<compile_context>
chip_gen: v5e
topology: v5e:2x2
jax: 0.10.0
libtpu: 0.0.40
codegen_flags: <defaults>
</compile_context>

<pallas_src>
import jax
import jax.numpy as jnp
from jax.experimental import pallas as pl
from jax.experimental.pallas import tpu as pltpu

IN_DIM = 28 * 28      # 784 (full-dim block, no pad needed)
H1 = 384              # 300 padded to lane multiple
H2 = 128              # 100 padded
H3 = 128              # 100 padded
OUT_REAL = 10         # real logits written to HBM
OUT_PAD = 128         # lane-dense width used for the fc4 matmul / softmax reduce
MASK_VAL = -1e30      # baked into padded b4 columns (python float, NOT a captured array)


def mlp_kernel(x_ref, w1_ref, b1_ref, w2_ref, b2_ref, w3_ref, b3_ref,
               w4_ref, b4_ref, o_ref):
    # fc1 + relu  (cast x tile to bf16 in-kernel; f32 accumulate)
    x = x_ref[...].astype(jnp.bfloat16)
    h = jnp.dot(x, w1_ref[...], preferred_element_type=jnp.float32)
    h = jnp.maximum(h + b1_ref[...], 0.0)
    # fc2 + relu
    h = jnp.dot(h.astype(jnp.bfloat16), w2_ref[...],
                preferred_element_type=jnp.float32)
    h = jnp.maximum(h + b2_ref[...], 0.0)
    # fc3 + relu
    h = jnp.dot(h.astype(jnp.bfloat16), w3_ref[...],
                preferred_element_type=jnp.float32)
    h = jnp.maximum(h + b3_ref[...], 0.0)
    # fc4 (no relu). Pad weight columns are zero and pad bias entries are -1e30,
    # so z[:, 10:] == -1e30: the 128-wide log_softmax equals the 10-wide one.
    z = jnp.dot(h.astype(jnp.bfloat16), w4_ref[...],
                preferred_element_type=jnp.float32)
    z = z + b4_ref[...]
    # Numerically stable log_softmax along last axis; store only the real 10 logits.
    m = jnp.max(z, axis=-1, keepdims=True)
    shifted = z - m
    lse = jnp.log(jnp.sum(jnp.exp(shifted), axis=-1, keepdims=True))
    o_ref[...] = (shifted[:, :OUT_REAL] - lse).astype(o_ref.dtype)


def net_forward(x, params, *, tb=512, x_buffers=2):
    """x: (B, 784) f32. params: padded/bf16 weights from prepare_params().
    Returns (B, 10) f32 log-probabilities."""
    B = x.shape[0]
    tb = min(tb, B)                       # block equal to full batch dim is always legal
    num_tiles = pl.cdiv(B, tb)            # partial final block handled by Pallas

    w1, b1 = params["w1"], params["b1"]
    w2, b2 = params["w2"], params["b2"]
    w3, b3 = params["w3"], params["b3"]
    w4, b4 = params["w4"], params["b4"]

    resident = lambda shape: pl.BlockSpec(shape, lambda i: (0, 0))

    if x_buffers == 2:
        x_spec = pl.BlockSpec((tb, IN_DIM), lambda i: (i, 0))
    else:
        # v6e tuning lever: deeper input buffering hides the per-tile x DMA.
        x_spec = pl.BlockSpec((tb, IN_DIM), lambda i: (i, 0),
                              pipeline_mode=pl.Buffered(x_buffers))

    out = pl.pallas_call(
        mlp_kernel,
        out_shape=jax.ShapeDtypeStruct((B, OUT_REAL), jnp.float32),
        grid=(num_tiles,),
        in_specs=[
            x_spec,                                   # batch-tiled f32 input
            resident(w1.shape), resident(b1.shape),   # VMEM-resident weights/biases
            resident(w2.shape), resident(b2.shape),
            resident(w3.shape), resident(b3.shape),
            resident(w4.shape), resident(b4.shape),
        ],
        out_specs=pl.BlockSpec((tb, OUT_REAL), lambda i: (i, 0)),
        compiler_params=pltpu.CompilerParams(
            dimension_semantics=("parallel",),
            vmem_limit_bytes=32 << 20,
        ),
    )(x, w1, b1, w2, b2, w3, b3, w4, b4)

    return out


def init_params(key):
    """Raw f32 params matching the torch Linear shapes (stored as (in, out))."""
    dims = [(IN_DIM, 300), (300, 100), (100, 100), (100, 10)]
    params = {}
    for i, (fan_in, fan_out) in enumerate(dims, start=1):
        key, kw, kb = jax.random.split(key, 3)
        bound = 1.0 / jnp.sqrt(fan_in)
        params[f"w{i}"] = jax.random.uniform(
            kw, (fan_in, fan_out), jnp.float32, -bound, bound)
        params[f"b{i}"] = jax.random.uniform(
            kb, (1, fan_out), jnp.float32, -bound, bound)
    return params


def _pad2(a, rows, cols, fill=0.0):
    r, c = a.shape
    return jnp.pad(a, ((0, rows - r), (0, cols - c)), constant_values=fill)


def prepare_params(raw):
    """Zero-pad to tile-friendly dims; weights -> bf16 (MXU), biases stay f32.
    b4 pad columns carry the -1e30 logit mask so the kernel needs no masking ops."""
    return {
        "w1": _pad2(raw["w1"], IN_DIM, H1).astype(jnp.bfloat16),
        "b1": _pad2(raw["b1"], 1, H1),
        "w2": _pad2(raw["w2"], H1, H2).astype(jnp.bfloat16),
        "b2": _pad2(raw["b2"], 1, H2),
        "w3": _pad2(raw["w3"], H2, H3).astype(jnp.bfloat16),
        "b3": _pad2(raw["b3"], 1, H3),
        "w4": _pad2(raw["w4"], H3, OUT_PAD).astype(jnp.bfloat16),
        "b4": _pad2(raw["b4"], 1, OUT_PAD, fill=MASK_VAL),
    }


def reference_forward(x, raw):
    """Pure-JAX f32 reference with the original (unpadded) weights."""
    h = x
    for i in (1, 2, 3):
        h = jnp.maximum(h @ raw[f"w{i}"] + raw[f"b{i}"], 0.0)
    z = h @ raw["w4"] + raw["b4"]
    return jax.nn.log_softmax(z, axis=-1)


if __name__ == "__main__":
    key = jax.random.PRNGKey(0)
    key, kx = jax.random.split(key)
    raw = init_params(key)
    params = prepare_params(raw)

    # Synthetic "MNIST batch": (B, 1, 28, 28) NCHW, flattened like v.view(-1, 784).
    # B=256 with tb=128 -> 2 grid steps: exercises the pipeline and keeps an even
    # tile count (v7x two-core balance) while staying small.
    B = 256
    imgs = jax.random.uniform(kx, (B, 1, 28, 28), jnp.float32)
    x = imgs.reshape(B, IN_DIM)

    out = net_forward(x, params, tb=128)
    out = jax.block_until_ready(out)

    ref = reference_forward(x, raw)
    assert out.shape == (B, OUT_REAL)
    # bf16 MXU operands (f32 accumulation) -> loosened tolerance vs f32 reference.
    max_err = float(jnp.max(jnp.abs(out - ref)))
    assert jnp.allclose(out, ref, atol=5e-2, rtol=5e-2), f"mismatch vs reference (max err {max_err})"

    print("KERNEL_OK")
</pallas_src>

<mosaic_0001>
module attributes {stable_mosaic.version = 11 : i64} {
  func.func @mlp_kernel(%arg0: i32, %arg1: memref<128x784xf32, #tpu.memory_space<vmem>>, %arg2: memref<784x384xbf16, #tpu.memory_space<vmem>>, %arg3: memref<1x384xf32, #tpu.memory_space<vmem>>, %arg4: memref<384x128xbf16, #tpu.memory_space<vmem>>, %arg5: memref<1x128xf32, #tpu.memory_space<vmem>>, %arg6: memref<128x128xbf16, #tpu.memory_space<vmem>>, %arg7: memref<1x128xf32, #tpu.memory_space<vmem>>, %arg8: memref<128x128xbf16, #tpu.memory_space<vmem>>, %arg9: memref<1x128xf32, #tpu.memory_space<vmem>>, %arg10: memref<128x10xf32, #tpu.memory_space<vmem>>) attributes {dimension_semantics = [#tpu.dimension_semantics<parallel>], iteration_bounds = array<i64: 2>, scalar_prefetch = 0 : i64, scratch_operands = 0 : i64, tpu.core_type = #tpu.core_type<tc>, window_params = [{transform_indices = @transform_0, window_bounds = array<i64: 128, 784>}, {pipeline_mode = #tpu.pipeline_mode<synchronous>, transform_indices = @transform_1, window_bounds = array<i64: 784, 384>}, {pipeline_mode = #tpu.pipeline_mode<synchronous>, transform_indices = @transform_2, window_bounds = array<i64: 1, 384>}, {pipeline_mode = #tpu.pipeline_mode<synchronous>, transform_indices = @transform_3, window_bounds = array<i64: 384, 128>}, {pipeline_mode = #tpu.pipeline_mode<synchronous>, transform_indices = @transform_4, window_bounds = array<i64: 1, 128>}, {pipeline_mode = #tpu.pipeline_mode<synchronous>, transform_indices = @transform_5, window_bounds = array<i64: 128, 128>}, {pipeline_mode = #tpu.pipeline_mode<synchronous>, transform_indices = @transform_6, window_bounds = array<i64: 1, 128>}, {pipeline_mode = #tpu.pipeline_mode<synchronous>, transform_indices = @transform_7, window_bounds = array<i64: 128, 128>}, {pipeline_mode = #tpu.pipeline_mode<synchronous>, transform_indices = @transform_8, window_bounds = array<i64: 1, 128>}, {transform_indices = @transform_9, window_bounds = array<i64: 128, 10>}]} {
    %c0 = arith.constant 0 : index
    %c0_0 = arith.constant 0 : index
    %0 = vector.load %arg1[%c0, %c0_0] : memref<128x784xf32, #tpu.memory_space<vmem>>, vector<128x784xf32>
    %1 = arith.truncf %0 : vector<128x784xf32> to vector<128x784xbf16>
    %c0_1 = arith.constant 0 : index
    %c0_2 = arith.constant 0 : index
    %2 = vector.load %arg2[%c0_1, %c0_2] : memref<784x384xbf16, #tpu.memory_space<vmem>>, vector<784x384xbf16>
    %cst = arith.constant dense<0.000000e+00> : vector<128x384xf32>
    %3 = tpu.matmul %1, %2, %cst {dimension_numbers = #tpu.dot_dimension_numbers<[1], [0], [0], [1], [0, 0, 1, 1], [], []>} : vector<128x784xbf16>, vector<784x384xbf16>, vector<128x384xf32> -> vector<128x384xf32>
    %c0_3 = arith.constant 0 : index
    %c0_4 = arith.constant 0 : index
    %4 = vector.load %arg3[%c0_3, %c0_4] : memref<1x384xf32, #tpu.memory_space<vmem>>, vector<1x384xf32>
    %5 = vector.broadcast %4 : vector<1x384xf32> to vector<128x384xf32>
    %6 = arith.addf %3, %5 : vector<128x384xf32>
    %cst_5 = arith.constant 0.000000e+00 : f32
    %7 = vector.broadcast %cst_5 : f32 to vector<128x384xf32>
    %8 = arith.maximumf %6, %7 : vector<128x384xf32>
    %9 = arith.truncf %8 : vector<128x384xf32> to vector<128x384xbf16>
    %c0_6 = arith.constant 0 : index
    %c0_7 = arith.constant 0 : index
    %10 = vector.load %arg4[%c0_6, %c0_7] : memref<384x128xbf16, #tpu.memory_space<vmem>>, vector<384x128xbf16>
    %cst_8 = arith.constant dense<0.000000e+00> : vector<128x128xf32>
    %11 = tpu.matmul %9, %10, %cst_8 {dimension_numbers = #tpu.dot_dimension_numbers<[1], [0], [0], [1], [0, 0, 1, 1], [], []>} : vector<128x384xbf16>, vector<384x128xbf16>, vector<128x128xf32> -> vector<128x128xf32>
    %c0_9 = arith.constant 0 : index
    %c0_10 = arith.constant 0 : index
    %12 = vector.load %arg5[%c0_9, %c0_10] : memref<1x128xf32, #tpu.memory_space<vmem>>, vector<1x128xf32>
    %13 = vector.broadcast %12 : vector<1x128xf32> to vector<128x128xf32>
    %14 = arith.addf %11, %13 : vector<128x128xf32>
    %cst_11 = arith.constant 0.000000e+00 : f32
    %15 = vector.broadcast %cst_11 : f32 to vector<128x128xf32>
    %16 = arith.maximumf %14, %15 : vector<128x128xf32>
    %17 = arith.truncf %16 : vector<128x128xf32> to vector<128x128xbf16>
    %c0_12 = arith.constant 0 : index
    %c0_13 = arith.constant 0 : index
    %18 = vector.load %arg6[%c0_12, %c0_13] : memref<128x128xbf16, #tpu.memory_space<vmem>>, vector<128x128xbf16>
    %cst_14 = arith.constant dense<0.000000e+00> : vector<128x128xf32>
    %19 = tpu.matmul %17, %18, %cst_14 {dimension_numbers = #tpu.dot_dimension_numbers<[1], [0], [0], [1], [0, 0, 1, 1], [], []>} : vector<128x128xbf16>, vector<128x128xbf16>, vector<128x128xf32> -> vector<128x128xf32>
    %c0_15 = arith.constant 0 : index
    %c0_16 = arith.constant 0 : index
    %20 = vector.load %arg7[%c0_15, %c0_16] : memref<1x128xf32, #tpu.memory_space<vmem>>, vector<1x128xf32>
    %21 = vector.broadcast %20 : vector<1x128xf32> to vector<128x128xf32>
    %22 = arith.addf %19, %21 : vector<128x128xf32>
    %cst_17 = arith.constant 0.000000e+00 : f32
    %23 = vector.broadcast %cst_17 : f32 to vector<128x128xf32>
    %24 = arith.maximumf %22, %23 : vector<128x128xf32>
    %25 = arith.truncf %24 : vector<128x128xf32> to vector<128x128xbf16>
    %c0_18 = arith.constant 0 : index
    %c0_19 = arith.constant 0 : index
    %26 = vector.load %arg8[%c0_18, %c0_19] : memref<128x128xbf16, #tpu.memory_space<vmem>>, vector<128x128xbf16>
    %cst_20 = arith.constant dense<0.000000e+00> : vector<128x128xf32>
    %27 = tpu.matmul %25, %26, %cst_20 {dimension_numbers = #tpu.dot_dimension_numbers<[1], [0], [0], [1], [0, 0, 1, 1], [], []>} : vector<128x128xbf16>, vector<128x128xbf16>, vector<128x128xf32> -> vector<128x128xf32>
    %c0_21 = arith.constant 0 : index
    %c0_22 = arith.constant 0 : index
    %28 = vector.load %arg9[%c0_21, %c0_22] : memref<1x128xf32, #tpu.memory_space<vmem>>, vector<1x128xf32>
    %29 = vector.broadcast %28 : vector<1x128xf32> to vector<128x128xf32>
    %30 = arith.addf %27, %29 : vector<128x128xf32>
    %cst_23 = arith.constant dense<0xFF800000> : vector<128xf32>
    %31 = vector.multi_reduction <maximumf>, %30, %cst_23 [1] : vector<128x128xf32> to vector<128xf32>
    %32 = vector.shape_cast %31 : vector<128xf32> to vector<128x1xf32>
    %33 = vector.broadcast %32 : vector<128x1xf32> to vector<128x128xf32>
    %34 = arith.subf %30, %33 : vector<128x128xf32>
    %35 = math.exp %34 : vector<128x128xf32>
    %cst_24 = arith.constant dense<0.000000e+00> : vector<128xf32>
    %36 = vector.multi_reduction <add>, %35, %cst_24 [1] : vector<128x128xf32> to vector<128xf32>
    %37 = vector.shape_cast %36 : vector<128xf32> to vector<128x1xf32>
    %38 = math.log %37 : vector<128x1xf32>
    %39 = vector.extract_strided_slice %34 {offsets = [0, 0], sizes = [128, 10], strides = [1, 1]} : vector<128x128xf32> to vector<128x10xf32>
    %40 = vector.broadcast %38 : vector<128x1xf32> to vector<128x10xf32>
    %41 = arith.subf %39, %40 : vector<128x10xf32>
    %c0_25 = arith.constant 0 : index
    %c0_26 = arith.constant 0 : index
    %42 = vector.load %arg10[%c0_25, %c0_26] : memref<128x10xf32, #tpu.memory_space<vmem>>, vector<128x10xf32>
    tpu.vector_store %arg10[%c0_25, %c0_26], %41 {strides = array<i32>} : memref<128x10xf32, #tpu.memory_space<vmem>>, vector<128x10xf32>,
    return
  }
  func.func @transform_0(%arg0: i32) -> (i32, i32) {
    %c0_i32 = arith.constant 0 : i32
    %c0_i32_0 = arith.constant 0 : i32
    return %arg0, %c0_i32 : i32, i32
  }
  func.func @transform_1(%arg0: i32) -> (i32, i32) {
    %c0_i32 = arith.constant 0 : i32
    %c0_i32_0 = arith.constant 0 : i32
    %c0_i32_1 = arith.constant 0 : i32
    return %c0_i32, %c0_i32_0 : i32, i32
  }
  func.func @transform_2(%arg0: i32) -> (i32, i32) {
    %c0_i32 = arith.constant 0 : i32
    %c0_i32_0 = arith.constant 0 : i32
    %c0_i32_1 = arith.constant 0 : i32
    return %c0_i32, %c0_i32_0 : i32, i32
  }
  func.func @transform_3(%arg0: i32) -> (i32, i32) {
    %c0_i32 = arith.constant 0 : i32
    %c0_i32_0 = arith.constant 0 : i32
    %c0_i32_1 = arith.constant 0 : i32
    return %c0_i32, %c0_i32_0 : i32, i32
  }
  func.func @transform_4(%arg0: i32) -> (i32, i32) {
    %c0_i32 = arith.constant 0 : i32
    %c0_i32_0 = arith.constant 0 : i32
    %c0_i32_1 = arith.constant 0 : i32
    return %c0_i32, %c0_i32_0 : i32, i32
  }
  func.func @transform_5(%arg0: i32) -> (i32, i32) {
    %c0_i32 = arith.constant 0 : i32
    %c0_i32_0 = arith.constant 0 : i32
    %c0_i32_1 = arith.constant 0 : i32
    return %c0_i32, %c0_i32_0 : i32, i32
  }
  func.func @transform_6(%arg0: i32) -> (i32, i32) {
    %c0_i32 = arith.constant 0 : i32
    %c0_i32_0 = arith.constant 0 : i32
    %c0_i32_1 = arith.constant 0 : i32
    return %c0_i32, %c0_i32_0 : i32, i32
  }
  func.func @transform_7(%arg0: i32) -> (i32, i32) {
    %c0_i32 = arith.constant 0 : i32
    %c0_i32_0 = arith.constant 0 : i32
    %c0_i32_1 = arith.constant 0 : i32
    return %c0_i32, %c0_i32_0 : i32, i32
  }
  func.func @transform_8(%arg0: i32) -> (i32, i32) {
    %c0_i32 = arith.constant 0 : i32
    %c0_i32_0 = arith.constant 0 : i32
    %c0_i32_1 = arith.constant 0 : i32
    return %c0_i32, %c0_i32_0 : i32, i32
  }
  func.func @transform_9(%arg0: i32) -> (i32, i32) {
    %c0_i32 = arith.constant 0 : i32
    %c0_i32_0 = arith.constant 0 : i32
    return %arg0, %c0_i32 : i32, i32
  }
}

</mosaic_0001>

<bundles_post_ra>
// kernel: tpu_custom_call.1
= control target key start
LH: loop header
LB: loop body
LE: loop exit
PB: predicated region body
PF: predicated region fallthrough
CT: control target
= control target key end

     0   :  { %s4601_s30 = smov 0   ;;  %s6537_s0 = inlined_call_operand.vmem [shape: f32[256,784], index: 0, kind: input, shape index: {}]   ;;  %s6538_s1 = inlined_call_operand.vmem [shape: bf16[784,384], index: 1, kind: input, shape index: {}]   ;;  %s6539_s2 = inlined_call_operand.vmem [shape: f32[1,384], index: 2, kind: input, shape index: {}]   ;;  %s6540_s3 = inlined_call_operand.vmem [shape: bf16[384,128], index: 3, kind: input, shape index: {}]   ;;  %s6541_s4 = inlined_call_operand.vmem [shape: f32[1,128], index: 4, kind: input, shape index: {}]   ;;  %s6542_s5 = inlined_call_operand.vmem [shape: bf16[128,128], index: 5, kind: input, shape index: {}]   ;;  %s6543_s6 = inlined_call_operand.vmem [shape: f32[1,128], index: 6, kind: input, shape index: {}]   ;;  %s6544_s7 = inlined_call_operand.vmem [shape: bf16[128,128], index: 7, kind: input, shape index: {}]   ;;  %s6545_s8 = inlined_call_operand.vmem [shape: f32[1,128], index: 8, kind: input, shape index: {}]   ;;  %s6546_s9 = inlined_call_operand.vmem [shape: f32[256,10], index: 9, kind: output, shape index: {}]  }
   0x1 LB: > { %s3480_s10 = sadd.s32 4294967295, %s4549_s30   ;;  %p3484_p0 = scmp.ge.s32.totalorder %s4549_s30, 1  ;;  %s4549_s30 = sphi %s4601_s30, %s19_s30  }
   0x2   : > { %p289_p1 = scmp.lt.s32.totalorder %s4549_s30, 3 }
   0x4   : > { %p290_p2 = pnand %p3484_p0, %p289_p1 }
   0x6   : > { %293 = sbr.rel (%p290_p2) target bundleno = 1561 (0x619), region = 56 }
   0xb   : > { %v3575_v0 = vld [vmem:[%s6538_s1 + $0xa8] sm:$0xf]  ;;  %v4285_v1 = vld [vmem:[%s6538_s1 + $0xb0] sm:$0xf0]  ;;  %v3563_v5 = vld [vmem:[%s6538_s1 + $0x90] sm:$0xf] }
   0xc   : > { %v3671_v2 = vld [vmem:[%s6538_s1 + $0x168] sm:$0xf]  ;;  %v3576_v3 = vor.u32 %v4285_v1, %v3575_v0  ;;  %v4309_v4 = vld [vmem:[%s6538_s1 + $0x170] sm:$0xf0]  ;;  %v4282_v6 = vld [vmem:[%s6538_s1 + $0x98] sm:$0xf0] }
   0xd   : > { %v3672_v7 = vor.u32 %v4309_v4, %v3671_v2  ;;  %v3659_v8 = vld [vmem:[%s6538_s1 + $0x150] sm:$0xf]  ;;  %v4306_v9 = vld [vmem:[%s6538_s1 + $0x158] sm:$0xf0]  ;;  %v3564_v10 = vor.u32 %v4282_v6, %v3563_v5  ;;  %v3551_v12 = vld [vmem:[%s6538_s1 + $0x78] sm:$0xf] }
   0xe   : > { %4450 = vmatpush.bf16.msra.mxu2 %v3576_v3  ;;  %1521 = vmatpush.bf16.msra.mxu0 %v3576_v3  ;;  %v3660_v11 = vor.u32 %v4306_v9, %v3659_v8  ;;  %v4279_v13 = vld [vmem:[%s6538_s1 + $0x80] sm:$0xf0]  ;;  %v3647_v14 = vld [vmem:[%s6538_s1 + $0x138] sm:$0xf]  ;;  %v3539_v18 = vld [vmem:[%s6538_s1 + $0x60] sm:$0xf] }
   0xf   : > { %1570 = vmatpush.bf16.msra.mxu1 %v3672_v7  ;;  %4458 = vmatpush.bf16.msra.mxu3 %v3672_v7  ;;  %v4303_v15 = vld [vmem:[%s6538_s1 + $0x140] sm:$0xf0]  ;;  %v3552_v16 = vor.u32 %v4279_v13, %v3551_v12  ;;  %v4276_v19 = vld [vmem:[%s6538_s1 + $0x68] sm:$0xf0]  ;;  %v3635_v20 = vld [vmem:[%s6538_s1 + $0x120] sm:$0xf] }
  0x10   : > { %v3648_v17 = vor.u32 %v4303_v15, %v3647_v14  ;;  %v4300_v21 = vld [vmem:[%s6538_s1 + $0x128] sm:$0xf0]  ;;  %s3485_s24 = sshll.u32 %s3480_s10, 4  ;;  %v3540_v22 = vor.u32 %v4276_v19, %v3539_v18  ;;  %v3527_v24 = vld [vmem:[%s6538_s1 + $0x48] sm:$0xf]  ;;  %vm1496_vm0 = vcmask 130048  }
  0x11   : > { %p327_p3 = scmp.lt.s32.totalorder %s3485_s24, 31  ;;  %v3636_v23 = vor.u32 %v4300_v21, %v3635_v20  ;;  %v4273_v25 = vld [vmem:[%s6538_s1 + $0x50] sm:$0xf0]  ;;  %v3623_v26 = vld [vmem:[%s6538_s1 + $0x108] sm:$0xf]  ;;  %vm3407_vm1 = vcmask 80896  }
  0x12   : > { %4451 = vmatpush.bf16.msra.mxu2 %v3564_v10  ;;  %1522 = vmatpush.bf16.msra.mxu0 %v3564_v10  ;;  %v4297_v27 = vld [vmem:[%s6538_s1 + $0x110] sm:$0xf0]  ;;  %v3528_v28 = vor.u32 %v4273_v25, %v3527_v24  ;;  %v3515_v30 = vld [vmem:[%s6538_s1 + $0x30] sm:$0xf]  ;;  %v4270_v31 = vld [vmem:[%s6538_s1 + $0x38] sm:$0xf0] }
  0x13   : > { %1571 = vmatpush.bf16.msra.mxu1 %v3660_v11  ;;  %4459 = vmatpush.bf16.msra.mxu3 %v3660_v11  ;;  %s6692_s24 = smov (!%p327_p3, %s3485_s24), 31  ;;  %v3624_v29 = vor.u32 %v4297_v27, %v3623_v26  ;;  %v3611_v32 = vld [vmem:[%s6538_s1 + $0xf0] sm:$0xf]  ;;  %v4294_v33 = vld [vmem:[%s6538_s1 + $0xf8] sm:$0xf0]  ;;  %v3516_v34 = vor.u32 %v4270_v31, %v3515_v30 }
  0x14   : > { %s4466_s21 = smul.u32 56, %s6692_s24  ;;  %v3612_v35 = vor.u32 %v4294_v33, %v3611_v32  ;;  %v3503_v36 = vld [vmem:[%s6538_s1 + $0x18] sm:$0xf]  ;;  %v4267_v37 = vld [vmem:[%s6538_s1 + $0x20] sm:$0xf0]  ;;  %s3488_s28 = sshll.u32 %s6692_s24, 3 }
  0x15   : > { %v3599_v38 = vld [vmem:[%s6538_s1 + $0xd8] sm:$0xf]  ;;  %v4291_v39 = vld [vmem:[%s6538_s1 + $0xe0] sm:$0xf0]  ;;  %v3504_v40 = vor.u32 %v4267_v37, %v3503_v36  ;;  %v3491_v41 = vld [vmem:[%s6538_s1] sm:$0xf]  ;;  %s6484_s10 = scalar_lea.vmem %s6546_s9, %s3488_s28 }
  0x16   : > { %4452 = vmatpush.bf16.msra.mxu2 %v3552_v16  ;;  %1523 = vmatpush.bf16.msra.mxu0 %v3552_v16  ;;  %s4704_s15 = scalar_lea.vmem %s6537_s0, %s4466_s21  ;;  %v3600_v42 = vor.u32 %v4291_v39, %v3599_v38  ;;  %v4264_v43 = vld [vmem:[%s6538_s1 + $0x8] sm:$0xf0]  ;;  %v3587_v44 = vld [vmem:[%s6538_s1 + $0xc0] sm:$0xf]  ;;  %v3767_v46 = vld [vmem:[%s6538_s1 + $0x228] sm:$0xf] }
  0x17   : > { %1572 = vmatpush.bf16.msra.mxu1 %v3648_v17  ;;  %4460 = vmatpush.bf16.msra.mxu3 %v3648_v17  ;;  %v4288_v45 = vld [vmem:[%s6538_s1 + $0xc8] sm:$0xf0]  ;;  %v4333_v47 = vld [vmem:[%s6538_s1 + $0x230] sm:$0xf0]  ;;  %v3863_v48 = vld [vmem:[%s6538_s1 + $0x2e8] sm:$0xf]  ;;  %v3492_v52 = vor.u32 %v4264_v43, %v3491_v41 }
  0x18   : > { %v396_v49 = vld [vmem:[%s4704_s15 + $0x1c0] sm:$0xff]  ;;  %v403_v50 = vld [vmem:[%s4704_s15 + $0x1f8] sm:$0xff]  ;;  %v4357_v51 = vld [vmem:[%s6538_s1 + $0x2f0] sm:$0xf0]  ;;  %v3588_v56 = vor.u32 %v4288_v45, %v3587_v44  ;;  %v3768_v60 = vor.u32 %v4333_v47, %v3767_v46 }
  0x19   : > { %v341_v53 = vld [vmem:[%s4704_s15 + $0x8] sm:$0xff]  ;;  %v340_v54 = vld [vmem:[%s4704_s15] sm:$0xff]  ;;  %v347_v55 = vld [vmem:[%s4704_s15 + $0x38] sm:$0xff]  ;;  %v3864_v61 = vor.u32 %v4357_v51, %v3863_v48  ;;  %v4744_v1 = vpack.c.bf16 %v403_v50, %v396_v49 }
  0x1a   : > { %4453 = vmatpush.bf16.msra.mxu2 %v3540_v22  ;;  %1524 = vmatpush.bf16.msra.mxu0 %v3540_v22  ;;  %v348_v57 = vld [vmem:[%s4704_s15 + $0x40] sm:$0xff]  ;;  %v397_v58 = vld [vmem:[%s4704_s15 + $0x1c8] sm:$0xff]  ;;  %v3755_v62 = vld [vmem:[%s6538_s1 + $0x210] sm:$0xf]  ;;  %v4746_v2 = vpack.c.bf16 %v347_v55, %v340_v54 }
  0x1b   : > { %1573 = vmatpush.bf16.msra.mxu1 %v3636_v23  ;;  %4461 = vmatpush.bf16.msra.mxu3 %v3636_v23  ;;  %v404_v59 = vld [vmem:[%s4704_s15 + $0x200] sm:$0xff]  ;;  %v3959_v63 = vld [vmem:[%s6538_s1 + $0x3a8] sm:$0xf]  ;;  %v4381_v0 = vld [vmem:[%s6538_s1 + $0x3b0] sm:$0xf0]  ;;  %v4757_v6 = vpack.c.bf16 %v348_v57, %v341_v53 }
  0x1c   : > { %6598 = vst [vmem:[#allocation2_spill] sm:$0xff] %v4746_v2  ;;  %v4330_v3 = vld [vmem:[%s6538_s1 + $0x218] sm:$0xf0]  ;;  %v3851_v4 = vld [vmem:[%s6538_s1 + $0x2d0] sm:$0xf]  ;;  %v4759_v7 = vpack.c.bf16 %v404_v59, %v397_v58  ;;  %v3960_v8 = vor.u32 %v4381_v0, %v3959_v63  ;;  %v417_v39 = vld [vmem:[%s4704_s15 + $0x268] sm:$0xff] }
  0x1d   : > { %v4354_v5 = vld [vmem:[%s6538_s1 + $0x2d8] sm:$0xf0]  ;;  %6599 = vst [vmem:[#allocation3_spill] sm:$0xff] %v4757_v6  ;;  %v3743_v9 = vld [vmem:[%s6538_s1 + $0x1f8] sm:$0xf]  ;;  %v3756_v11 = vor.u32 %v4330_v3, %v3755_v62  ;;  %v410_v38 = vld [vmem:[%s4704_s15 + $0x230] sm:$0xff] }
  0x1e   : > { %4454 = vmatpush.bf16.msra.mxu2 %v3528_v28  ;;  %1525 = vmatpush.bf16.msra.mxu0 %v3528_v28  ;;  %6600 = vst [vmem:[#allocation4_spill] sm:$0xff] %v4759_v7  ;;  %v3947_v10 = vld [vmem:[%s6538_s1 + $0x390] sm:$0xf]  ;;  %v3852_v12 = vor.u32 %v4354_v5, %v3851_v4  ;;  %v4378_v13 = vld [vmem:[%s6538_s1 + $0x398] sm:$0xf0]  ;;  %v361_v50 = vld [vmem:[%s4704_s15 + $0xa8] sm:$0xff] }
  0x1f   : > { %1574 = vmatpush.bf16.msra.mxu1 %v3624_v29  ;;  %4462 = vmatpush.bf16.msra.mxu3 %v3624_v29  ;;  %v4055_v14 = vld [vmem:[%s6538_s1 + $0x468] sm:$0xf]  ;;  %v4405_v15 = vld [vmem:[%s6538_s1 + $0x470] sm:$0xf0]  ;;  %v4327_v16 = vld [vmem:[%s6538_s1 + $0x200] sm:$0xf0]  ;;  %v3948_v20 = vor.u32 %v4378_v13, %v3947_v10 }
  0x20   : > { %v3839_v17 = vld [vmem:[%s6538_s1 + $0x2b8] sm:$0xf]  ;;  %v4351_v18 = vld [vmem:[%s6538_s1 + $0x2c0] sm:$0xf0]  ;;  %v4056_v19 = vor.u32 %v4405_v15, %v4055_v14  ;;  %v3731_v21 = vld [vmem:[%s6538_s1 + $0x1e0] sm:$0xf]  ;;  %v3744_v25 = vor.u32 %v4327_v16, %v3743_v9 }
  0x21   : > { %v4324_v22 = vld [vmem:[%s6538_s1 + $0x1e8] sm:$0xf0]  ;;  %v3827_v23 = vld [vmem:[%s6538_s1 + $0x2a0] sm:$0xf]  ;;  %v3935_v24 = vld [vmem:[%s6538_s1 + $0x378] sm:$0xf]  ;;  %v3840_v26 = vor.u32 %v4351_v18, %v3839_v17 }
  0x22   : > { %4455 = vmatpush.bf16.msra.mxu2 %v3516_v34  ;;  %1526 = vmatpush.bf16.msra.mxu0 %v3516_v34  ;;  %v4375_v27 = vld [vmem:[%s6538_s1 + $0x380] sm:$0xf0]  ;;  %v4043_v28 = vld [vmem:[%s6538_s1 + $0x450] sm:$0xf]  ;;  %v4402_v29 = vld [vmem:[%s6538_s1 + $0x458] sm:$0xf0] }
  0x23   : > { %1575 = vmatpush.bf16.msra.mxu1 %v3612_v35  ;;  %4463 = vmatpush.bf16.msra.mxu3 %v3612_v35  ;;  %v4348_v30 = vld [vmem:[%s6538_s1 + $0x2a8] sm:$0xf0]  ;;  %v4044_v31 = vor.u32 %v4402_v29, %v4043_v28  ;;  %v4031_v32 = vld [vmem:[%s6538_s1 + $0x438] sm:$0xf]  ;;  %v4399_v33 = vld [vmem:[%s6538_s1 + $0x440] sm:$0xf0]  ;;  %v3936_v34 = vor.u32 %v4375_v27, %v3935_v24 }
  0x24   : > { %v3719_v35 = vld [vmem:[%s6538_s1 + $0x1c8] sm:$0xf]  ;;  %v3923_v36 = vld [vmem:[%s6538_s1 + $0x360] sm:$0xf]  ;;  %v4032_v37 = vor.u32 %v4399_v33, %v4031_v32  ;;  %v3828_v41 = vor.u32 %v4348_v30, %v3827_v23  ;;  %v4396_v44 = vld [vmem:[%s6538_s1 + $0x428] sm:$0xf0] }
  0x25   : > { %v4019_v43 = vld [vmem:[%s6538_s1 + $0x420] sm:$0xf]  ;;  %v4321_v45 = vld [vmem:[%s6538_s1 + $0x1d0] sm:$0xf0]  ;;  %v3815_v46 = vld [vmem:[%s6538_s1 + $0x288] sm:$0xf] }
  0x26   : > { %4456 = vmatpush.bf16.msra.mxu2 %v3504_v40  ;;  %1527 = vmatpush.bf16.msra.mxu0 %v3504_v40  ;;  %v3732_v40 = vor.u32 %v4324_v22, %v3731_v21  ;;  %v4345_v47 = vld [vmem:[%s6538_s1 + $0x290] sm:$0xf0]  ;;  %v355_v48 = vld [vmem:[%s4704_s15 + $0x78] sm:$0xff]  ;;  %v4020_v55 = vor.u32 %v4396_v44, %v4019_v43  ;;  %v3707_v58 = vld [vmem:[%s6538_s1 + $0x1b0] sm:$0xf] }
  0x27   : > { %1576 = vmatpush.bf16.msra.mxu1 %v3600_v42  ;;  %4464 = vmatpush.bf16.msra.mxu3 %v3600_v42  ;;  %v4372_v42 = vld [vmem:[%s6538_s1 + $0x368] sm:$0xf0]  ;;  %v354_v49 = vld [vmem:[%s4704_s15 + $0x70] sm:$0xff]  ;;  %v3816_v57 = vor.u32 %v4345_v47, %v3815_v46  ;;  %v3911_v59 = vld [vmem:[%s6538_s1 + $0x348] sm:$0xf] }
  0x28   : > { %v362_v51 = vld [vmem:[%s4704_s15 + $0xb0] sm:$0xff]  ;;  %v3924_v54 = vor.u32 %v4372_v42, %v3923_v36  ;;  %v4862_v62 = vpack.c.bf16 %v361_v50, %v354_v49  ;;  %v4318_v63 = vld [vmem:[%s6538_s1 + $0x1b8] sm:$0xf0]  ;;  %v3695_v14 = vld [vmem:[%s6538_s1 + $0x198] sm:$0xf] }
  0x29   : > { %v418_v53 = vld [vmem:[%s4704_s15 + $0x270] sm:$0xff]  ;;  %v4342_v3 = vld [vmem:[%s6538_s1 + $0x278] sm:$0xf0]  ;;  %v4873_v4 = vpack.c.bf16 %v362_v51, %v355_v48  ;;  %v3708_v9 = vor.u32 %v4318_v63, %v3707_v58  ;;  %v4315_v15 = vld [vmem:[%s6538_s1 + $0x1a0] sm:$0xf0] }
  0x2a   : > { %4457 = vmatpush.bf16.msra.mxu2 %v3492_v52  ;;  %1528 = vmatpush.bf16.msra.mxu0 %v3492_v52  ;;  %v411_v52 = vld [vmem:[%s4704_s15 + $0x238] sm:$0xff]  ;;  %v3803_v0 = vld [vmem:[%s6538_s1 + $0x270] sm:$0xf]  ;;  %v4339_v17 = vld [vmem:[%s6538_s1 + $0x260] sm:$0xf0] }
  0x2b   : > { %1577 = vmatpush.bf16.msra.mxu1 %v3588_v56  ;;  %4465 = vmatpush.bf16.msra.mxu3 %v3588_v56  ;;  %v3720_v56 = vor.u32 %v4321_v45, %v3719_v35  ;;  %6601 = vst [vmem:[#allocation5_spill] sm:$0xff] %v4873_v4  ;;  %v4875_v5 = vpack.c.bf16 %v418_v53, %v411_v52  ;;  %v3791_v16 = vld [vmem:[%s6538_s1 + $0x258] sm:$0xf]  ;;  %v3899_v18 = vld [vmem:[%s6538_s1 + $0x330] sm:$0xf]  ;;  %v424_v42 = vld [vmem:[%s4704_s15 + $0x2a0] sm:$0xff] }
  0x2c   : > { %v3804_v10 = vor.u32 %v4342_v3, %v3803_v0  ;;  %v3792_v21 = vor.u32 %v4339_v17, %v3791_v16  ;;  %v3995_v23 = vld [vmem:[%s6538_s1 + $0x3f0] sm:$0xf]  ;;  %v4390_v24 = vld [vmem:[%s6538_s1 + $0x3f8] sm:$0xf0]  ;;  %v4312_v27 = vld [vmem:[%s6538_s1 + $0x188] sm:$0xf0] }
  0x2d   : > { %1549 = vmatmul.bf16.vlgmr.msra.gmra.mxu2 %v4744_v1  ;;  %1529 = vmatmul.bf16.vlgmr.msra.gmra.mxu0 %v4746_v2  ;;  %6602 = vst [vmem:[#allocation6_spill] sm:$0xff] %v4875_v5  ;;  %v3983_v28 = vld [vmem:[%s6538_s1 + $0x3d8] sm:$0xf]  ;;  %v4387_v29 = vld [vmem:[%s6538_s1 + $0x3e0] sm:$0xf0]  ;;  %v369_v44 = vld [vmem:[%s4704_s15 + $0xe8] sm:$0xff] }
  0x2e   : > { %1619 = vmatpush.bf16.msrb.mxu2 %v3768_v60  ;;  %1578 = vmatmul.bf16.vlgmr.msra.gmra.mxu1 %v4757_v6  ;;  %v4369_v60 = vld [vmem:[%s6538_s1 + $0x350] sm:$0xf0]  ;;  %v3779_v30 = vld [vmem:[%s6538_s1 + $0x240] sm:$0xf]  ;;  %v3887_v32 = vld [vmem:[%s6538_s1 + $0x318] sm:$0xf]  ;;  %v3984_v33 = vor.u32 %v4387_v29, %v3983_v28 }
  0x2f   : > { %1668 = vmatpush.bf16.msrb.mxu3 %v3864_v61  ;;  %1717 = vmatpush.bf16.msrb.mxu0 %v3960_v8  ;;  %v4860_v61 = vpack.c.bf16 %v417_v39, %v410_v38  ;;  %v3912_v8 = vor.u32 %v4369_v60, %v3911_v59  ;;  %v3971_v35 = vld [vmem:[%s6538_s1 + $0x3c0] sm:$0xf]  ;;  %v4384_v39 = vld [vmem:[%s6538_s1 + $0x3c8] sm:$0xf0]  ;;  %v431_v43 = vld [vmem:[%s4704_s15 + $0x2d8] sm:$0xff] }
  0x30   : > { %1598 = vmatmul.bf16.vlgmr.msra.gmra.mxu3 %v4759_v7  ;;  %1766 = vmatpush.bf16.msrb.mxu1 %v4056_v19  ;;  %v4366_v19 = vld [vmem:[%s6538_s1 + $0x338] sm:$0xf0]  ;;  %v368_v45 = vld [vmem:[%s4704_s15 + $0xe0] sm:$0xff]  ;;  %v425_v48 = vld [vmem:[%s4704_s15 + $0x2a8] sm:$0xff]  ;;  %v3972_v50 = vor.u32 %v4384_v39, %v3971_v35  ;;  %v4955_v52 = vpack.c.bf16 %v431_v43, %v424_v42 }
  0x31   : > { %v3900_v22 = vor.u32 %v4366_v19, %v3899_v18  ;;  %v375_v46 = vld [vmem:[%s4704_s15 + $0x118] sm:$0xff]  ;;  %v376_v47 = vld [vmem:[%s4704_s15 + $0x120] sm:$0xff]  ;;  %v4284_v58 = vld [vmem:[%s6538_s1 + $0xac] sm:$0xf] }
  0x32   : > { %1620 = vmatpush.bf16.msrb.mxu2 %v3756_v11  ;;  %v4007_v11 = vld [vmem:[%s6538_s1 + $0x408] sm:$0xf]  ;;  %v432_v49 = vld [vmem:[%s4704_s15 + $0x2e0] sm:$0xff]  ;;  %6603 = vst [vmem:[#allocation7_spill] sm:$0xff] %v4955_v52  ;;  %v4957_v53 = vpack.c.bf16 %v375_v46, %v368_v45  ;;  %v3577_v60 = vld [vmem:[%s6538_s1 + $0xb4] sm:$0xf0] }
  0x33   : > { %1669 = vmatpush.bf16.msrb.mxu3 %v3852_v12  ;;  %1718 = vmatpush.bf16.msrb.mxu0 %v3948_v20  ;;  %v4393_v12 = vld [vmem:[%s6538_s1 + $0x410] sm:$0xf0]  ;;  %v3696_v20 = vor.u32 %v4315_v15, %v3695_v14  ;;  %v4308_v63 = vld [vmem:[%s6538_s1 + $0x16c] sm:$0xf]  ;;  %v3673_v0 = vld [vmem:[%s6538_s1 + $0x174] sm:$0xf0]  ;;  %v3580_v3 = vor.u32 %v4284_v58, %v3577_v60 }
  0x34   : > { %1767 = vmatpush.bf16.msrb.mxu1 %v4044_v31  ;;  %v4008_v13 = vor.u32 %v4393_v12, %v4007_v11  ;;  %v4336_v31 = vld [vmem:[%s6538_s1 + $0x248] sm:$0xf0]  ;;  %v383_v11 = vld [vmem:[%s4704_s15 + $0x158] sm:$0xff]  ;;  %v382_v12 = vld [vmem:[%s4704_s15 + $0x150] sm:$0xff] }
  0x35   : > { %v390_v14 = vld [vmem:[%s4704_s15 + $0x190] sm:$0xff]  ;;  %v439_v15 = vld [vmem:[%s4704_s15 + $0x318] sm:$0xff]  ;;  %v349_v28 = vld [vmem:[%s4704_s15 + $0x48] sm:$0xff] }
  0x36   : > { %1621 = vmatpush.bf16.msrb.mxu2 %v3744_v25  ;;  %v3683_v25 = vld [vmem:[%s6538_s1 + $0x180] sm:$0xf]  ;;  %v446_v16 = vld [vmem:[%s4704_s15 + $0x350] sm:$0xff]  ;;  %v4997_v19 = vpack.c.bf16 %v390_v14, %v383_v11  ;;  %v343_v29 = vld [vmem:[%s4704_s15 + $0x18] sm:$0xff] }
  0x37   : > { %1670 = vmatpush.bf16.msrb.mxu3 %v3840_v26  ;;  %1719 = vmatpush.bf16.msrb.mxu0 %v3936_v34  ;;  %v3996_v26 = vor.u32 %v4390_v24, %v3995_v23  ;;  %v4363_v34 = vld [vmem:[%s6538_s1 + $0x320] sm:$0xf0]  ;;  %v3684_v36 = vor.u32 %v4312_v27, %v3683_v25  ;;  %v4305_v23 = vld [vmem:[%s6538_s1 + $0x154] sm:$0xf]  ;;  %v3661_v25 = vld [vmem:[%s6538_s1 + $0x15c] sm:$0xf0] }
  0x38   : > { %1768 = vmatpush.bf16.msrb.mxu1 %v4032_v37  ;;  %v3780_v37 = vor.u32 %v4336_v31, %v3779_v30  ;;  %v3888_v38 = vor.u32 %v4363_v34, %v3887_v32  ;;  %6606 = vst [vmem:[#allocation10_spill] sm:$0xff] %v4997_v19  ;;  %v342_v27 = vld [vmem:[%s4704_s15 + $0x10] sm:$0xff]  ;;  %v344_v30 = vld [vmem:[%s4704_s15 + $0x20] sm:$0xff]  ;;  %v351_v31 = vld [vmem:[%s4704_s15 + $0x58] sm:$0xff] }
  0x39   : > { %v350_v32 = vld [vmem:[%s4704_s15 + $0x50] sm:$0xff]  ;;  %v352_v34 = vld [vmem:[%s4704_s15 + $0x60] sm:$0xff]  ;;  %v5025_v35 = vpack.c.bf16 %v349_v28, %v342_v27  ;;  %v4278_v39 = vld [vmem:[%s6538_s1 + $0x7c] sm:$0xf] }
  0x3a   : > { %1622 = vmatpush.bf16.msrb.mxu2 %v3732_v40  ;;  %v3875_v40 = vld [vmem:[%s6538_s1 + $0x300] sm:$0xf]  ;;  %v3649_v43 = vld [vmem:[%s6538_s1 + $0x144] sm:$0xf0]  ;;  %v363_v46 = vld [vmem:[%s4704_s15 + $0xb8] sm:$0xff] }
  0x3b   : > { %1671 = vmatpush.bf16.msrb.mxu3 %v3828_v41  ;;  %1720 = vmatpush.bf16.msrb.mxu0 %v3924_v54  ;;  %v4360_v41 = vld [vmem:[%s6538_s1 + $0x308] sm:$0xf0]  ;;  %v4959_v54 = vpack.c.bf16 %v376_v47, %v369_v44  ;;  %6607 = vst [vmem:[#allocation11_spill] sm:$0xff] %v5025_v35  ;;  %v356_v45 = vld [vmem:[%s4704_s15 + $0x80] sm:$0xff]  ;;  %v370_v11 = vld [vmem:[%s4704_s15 + $0xf0] sm:$0xff] }
  0x3c   : > { %1769 = vmatpush.bf16.msrb.mxu1 %v4020_v55  ;;  %v3876_v51 = vor.u32 %v4360_v41, %v3875_v40  ;;  %v4961_v55 = vpack.c.bf16 %v432_v49, %v425_v48  ;;  %v3553_v40 = vld [vmem:[%s6538_s1 + $0x84] sm:$0xf0]  ;;  %v4302_v41 = vld [vmem:[%s6538_s1 + $0x13c] sm:$0xf]  ;;  %v358_v48 = vld [vmem:[%s4704_s15 + $0x90] sm:$0xff] }
  0x3d   : > { %1554 = vmatmul.bf16.gmra.mxu2 %v4860_v61  ;;  %1534 = vmatmul.bf16.gmra.mxu0 %v4862_v62  ;;  %6604 = vst [vmem:[#allocation8_spill] sm:$0xff] %v4959_v54  ;;  %v3556_v42 = vor.u32 %v4278_v39, %v3553_v40  ;;  %v3652_v44 = vor.u32 %v4302_v41, %v3649_v43  ;;  %v357_v47 = vld [vmem:[%s4704_s15 + $0x88] sm:$0xff]  ;;  %v372_v14 = vld [vmem:[%s4704_s15 + $0x100] sm:$0xff]  ;;  %v3529_v28 = vld [vmem:[%s6538_s1 + $0x54] sm:$0xf0] }
  0x3e   : > { %1623 = vmatpush.bf16.msrb.mxu2 %v3720_v56  ;;  %1583 = vmatmul.bf16.gmra.mxu1 %v4873_v4  ;;  %6605 = vst [vmem:[#allocation9_spill] sm:$0xff] %v4961_v55  ;;  %v4067_v56 = vld [vmem:[%s6538_s1 + $0x480] sm:$0xf]  ;;  %v365_v49 = vld [vmem:[%s4704_s15 + $0xc8] sm:$0xff]  ;;  %v386_v40 = vld [vmem:[%s4704_s15 + $0x170] sm:$0xff] }
  0x3f   : > { %1672 = vmatpush.bf16.msrb.mxu3 %v3816_v57  ;;  %1721 = vmatpush.bf16.msrb.mxu0 %v3912_v8  ;;  %v4408_v57 = vld [vmem:[%s6538_s1 + $0x488] sm:$0xf0]  ;;  %v3676_v8 = vor.u32 %v4308_v63, %v3673_v0  ;;  %v5059_v58 = vpack.c.bf16 %v365_v49, %v358_v48  ;;  %v4275_v63 = vld [vmem:[%s6538_s1 + $0x64] sm:$0xf]  ;;  %v3541_v0 = vld [vmem:[%s6538_s1 + $0x6c] sm:$0xf0] }
  0x40   : > { %1603 = vmatmul.bf16.gmra.mxu3 %v4875_v5  ;;  %1770 = vmatpush.bf16.msrb.mxu1 %v4008_v13  ;;  %v4068_v59 = vor.u32 %v4408_v57, %v4067_v56  ;;  %v389_v13 = vld [vmem:[%s4704_s15 + $0x188] sm:$0xff]  ;;  %v366_v56 = vld [vmem:[%s4704_s15 + $0xd0] sm:$0xff]  ;;  %v5057_v57 = vpack.c.bf16 %v363_v46, %v356_v45  ;;  %v387_v43 = vld [vmem:[%s4704_s15 + $0x178] sm:$0xff] }
  0x41   : > { %v4995_v18 = vpack.c.bf16 %v389_v13, %v382_v12  ;;  %v377_v12 = vld [vmem:[%s4704_s15 + $0x128] sm:$0xff]  ;;  %v371_v13 = vld [vmem:[%s4704_s15 + $0xf8] sm:$0xff]  ;;  %v4269_v49 = vld [vmem:[%s6538_s1 + $0x34] sm:$0xf] }
  0x42   : > { %1624 = vmatpush.bf16.msrb.mxu2 %v3708_v9  ;;  %v438_v9 = vld [vmem:[%s4704_s15 + $0x310] sm:$0xff]  ;;  %v4272_v27 = vld [vmem:[%s6538_s1 + $0x4c] sm:$0xf] }
  0x43   : > { %1673 = vmatpush.bf16.msrb.mxu3 %v3804_v10  ;;  %1722 = vmatpush.bf16.msrb.mxu0 %v3900_v22  ;;  %v445_v10 = vld [vmem:[%s4704_s15 + $0x348] sm:$0xff]  ;;  %v3565_v22 = vld [vmem:[%s6538_s1 + $0x9c] sm:$0xf0] }
  0x44   : > { %1771 = vmatpush.bf16.msrb.mxu1 %v3996_v26  ;;  %v4993_v17 = vpack.c.bf16 %v445_v10, %v438_v9  ;;  %v3664_v26 = vor.u32 %v4305_v23, %v3661_v25  ;;  %v3637_v9 = vld [vmem:[%s6538_s1 + $0x12c] sm:$0xf0]  ;;  %v5089_v23 = vpack.c.bf16 %v377_v12, %v370_v11  ;;  %v385_v39 = vld [vmem:[%s4704_s15 + $0x168] sm:$0xff]  ;;  %v400_v11 = vld [vmem:[%s4704_s15 + $0x1e0] sm:$0xff] }
  0x45   : > { %v393_v41 = vld [vmem:[%s4704_s15 + $0x1a8] sm:$0xff]  ;;  %v407_v12 = vld [vmem:[%s4704_s15 + $0x218] sm:$0xff] }
  0x46   : > { %1625 = vmatpush.bf16.msrb.mxu2 %v3696_v20  ;;  %v4999_v20 = vpack.c.bf16 %v446_v16, %v439_v15  ;;  %v379_v15 = vld [vmem:[%s4704_s15 + $0x138] sm:$0xff]  ;;  %v378_v16 = vld [vmem:[%s4704_s15 + $0x130] sm:$0xff]  ;;  %v5123_v46 = vpack.c.bf16 %v393_v41, %v386_v40  ;;  %v3505_v41 = vld [vmem:[%s6538_s1 + $0x24] sm:$0xf0] }
  0x47   : > { %1674 = vmatpush.bf16.msrb.mxu3 %v3792_v21  ;;  %1723 = vmatpush.bf16.msrb.mxu0 %v3888_v38  ;;  %v4281_v21 = vld [vmem:[%s6538_s1 + $0x94] sm:$0xf]  ;;  %v5093_v25 = vpack.c.bf16 %v378_v16, %v371_v13  ;;  %v4266_v40 = vld [vmem:[%s6538_s1 + $0x1c] sm:$0xf] }
  0x48   : > { %1772 = vmatpush.bf16.msrb.mxu1 %v3984_v33  ;;  %v3568_v24 = vor.u32 %v4281_v21, %v3565_v22  ;;  %v345_v33 = vld [vmem:[%s4704_s15 + $0x28] sm:$0xff]  ;;  %v380_v22 = vld [vmem:[%s4704_s15 + $0x140] sm:$0xff]  ;;  %6611 = vst [vmem:[#allocation15_spill] sm:$0xff] %v5123_v46  ;;  %v406_v13 = vld [vmem:[%s4704_s15 + $0x210] sm:$0xff] }
  0x49   : > { %v5031_v38 = vpack.c.bf16 %v352_v34, %v345_v33  ;;  %v373_v21 = vld [vmem:[%s4704_s15 + $0x108] sm:$0xff]  ;;  %v384_v33 = vld [vmem:[%s4704_s15 + $0x160] sm:$0xff]  ;;  %v391_v34 = vld [vmem:[%s4704_s15 + $0x198] sm:$0xff] }
  0x4a   : > { %1626 = vmatpush.bf16.msrb.mxu2 %v3684_v36  ;;  %v5027_v36 = vpack.c.bf16 %v351_v31, %v344_v30  ;;  %v4296_v30 = vld [vmem:[%s6538_s1 + $0x10c] sm:$0xf]  ;;  %v3625_v31 = vld [vmem:[%s6538_s1 + $0x114] sm:$0xf0]  ;;  %v5121_v45 = vpack.c.bf16 %v391_v34, %v384_v33 }
  0x4b   : > { %1675 = vmatpush.bf16.msrb.mxu3 %v3780_v37  ;;  %1724 = vmatpush.bf16.msrb.mxu0 %v3876_v51  ;;  %v5029_v37 = vpack.c.bf16 %v350_v32, %v343_v29  ;;  %v359_v51 = vld [vmem:[%s4704_s15 + $0x98] sm:$0xff]  ;;  %v3532_v29 = vor.u32 %v4272_v27, %v3529_v28  ;;  %v3628_v32 = vor.u32 %v4296_v30, %v3625_v31 }
  0x4c   : > { %1773 = vmatpush.bf16.msrb.mxu1 %v3972_v50  ;;  %v364_v50 = vld [vmem:[%s4704_s15 + $0xc0] sm:$0xff]  ;;  %v5063_v60 = vpack.c.bf16 %v366_v56, %v359_v51  ;;  %v4293_v56 = vld [vmem:[%s6538_s1 + $0xf4] sm:$0xf]  ;;  %v3769_v33 = vld [vmem:[%s6538_s1 + $0x234] sm:$0xf0] }
  0x4d   : > { %1559 = vmatmul.bf16.gmra.mxu2 %v4955_v52  ;;  %1539 = vmatmul.bf16.gmra.mxu0 %v4957_v53 }
  0x4e   : > { %1588 = vmatmul.bf16.gmra.mxu1 %v4959_v54  ;;  %1822 = vmatpush.bf16.msra.mxu2 %v4068_v59  ;;  %v5061_v59 = vpack.c.bf16 %v364_v50, %v357_v47  ;;  %6608 = vst [vmem:[#allocation12_spill] sm:$0xff] %v5063_v60  ;;  %v3517_v50 = vld [vmem:[%s6538_s1 + $0x3c] sm:$0xf0] }
  0x4f   : > { %1864 = vmatpush.bf16.msra.mxu3 %v3580_v3  ;;  %1913 = vmatpush.bf16.msra.mxu0 %v3676_v8  ;;  %v4299_v3 = vld [vmem:[%s6538_s1 + $0x124] sm:$0xf]  ;;  %v3544_v8 = vor.u32 %v4275_v63, %v3541_v0  ;;  %v3520_v51 = vor.u32 %v4269_v49, %v3517_v50  ;;  %v3613_v63 = vld [vmem:[%s6538_s1 + $0xfc] sm:$0xf0] }
  0x50   : > { %1608 = vmatmul.bf16.gmra.mxu3 %v4961_v55  ;;  %v3640_v10 = vor.u32 %v4299_v3, %v3637_v9  ;;  %v3616_v0 = vor.u32 %v4293_v56, %v3613_v63  ;;  %v5148_v3 = vld [vmem:[%s6539_s2] sm:$0x7]  ;;  %v405_v9 = vld [vmem:[%s4704_s15 + $0x208] sm:$0xff] }
  0x51   : > { %v5159_v16 = vperm.slane %v5148_v3, 0  ;;  %v3757_v49 = vld [vmem:[%s6538_s1 + $0x21c] sm:$0xf0] }
  0x53   : > { %1865 = vmatpush.bf16.msra.mxu3 %v3568_v24  ;;  %1914 = vmatpush.bf16.msra.mxu0 %v3664_v26  ;;  %v5091_v24 = vpack.c.bf16 %v379_v15, %v372_v14  ;;  %v5095_v26 = vpack.c.bf16 %v380_v22, %v373_v21  ;;  %v401_v14 = vld [vmem:[%s4704_s15 + $0x1e8] sm:$0xff]  ;;  %v408_v15 = vld [vmem:[%s4704_s15 + $0x220] sm:$0xff]  ;;  %v5163_v22 = vpack.c.bf16 %v407_v12, %v400_v11  ;;  %v4290_v12 = vld [vmem:[%s6538_s1 + $0xdc] sm:$0xf] }
  0x54   : > { %v3745_v11 = vld [vmem:[%s6538_s1 + $0x204] sm:$0xf0] }
  0x55   : > { %6609 = vst [vmem:[#allocation13_spill] sm:$0xff] %v5091_v24 }
  0x56   : > { %6610 = vst [vmem:[#allocation14_spill] sm:$0xff] %v5095_v26 }
  0x57   : > { %1866 = vmatpush.bf16.msra.mxu3 %v3556_v42  ;;  %1915 = vmatpush.bf16.msra.mxu0 %v3652_v44  ;;  %v392_v42 = vld [vmem:[%s4704_s15 + $0x1a0] sm:$0xff]  ;;  %v394_v44 = vld [vmem:[%s4704_s15 + $0x1b0] sm:$0xff]  ;;  %6614 = vst [vmem:[#allocation18_spill] sm:$0xff] %v5163_v22 }
  0x58   : > { %v5125_v47 = vpack.c.bf16 %v392_v42, %v385_v39  ;;  %v5127_v48 = vpack.c.bf16 %v394_v44, %v387_v43  ;;  %v3508_v42 = vor.u32 %v4266_v40, %v3505_v41  ;;  %v4329_v44 = vld [vmem:[%s6538_s1 + $0x214] sm:$0xf]  ;;  %v420_v40 = vld [vmem:[%s4704_s15 + $0x280] sm:$0xff]  ;;  %v415_v41 = vld [vmem:[%s4704_s15 + $0x258] sm:$0xff] }
  0x59   : > { %v3760_v56 = vor.u32 %v4329_v44, %v3757_v49  ;;  %v4323_v44 = vld [vmem:[%s6538_s1 + $0x1e4] sm:$0xf]  ;;  %v3733_v49 = vld [vmem:[%s6538_s1 + $0x1ec] sm:$0xf0] }
  0x5a   : > { %6612 = vst [vmem:[#allocation16_spill] sm:$0xff] %v5125_v47 }
  0x5b   : > { %1867 = vmatpush.bf16.msra.mxu3 %v3544_v8  ;;  %1916 = vmatpush.bf16.msra.mxu0 %v3640_v10  ;;  %6613 = vst [vmem:[#allocation17_spill] sm:$0xff] %v5127_v48  ;;  %v398_v8 = vld [vmem:[%s4704_s15 + $0x1d0] sm:$0xff]  ;;  %v399_v10 = vld [vmem:[%s4704_s15 + $0x1d8] sm:$0xff] }
  0x5c   : > { %v5161_v21 = vpack.c.bf16 %v405_v9, %v398_v8  ;;  %v5165_v28 = vpack.c.bf16 %v406_v13, %v399_v10  ;;  %v4326_v10 = vld [vmem:[%s6538_s1 + $0x1fc] sm:$0xf] }
  0x5d   : > { %1564 = vmatmul.bf16.gmra.mxu2 %v4993_v17  ;;  %1544 = vmatmul.bf16.gmra.mxu0 %v4995_v18  ;;  %v3748_v13 = vor.u32 %v4326_v10, %v3745_v11 }
  0x5e   : > { %1593 = vmatmul.bf16.gmra.mxu1 %v4997_v19  ;;  %6615 = vst [vmem:[#allocation19_spill] sm:$0xff] %v5165_v28 }
  0x5f   : > { %1868 = vmatpush.bf16.msra.mxu3 %v3532_v29  ;;  %1917 = vmatpush.bf16.msra.mxu0 %v3628_v32  ;;  %v5167_v29 = vpack.c.bf16 %v408_v15, %v401_v14  ;;  %v4332_v32 = vld [vmem:[%s6538_s1 + $0x22c] sm:$0xf]  ;;  %v3601_v14 = vld [vmem:[%s6538_s1 + $0xe4] sm:$0xf0]  ;;  %v412_v15 = vld [vmem:[%s4704_s15 + $0x240] sm:$0xff] }
  0x60   : > { %1613 = vmatmul.bf16.gmra.mxu3 %v4999_v20  ;;  %v3772_v39 = vor.u32 %v4332_v32, %v3769_v33  ;;  %v413_v32 = vld [vmem:[%s4704_s15 + $0x248] sm:$0xff]  ;;  %v414_v33 = vld [vmem:[%s4704_s15 + $0x250] sm:$0xff] }
  0x61   : > { %6616 = vst [vmem:[#allocation20_spill] sm:$0xff] %v5167_v29  ;;  %v5231_v10 = vpack.c.bf16 %v420_v40, %v413_v32 }
  0x62   : > { %1962 = vmatpush.bf16.msra.mxu1 %v3772_v39  ;;  %v421_v39 = vld [vmem:[%s4704_s15 + $0x288] sm:$0xff] }
  0x63   : > { %1869 = vmatpush.bf16.msra.mxu3 %v3520_v51  ;;  %1918 = vmatpush.bf16.msra.mxu0 %v3616_v0  ;;  %6618 = vst [vmem:[#allocation22_spill] sm:$0xff] %v5231_v10 }
  0x66   : > { %1963 = vmatpush.bf16.msra.mxu1 %v3760_v56 }
  0x67   : > { %1870 = vmatpush.bf16.msra.mxu3 %v3508_v42  ;;  %v422_v42 = vld [vmem:[%s4704_s15 + $0x290] sm:$0xff] }
  0x68   : > { %v5233_v11 = vpack.c.bf16 %v422_v42, %v415_v41  ;;  %v4317_v42 = vld [vmem:[%s6538_s1 + $0x1b4] sm:$0xf] }
  0x6a   : > { %1964 = vmatpush.bf16.msra.mxu1 %v3748_v13  ;;  %6619 = vst [vmem:[#allocation23_spill] sm:$0xff] %v5233_v11 }
  0x6d   : > { %1627 = vmatmul.bf16.vlgmr.msrb.gmra.mxu2 %v5025_v35  ;;  %1725 = vmatmul.bf16.vlgmr.msrb.gmra.mxu0 %v5027_v36 }
  0x6e   : > { %1774 = vmatmul.bf16.vlgmr.msrb.gmra.mxu1 %v5031_v38 }
  0x70   : > { %1676 = vmatmul.bf16.vlgmr.msrb.gmra.mxu3 %v5029_v37 }
  0x7d   : > { %1632 = vmatmul.bf16.gmra.mxu2 %v5057_v57  ;;  %1730 = vmatmul.bf16.gmra.mxu0 %v5059_v58 }
  0x7e   : > { %1779 = vmatmul.bf16.gmra.mxu1 %v5063_v60 }
  0x80   : > { %1681 = vmatmul.bf16.gmra.mxu3 %v5061_v59 }
  0x8d   : > { %1637 = vmatmul.bf16.gmra.mxu2 %v5089_v23  ;;  %1735 = vmatmul.bf16.gmra.mxu0 %v5091_v24 }
  0x8e   : > { %1784 = vmatmul.bf16.gmra.mxu1 %v5095_v26 }
  0x90   : > { %1686 = vmatmul.bf16.gmra.mxu3 %v5093_v25 }
  0x9d   : > { %1642 = vmatmul.bf16.gmra.mxu2 %v5121_v45  ;;  %1740 = vmatmul.bf16.gmra.mxu0 %v5123_v46 }
  0x9e   : > { %1789 = vmatmul.bf16.gmra.mxu1 %v5127_v48 }
  0xa0   : > { %1691 = vmatmul.bf16.gmra.mxu3 %v5125_v47 }
  0xaa   : > { %v1530_v27 = vpop.f32.mrf.mxu0 }
  0xab   : > { %v1579_v30 = vpop.f32.mrf.mxu1  ;;  %v1531_v31 = vadd.f32 %v1530_v27, %v5159_v16  ;;  %v419_v27 = vld [vmem:[%s4704_s15 + $0x278] sm:$0xff] }
  0xac   : > { %v5227_v56 = vpack.c.bf16 %v419_v27, %v412_v15  ;;  %v4320_v15 = vld [vmem:[%s6538_s1 + $0x1cc] sm:$0xf]  ;;  %v3721_v27 = vld [vmem:[%s6538_s1 + $0x1d4] sm:$0xf0] }
  0xad   : > { %1647 = vmatmul.bf16.gmra.mxu2 %v5161_v21  ;;  %1745 = vmatmul.bf16.gmra.mxu0 %v5163_v22  ;;  %v5178_v34 = vadd.f32 %v1579_v30, %v1531_v31  ;;  %v3604_v30 = vor.u32 %v4290_v12, %v3601_v14  ;;  %v3724_v32 = vor.u32 %v4320_v15, %v3721_v27  ;;  %v3697_v15 = vld [vmem:[%s6538_s1 + $0x1a4] sm:$0xf0]  ;;  %v4287_v27 = vld [vmem:[%s6538_s1 + $0xc4] sm:$0xf] }
  0xae   : > { %1794 = vmatmul.bf16.gmra.mxu1 %v5167_v29 }
  0xaf   : > { %1919 = vmatpush.bf16.msra.mxu0 %v3604_v30 }
  0xb0   : > { %1696 = vmatmul.bf16.gmra.mxu3 %v5165_v28  ;;  %v1550_v43 = vpop.f32.mrf.mxu2 }
  0xb1   : > { %v1551_v50 = vadd.f32 %v1550_v43, %v5159_v16 }
  0xb2   : > { %v1532_v63 = vpop.f32.mrf.mxu0 }
  0xb3   : > { %v1599_v51 = vpop.f32.mrf.mxu3  ;;  %v1581_v8 = vpop.f32.mrf.mxu1  ;;  %v1533_v9 = vadd.f32 %v1532_v63, %v5159_v16  ;;  %v5229_v63 = vpack.c.bf16 %v421_v39, %v414_v33  ;;  %v4263_v33 = vld [vmem:[%s6538_s1 + $0x4] sm:$0xf]  ;;  %v3493_v39 = vld [vmem:[%s6538_s1 + $0xc] sm:$0xf0] }
  0xb4   : > { %v5195_v0 = vadd.f32 %v1599_v51, %v1551_v50  ;;  %v3496_v40 = vor.u32 %v4263_v33, %v3493_v39  ;;  %v3589_v33 = vld [vmem:[%s6538_s1 + $0xcc] sm:$0xf0] }
  0xb5   : > { %v5212_v31 = vadd.f32 %v1581_v8, %v1533_v9  ;;  %6617 = vst [vmem:[#allocation21_spill] sm:$0xff] %v5229_v63  ;;  %v3736_v8 = vor.u32 %v4323_v44, %v3733_v49  ;;  %v426_v39 = vld [vmem:[%s4704_s15 + $0x2b0] sm:$0xff] }
  0xb6   : > { %1871 = vmatpush.bf16.msra.mxu3 %v3496_v40  ;;  %v433_v40 = vld [vmem:[%s4704_s15 + $0x2e8] sm:$0xff] }
  0xb7   : > { %1965 = vmatpush.bf16.msra.mxu1 %v3736_v8 }
  0xb8   : > { %v1552_v43 = vpop.f32.mrf.mxu2 }
  0xb9   : > { %v1553_v50 = vadd.f32 %v1552_v43, %v5159_v16  ;;  %v3709_v43 = vld [vmem:[%s6538_s1 + $0x1bc] sm:$0xf0] }
  0xba   : > { %v1535_v9 = vpop.f32.mrf.mxu0 }
  0xbb   : > { %v1601_v51 = vpop.f32.mrf.mxu3  ;;  %v1584_v13 = vpop.f32.mrf.mxu1  ;;  %v1536_v14 = vadd.f32 %v1535_v9, %v5159_v16  ;;  %1966 = vmatpush.bf16.msra.mxu1 %v3724_v32 }
  0xbc   : > { %v5235_v12 = vadd.f32 %v1601_v51, %v1553_v50  ;;  %v3712_v50 = vor.u32 %v4317_v42, %v3709_v43  ;;  %v427_v43 = vld [vmem:[%s4704_s15 + $0x2b8] sm:$0xff] }
  0xbd   : > { %1652 = vmatmul.bf16.gmra.mxu2 %v5227_v56  ;;  %1750 = vmatmul.bf16.gmra.mxu0 %v5229_v63  ;;  %v5246_v30 = vadd.f32 %v1584_v13, %v1536_v14  ;;  %v4314_v14 = vld [vmem:[%s6538_s1 + $0x19c] sm:$0xf]  ;;  %v429_v63 = vld [vmem:[%s4704_s15 + $0x2c8] sm:$0xff] }
  0xbe   : > { %1799 = vmatmul.bf16.gmra.mxu1 %v5233_v11  ;;  %v3700_v32 = vor.u32 %v4314_v14, %v3697_v15  ;;  %v436_v11 = vld [vmem:[%s4704_s15 + $0x300] sm:$0xff]  ;;  %v3685_v14 = vld [vmem:[%s6538_s1 + $0x18c] sm:$0xf0]  ;;  %v5295_v15 = vpack.c.bf16 %v433_v40, %v426_v39 }
  0xbf   : > { %1967 = vmatpush.bf16.msra.mxu1 %v3712_v50  ;;  %v4311_v50 = vld [vmem:[%s6538_s1 + $0x184] sm:$0xf] }
  0xc0   : > { %1701 = vmatmul.bf16.gmra.mxu3 %v5231_v10  ;;  %v1555_v41 = vpop.f32.mrf.mxu2  ;;  %6620 = vst [vmem:[#allocation24_spill] sm:$0xff] %v5295_v15 }
  0xc1   : > { %v1556_v44 = vadd.f32 %v1555_v41, %v5159_v16  ;;  %v3592_v41 = vor.u32 %v4287_v27, %v3589_v33  ;;  %v3688_v33 = vor.u32 %v4311_v50, %v3685_v14 }
  0xc2   : > { %v1537_v51 = vpop.f32.mrf.mxu0 }
  0xc3   : > { %v1604_v49 = vpop.f32.mrf.mxu3  ;;  %v1586_v9 = vpop.f32.mrf.mxu1  ;;  %v1538_v13 = vadd.f32 %v1537_v51, %v5159_v16  ;;  %v434_v51 = vld [vmem:[%s4704_s15 + $0x2f0] sm:$0xff]  ;;  %1920 = vmatpush.bf16.msra.mxu0 %v3592_v41  ;;  %1968 = vmatpush.bf16.msra.mxu1 %v3700_v32  ;;  %v5301_v32 = vpack.c.bf16 %v436_v11, %v429_v63  ;;  %v4356_v63 = vld [vmem:[%s6538_s1 + $0x2ec] sm:$0xf] }
  0xc4   : > { %v5263_v8 = vadd.f32 %v1604_v49, %v1556_v44  ;;  %v428_v44 = vld [vmem:[%s4704_s15 + $0x2c0] sm:$0xff]  ;;  %v435_v49 = vld [vmem:[%s4704_s15 + $0x2f8] sm:$0xff]  ;;  %v5299_v41 = vpack.c.bf16 %v434_v51, %v427_v43  ;;  %v4380_v11 = vld [vmem:[%s6538_s1 + $0x3ac] sm:$0xf] }
  0xc5   : > { %v5280_v42 = vadd.f32 %v1586_v9, %v1538_v13  ;;  %v5297_v27 = vpack.c.bf16 %v435_v49, %v428_v44  ;;  %6623 = vst [vmem:[#allocation27_spill] sm:$0xff] %v5301_v32 }
  0xc6   : > { %6622 = vst [vmem:[#allocation26_spill] sm:$0xff] %v5299_v41 }
  0xc7   : > { %6621 = vst [vmem:[#allocation25_spill] sm:$0xff] %v5297_v27  ;;  %1969 = vmatpush.bf16.msra.mxu1 %v3688_v33  ;;  %v4404_v33 = vld [vmem:[%s6538_s1 + $0x46c] sm:$0xf] }
  0xc8   : > { %v1557_v10 = vpop.f32.mrf.mxu2 }
  0xc9   : > { %v1558_v9 = vadd.f32 %v1557_v10, %v5159_v16 }
  0xca   : > { %v1540_v22 = vpop.f32.mrf.mxu0 }
  0xcb   : > { %v1606_v13 = vpop.f32.mrf.mxu3  ;;  %v1589_v28 = vpop.f32.mrf.mxu1  ;;  %v1541_v46 = vadd.f32 %v1540_v22, %v5159_v16  ;;  %v3865_v22 = vld [vmem:[%s6538_s1 + $0x2f4] sm:$0xf0] }
  0xcc   : > { %v5303_v29 = vadd.f32 %v1606_v13, %v1558_v9  ;;  %v440_v9 = vld [vmem:[%s4704_s15 + $0x320] sm:$0xff]  ;;  %v447_v13 = vld [vmem:[%s4704_s15 + $0x358] sm:$0xff] }
  0xcd   : > { %1657 = vmatmul.bf16.gmra.mxu2 %v5295_v15  ;;  %1755 = vmatmul.bf16.gmra.mxu0 %v5297_v27  ;;  %v5308_v10 = vadd.f32 %v1589_v28, %v1541_v46  ;;  %v3868_v46 = vor.u32 %v4356_v63, %v3865_v22  ;;  %v3961_v28 = vld [vmem:[%s6538_s1 + $0x3b4] sm:$0xf0] }
  0xce   : > { %1804 = vmatmul.bf16.gmra.mxu1 %v5301_v32  ;;  %v3964_v40 = vor.u32 %v4380_v11, %v3961_v28  ;;  %v4057_v63 = vld [vmem:[%s6538_s1 + $0x474] sm:$0xf0]  ;;  %v441_v11 = vld [vmem:[%s4704_s15 + $0x328] sm:$0xff] }
  0xcf   : > { %2011 = vmatpush.bf16.msrb.mxu2 %v3868_v46  ;;  %v442_v46 = vld [vmem:[%s4704_s15 + $0x330] sm:$0xff]  ;;  %v449_v28 = vld [vmem:[%s4704_s15 + $0x368] sm:$0xff] }
  0xd0   : > { %1706 = vmatmul.bf16.gmra.mxu3 %v5299_v41  ;;  %v1560_v39 = vpop.f32.mrf.mxu2  ;;  %v5345_v41 = vpack.c.bf16 %v447_v13, %v440_v9  ;;  %v5347_v48 = vpack.c.bf16 %v449_v28, %v442_v46  ;;  %v4353_v9 = vld [vmem:[%s6538_s1 + $0x2d4] sm:$0xf]  ;;  %v3949_v13 = vld [vmem:[%s6538_s1 + $0x39c] sm:$0xf0] }
  0xd1   : > { %v1561_v43 = vadd.f32 %v1560_v39, %v5159_v16  ;;  %2060 = vmatpush.bf16.msrb.mxu3 %v3964_v40  ;;  %v4060_v39 = vor.u32 %v4404_v33, %v4057_v63  ;;  %v448_v40 = vld [vmem:[%s4704_s15 + $0x360] sm:$0xff] }
  0xd2   : > { %v1542_v49 = vpop.f32.mrf.mxu0  ;;  %6624 = vst [vmem:[#allocation28_spill] sm:$0xff] %v5347_v48  ;;  %v5349_v24 = vpack.c.bf16 %v448_v40, %v441_v11 }
  0xd3   : > { %v1609_v44 = vpop.f32.mrf.mxu3  ;;  %v1591_v50 = vpop.f32.mrf.mxu1  ;;  %v1543_v14 = vadd.f32 %v1542_v49, %v5159_v16  ;;  %2109 = vmatpush.bf16.msrb.mxu0 %v4060_v39 }
  0xd4   : > { %v5325_v51 = vadd.f32 %v1609_v44, %v1561_v43  ;;  %v443_v43 = vld [vmem:[%s4704_s15 + $0x338] sm:$0xff]  ;;  %v450_v44 = vld [vmem:[%s4704_s15 + $0x370] sm:$0xff]  ;;  %6625 = vst [vmem:[#allocation29_spill] sm:$0xff] %v5349_v24 }
  0xd5   : > { %v5336_v22 = vadd.f32 %v1591_v50, %v1543_v14  ;;  %v5351_v50 = vpack.c.bf16 %v450_v44, %v443_v43 }
  0xd7   : > { %6626 = vst [vmem:[#allocation30_spill] sm:$0xff] %v5351_v50 }
  0xd8   : > { %v1562_v49 = vpop.f32.mrf.mxu2 }
  0xd9   : > { %v1563_v27 = vadd.f32 %v1562_v49, %v5159_v16 }
  0xda   : > { %v1545_v47 = vpop.f32.mrf.mxu0 }
  0xdb   : > { %v1611_v32 = vpop.f32.mrf.mxu3  ;;  %v1594_v33 = vpop.f32.mrf.mxu1  ;;  %v1546_v63 = vadd.f32 %v1545_v47, %v5159_v16  ;;  %v4377_v47 = vld [vmem:[%s6538_s1 + $0x394] sm:$0xf] }
  0xdc   : > { %v5353_v14 = vadd.f32 %v1611_v32, %v1563_v27  ;;  %v3853_v27 = vld [vmem:[%s6538_s1 + $0x2dc] sm:$0xf0]  ;;  %v3952_v46 = vor.u32 %v4377_v47, %v3949_v13  ;;  %v346_v47 = vld [vmem:[%s4704_s15 + $0x30] sm:$0xff]  ;;  %v353_v13 = vld [vmem:[%s4704_s15 + $0x68] sm:$0xff] }
  0xdd   : > { %1662 = vmatmul.bf16.gmra.mxu2 %v5345_v41  ;;  %1760 = vmatmul.bf16.gmra.mxu0 %v5347_v48  ;;  %v5358_v39 = vadd.f32 %v1594_v33, %v1546_v63  ;;  %v3856_v32 = vor.u32 %v4353_v9, %v3853_v27  ;;  %v4401_v63 = vld [vmem:[%s6538_s1 + $0x454] sm:$0xf]  ;;  %v4045_v9 = vld [vmem:[%s6538_s1 + $0x45c] sm:$0xf0] }
  0xde   : > { %1809 = vmatmul.bf16.gmra.mxu1 %v5351_v50  ;;  %2061 = vmatpush.bf16.msrb.mxu3 %v3952_v46 }
  0xdf   : > { %2012 = vmatpush.bf16.msrb.mxu2 %v3856_v32  ;;  %v4048_v32 = vor.u32 %v4401_v63, %v4045_v9  ;;  %v3937_v9 = vld [vmem:[%s6538_s1 + $0x384] sm:$0xf0] }
  0xe0   : > { %1711 = vmatmul.bf16.gmra.mxu3 %v5349_v24  ;;  %v1565_v11 = vpop.f32.mrf.mxu2  ;;  %v367_v24 = vld [vmem:[%s4704_s15 + $0xd8] sm:$0xff] }
  0xe1   : > { %v1566_v28 = vadd.f32 %v1565_v11, %v5159_v16  ;;  %2110 = vmatpush.bf16.msrb.mxu0 %v4048_v32 }
  0xe2   : > { %v1547_v43 = vpop.f32.mrf.mxu0 }
  0xe3   : > { %v1614_v40 = vpop.f32.mrf.mxu3  ;;  %v1596_v49 = vpop.f32.mrf.mxu1  ;;  %v1548_v33 = vadd.f32 %v1547_v43, %v5159_v16 }
  0xe4   : > { %v5375_v44 = vadd.f32 %v1614_v40, %v1566_v28  ;;  %v5389_v40 = vpack.c.bf16 %v353_v13, %v346_v47 }
  0xe5   : > { %v5384_v27 = vadd.f32 %v1596_v49, %v1548_v33  ;;  %v3841_v49 = vld [vmem:[%s6538_s1 + $0x2c4] sm:$0xf0]  ;;  %v4374_v33 = vld [vmem:[%s6538_s1 + $0x37c] sm:$0xf] }
  0xe6   : > { %v3940_v13 = vor.u32 %v4374_v33, %v3937_v9 }
  0xe8   : > { %v1567_v11 = vpop.f32.mrf.mxu2  ;;  %2062 = vmatpush.bf16.msrb.mxu3 %v3940_v13 }
  0xe9   : > { %v1568_v46 = vadd.f32 %v1567_v11, %v5159_v16  ;;  %v4350_v16 = vld [vmem:[%s6538_s1 + $0x2bc] sm:$0xf] }
  0xea   : > { %v1726_v43 = vpop.f32.mrf.mxu0  ;;  %v3844_v63 = vor.u32 %v4350_v16, %v3841_v49  ;;  %v4033_v16 = vld [vmem:[%s6538_s1 + $0x444] sm:$0xf0]  ;;  %v360_v49 = vld [vmem:[%s4704_s15 + $0xa0] sm:$0xff] }
  0xeb   : > { %v1616_v28 = vpop.f32.mrf.mxu3  ;;  %v1775_v50 = vpop.f32.mrf.mxu1  ;;  %v5422_v13 = vpack.c.bf16 %v367_v24, %v360_v49  ;;  %v4371_v24 = vld [vmem:[%s6538_s1 + $0x364] sm:$0xf] }
  0xec   : > { %v5391_v48 = vadd.f32 %v1616_v28, %v1568_v46  ;;  %2013 = vmatpush.bf16.msrb.mxu2 %v3844_v63 }
  0xed   : > { %4077 = vmatmul.msk.bf16.vlgmr.msra.gmra.mxu2 %vm1496_vm0, %v5389_v40  ;;  %1921 = vmatmul.bf16.vlgmr.msra.gmra.mxu0 %v4757_v6 }
  0xee   : > { %1970 = vmatmul.bf16.vlgmr.msra.gmra.mxu1 %v5025_v35 }
  0xf0   : > { %1872 = vmatmul.bf16.vlgmr.msra.gmra.mxu3 %v4746_v2  ;;  %v1628_v47 = vpop.f32.mrf.mxu2  ;;  %v4398_v2 = vld [vmem:[%s6538_s1 + $0x43c] sm:$0xf] }
  0xf1   : > { %v1629_v32 = vadd.f32 %v1628_v47, %v5178_v34  ;;  %v4036_v33 = vor.u32 %v4398_v2, %v4033_v16  ;;  %v4347_v2 = vld [vmem:[%s6538_s1 + $0x2a4] sm:$0xf] }
  0xf2   : > { %v1728_v46 = vpop.f32.mrf.mxu0 }
  0xf3   : > { %v1677_v11 = vpop.f32.mrf.mxu3  ;;  %v1777_v6 = vpop.f32.mrf.mxu1  ;;  %2111 = vmatpush.bf16.msrb.mxu0 %v4036_v33 }
  0xf4   : > { %v1678_v28 = vadd.f32 %v1677_v11, %v1629_v32 }
  0xf6   : > { %v1727_v35 = vadd.f32 %v1726_v43, %v1678_v28 }
  0xf8   : > { %v5419_v9 = vadd.f32 %v1775_v50, %v1727_v35  ;;  %v1630_v34 = vpop.f32.mrf.mxu2  ;;  %v3829_v35 = vld [vmem:[%s6538_s1 + $0x2ac] sm:$0xf0] }
  0xf9   : > { %v1631_v63 = vadd.f32 %v1630_v34, %v5212_v31  ;;  %v3832_v31 = vor.u32 %v4347_v2, %v3829_v35  ;;  %v3925_v50 = vld [vmem:[%s6538_s1 + $0x36c] sm:$0xf0]  ;;  %v4395_v2 = vld [vmem:[%s6538_s1 + $0x424] sm:$0xf]  ;;  %v381_v35 = vld [vmem:[%s4704_s15 + $0x148] sm:$0xff] }
  0xfa   : > { %v1731_v43 = vpop.f32.mrf.mxu0  ;;  %v3928_v49 = vor.u32 %v4371_v24, %v3925_v50 }
  0xfb   : > { %v1679_v47 = vpop.f32.mrf.mxu3  ;;  %v1780_v11 = vpop.f32.mrf.mxu1  ;;  %2014 = vmatpush.bf16.msrb.mxu2 %v3832_v31 }
  0xfc   : > { %v1680_v32 = vadd.f32 %v1679_v47, %v1631_v63  ;;  %2063 = vmatpush.bf16.msrb.mxu3 %v3928_v49 }
  0xfd   : > { %4078 = vmatmul.msk.bf16.gmra.mxu2 %vm1496_vm0, %v5422_v13  ;;  %1926 = vmatmul.bf16.gmra.mxu0 %v4873_v4 }
  0xfe   : > { %v1729_v28 = vadd.f32 %v1728_v46, %v1680_v32  ;;  %1975 = vmatmul.bf16.gmra.mxu1 %v5057_v57 }
 0x100   : > { %1877 = vmatmul.bf16.gmra.mxu3 %v4862_v62  ;;  %v5441_v46 = vadd.f32 %v1777_v6, %v1729_v28  ;;  %v1633_v16 = vpop.f32.mrf.mxu2  ;;  %v4021_v6 = vld [vmem:[%s6538_s1 + $0x42c] sm:$0xf0] }
 0x101   : > { %v1634_v33 = vadd.f32 %v1633_v16, %v5246_v30  ;;  %v374_v28 = vld [vmem:[%s4704_s15 + $0x110] sm:$0xff]  ;;  %v4024_v24 = vor.u32 %v4395_v2, %v4021_v6  ;;  %v3913_v2 = vld [vmem:[%s6538_s1 + $0x354] sm:$0xf0] }
 0x102   : > { %v1733_v63 = vpop.f32.mrf.mxu0  ;;  %v5455_v49 = vpack.c.bf16 %v381_v35, %v374_v28 }
 0x103   : > { %v1682_v34 = vpop.f32.mrf.mxu3  ;;  %v1782_v32 = vpop.f32.mrf.mxu1  ;;  %2112 = vmatpush.bf16.msrb.mxu0 %v4024_v24 }
 0x104   : > { %v1683_v47 = vadd.f32 %v1682_v34, %v1634_v33  ;;  %6627 = vst [vmem:[#allocation31_spill] sm:$0xff] %v5455_v49 }
 0x106   : > { %v1732_v4 = vadd.f32 %v1731_v43, %v1683_v47 }
 0x108   : > { %v5452_v50 = vadd.f32 %v1780_v11, %v1732_v4  ;;  %v1635_v30 = vpop.f32.mrf.mxu2  ;;  %v4344_v4 = vld [vmem:[%s6538_s1 + $0x28c] sm:$0xf] }
 0x109   : > { %v1636_v31 = vadd.f32 %v1635_v30, %v5280_v42  ;;  %v3817_v42 = vld [vmem:[%s6538_s1 + $0x294] sm:$0xf0]  ;;  %v4368_v11 = vld [vmem:[%s6538_s1 + $0x34c] sm:$0xf] }
 0x10a   : > { %v1736_v43 = vpop.f32.mrf.mxu0  ;;  %v3916_v35 = vor.u32 %v4368_v11, %v3913_v2 }
 0x10b   : > { %v1684_v16 = vpop.f32.mrf.mxu3  ;;  %v1785_v34 = vpop.f32.mrf.mxu1 }
 0x10c   : > { %v1685_v33 = vadd.f32 %v1684_v16, %v1636_v31  ;;  %2064 = vmatpush.bf16.msrb.mxu3 %v3916_v35 }
 0x10d   : > { %4079 = vmatmul.msk.bf16.gmra.mxu2 %vm1496_vm0, %v5455_v49  ;;  %1931 = vmatmul.bf16.gmra.mxu0 %v4959_v54 }
 0x10e   : > { %v1734_v47 = vadd.f32 %v1733_v63, %v1685_v33  ;;  %1980 = vmatmul.bf16.gmra.mxu1 %v5089_v23  ;;  %v3820_v63 = vor.u32 %v4344_v4, %v3817_v42  ;;  %v4392_v4 = vld [vmem:[%s6538_s1 + $0x40c] sm:$0xf]  ;;  %v395_v42 = vld [vmem:[%s4704_s15 + $0x1b8] sm:$0xff] }
 0x110   : > { %1882 = vmatmul.bf16.gmra.mxu3 %v4957_v53  ;;  %v5474_v6 = vadd.f32 %v1782_v32, %v1734_v47  ;;  %v1638_v28 = vpop.f32.mrf.mxu2  ;;  %2015 = vmatpush.bf16.msrb.mxu2 %v3820_v63  ;;  %v4009_v32 = vld [vmem:[%s6538_s1 + $0x414] sm:$0xf0]  ;;  %v388_v47 = vld [vmem:[%s4704_s15 + $0x180] sm:$0xff] }
 0x111   : > { %v1639_v24 = vadd.f32 %v1638_v28, %v5308_v10  ;;  %v4012_v11 = vor.u32 %v4392_v4, %v4009_v32  ;;  %v5488_v35 = vpack.c.bf16 %v395_v42, %v388_v47  ;;  %v3901_v4 = vld [vmem:[%s6538_s1 + $0x33c] sm:$0xf0] }
 0x112   : > { %v1738_v31 = vpop.f32.mrf.mxu0 }
 0x113   : > { %v1687_v30 = vpop.f32.mrf.mxu3  ;;  %v1787_v33 = vpop.f32.mrf.mxu1  ;;  %2113 = vmatpush.bf16.msrb.mxu0 %v4012_v11  ;;  %6628 = vst [vmem:[#allocation32_spill] sm:$0xff] %v5488_v35 }
 0x114   : > { %v1688_v16 = vadd.f32 %v1687_v30, %v1639_v24 }
 0x116   : > { %v1737_v54 = vadd.f32 %v1736_v43, %v1688_v16 }
 0x118   : > { %v5485_v2 = vadd.f32 %v1785_v34, %v1737_v54  ;;  %v1640_v10 = vpop.f32.mrf.mxu2  ;;  %v4341_v54 = vld [vmem:[%s6538_s1 + $0x274] sm:$0xf] }
 0x119   : > { %v1641_v63 = vadd.f32 %v1640_v10, %v5336_v22  ;;  %v3805_v22 = vld [vmem:[%s6538_s1 + $0x27c] sm:$0xf0]  ;;  %v4365_v34 = vld [vmem:[%s6538_s1 + $0x334] sm:$0xf] }
 0x11a   : > { %v1741_v43 = vpop.f32.mrf.mxu0  ;;  %v3904_v42 = vor.u32 %v4365_v34, %v3901_v4 }
 0x11b   : > { %v1689_v28 = vpop.f32.mrf.mxu3  ;;  %v1790_v30 = vpop.f32.mrf.mxu1 }
 0x11c   : > { %v1690_v24 = vadd.f32 %v1689_v28, %v1641_v63  ;;  %2065 = vmatpush.bf16.msrb.mxu3 %v3904_v42 }
 0x11d   : > { %4080 = vmatmul.msk.bf16.gmra.mxu2 %vm1496_vm0, %v5488_v35  ;;  %1936 = vmatmul.bf16.gmra.mxu0 %v4997_v19 }
 0x11e   : > { %v1739_v16 = vadd.f32 %v1738_v31, %v1690_v24  ;;  %1985 = vmatmul.bf16.gmra.mxu1 %v5121_v45  ;;  %v3808_v31 = vor.u32 %v4341_v54, %v3805_v22  ;;  %v4389_v54 = vld [vmem:[%s6538_s1 + $0x3f4] sm:$0xf]  ;;  %v409_v22 = vld [vmem:[%s4704_s15 + $0x228] sm:$0xff] }
 0x120   : > { %1887 = vmatmul.bf16.gmra.mxu3 %v4995_v18  ;;  %v5507_v32 = vadd.f32 %v1787_v33, %v1739_v16  ;;  %v1643_v47 = vpop.f32.mrf.mxu2  ;;  %2016 = vmatpush.bf16.msrb.mxu2 %v3808_v31  ;;  %v3997_v33 = vld [vmem:[%s6538_s1 + $0x3fc] sm:$0xf0]  ;;  %v402_v16 = vld [vmem:[%s4704_s15 + $0x1f0] sm:$0xff] }
 0x121   : > { %v1644_v11 = vadd.f32 %v1643_v47, %v5358_v39  ;;  %v4000_v34 = vor.u32 %v4389_v54, %v3997_v33  ;;  %v5521_v42 = vpack.c.bf16 %v409_v22, %v402_v16  ;;  %v3889_v54 = vld [vmem:[%s6538_s1 + $0x324] sm:$0xf0] }
 0x122   : > { %v1743_v63 = vpop.f32.mrf.mxu0 }
 0x123   : > { %v1692_v10 = vpop.f32.mrf.mxu3  ;;  %v1792_v24 = vpop.f32.mrf.mxu1  ;;  %2114 = vmatpush.bf16.msrb.mxu0 %v4000_v34  ;;  %6629 = vst [vmem:[#allocation33_spill] sm:$0xff] %v5521_v42 }
 0x124   : > { %v1693_v28 = vadd.f32 %v1692_v10, %v1644_v11 }
 0x126   : > { %v1742_v19 = vadd.f32 %v1741_v43, %v1693_v28 }
 0x128   : > { %v5518_v4 = vadd.f32 %v1790_v30, %v1742_v19  ;;  %v1645_v39 = vpop.f32.mrf.mxu2  ;;  %v4338_v19 = vld [vmem:[%s6538_s1 + $0x25c] sm:$0xf] }
 0x129   : > { %v1646_v31 = vadd.f32 %v1645_v39, %v5384_v27  ;;  %v3793_v27 = vld [vmem:[%s6538_s1 + $0x264] sm:$0xf0]  ;;  %v4362_v30 = vld [vmem:[%s6538_s1 + $0x31c] sm:$0xf] }
 0x12a   : > { %v1746_v43 = vpop.f32.mrf.mxu0  ;;  %v3892_v22 = vor.u32 %v4362_v30, %v3889_v54 }
 0x12b   : > { %v1694_v47 = vpop.f32.mrf.mxu3  ;;  %v1795_v10 = vpop.f32.mrf.mxu1 }
 0x12c   : > { %v1695_v11 = vadd.f32 %v1694_v47, %v1646_v31  ;;  %2066 = vmatpush.bf16.msrb.mxu3 %v3892_v22 }
 0x12d   : > { %4081 = vmatmul.msk.bf16.gmra.mxu2 %vm1496_vm0, %v5521_v42  ;;  %1941 = vmatmul.bf16.gmra.mxu0 %v4759_v7 }
 0x12e   : > { %v1744_v28 = vadd.f32 %v1743_v63, %v1695_v11  ;;  %1990 = vmatmul.bf16.gmra.mxu1 %v5161_v21  ;;  %v3796_v63 = vor.u32 %v4338_v19, %v3793_v27  ;;  %v4386_v19 = vld [vmem:[%s6538_s1 + $0x3dc] sm:$0xf] }
 0x12f   : > { %v423_v27 = vld [vmem:[%s4704_s15 + $0x298] sm:$0xff] }
 0x130   : > { %1892 = vmatmul.bf16.gmra.mxu3 %v4744_v1  ;;  %v5540_v33 = vadd.f32 %v1792_v24, %v1744_v28  ;;  %v1648_v16 = vpop.f32.mrf.mxu2  ;;  %2017 = vmatpush.bf16.msrb.mxu2 %v3796_v63  ;;  %v3985_v24 = vld [vmem:[%s6538_s1 + $0x3e4] sm:$0xf0]  ;;  %v416_v28 = vld [vmem:[%s4704_s15 + $0x260] sm:$0xff] }
 0x131   : > { %v1649_v34 = vadd.f32 %v1648_v16, %v5195_v0  ;;  %v3988_v30 = vor.u32 %v4386_v19, %v3985_v24  ;;  %v5554_v22 = vpack.c.bf16 %v423_v27, %v416_v28  ;;  %v3877_v19 = vld [vmem:[%s6538_s1 + $0x30c] sm:$0xf0] }
 0x132   : > { %v1748_v31 = vpop.f32.mrf.mxu0 }
 0x133   : > { %v1697_v39 = vpop.f32.mrf.mxu3  ;;  %v1797_v11 = vpop.f32.mrf.mxu1  ;;  %2115 = vmatpush.bf16.msrb.mxu0 %v3988_v30  ;;  %6630 = vst [vmem:[#allocation34_spill] sm:$0xff] %v5554_v22 }
 0x134   : > { %v1698_v47 = vadd.f32 %v1697_v39, %v1649_v34 }
 0x136   : > { %v1747_v7 = vadd.f32 %v1746_v43, %v1698_v47 }
 0x138   : > { %v5551_v54 = vadd.f32 %v1795_v10, %v1747_v7  ;;  %v1650_v0 = vpop.f32.mrf.mxu2  ;;  %v4335_v7 = vld [vmem:[%s6538_s1 + $0x244] sm:$0xf] }
 0x139   : > { %v1651_v63 = vadd.f32 %v1650_v0, %v5235_v12  ;;  %v3781_v12 = vld [vmem:[%s6538_s1 + $0x24c] sm:$0xf0]  ;;  %v4359_v10 = vld [vmem:[%s6538_s1 + $0x304] sm:$0xf] }
 0x13a   : > { %v1751_v43 = vpop.f32.mrf.mxu0  ;;  %v3880_v27 = vor.u32 %v4359_v10, %v3877_v19 }
 0x13b   : > { %v1699_v16 = vpop.f32.mrf.mxu3  ;;  %v1800_v39 = vpop.f32.mrf.mxu1 }
 0x13c   : > { %v1700_v34 = vadd.f32 %v1699_v16, %v1651_v63  ;;  %2067 = vmatpush.bf16.msrb.mxu3 %v3880_v27 }
 0x13d   : > { %4082 = vmatmul.msk.bf16.gmra.mxu2 %vm1496_vm0, %v5554_v22  ;;  %1946 = vmatmul.bf16.gmra.mxu0 %v4875_v5 }
 0x13e   : > { %v1749_v47 = vadd.f32 %v1748_v31, %v1700_v34  ;;  %1995 = vmatmul.bf16.gmra.mxu1 %v5227_v56  ;;  %v3784_v31 = vor.u32 %v4335_v7, %v3781_v12  ;;  %v4383_v7 = vld [vmem:[%s6538_s1 + $0x3c4] sm:$0xf]  ;;  %v437_v12 = vld [vmem:[%s4704_s15 + $0x308] sm:$0xff] }
 0x140   : > { %1897 = vmatmul.bf16.gmra.mxu3 %v4860_v61  ;;  %v5573_v24 = vadd.f32 %v1797_v11, %v1749_v47  ;;  %v1653_v28 = vpop.f32.mrf.mxu2  ;;  %2018 = vmatpush.bf16.msrb.mxu2 %v3784_v31  ;;  %v3973_v11 = vld [vmem:[%s6538_s1 + $0x3cc] sm:$0xf0]  ;;  %v4407_v31 = vld [vmem:[%s6538_s1 + $0x484] sm:$0xf] }
 0x141   : > { %v1654_v30 = vadd.f32 %v1653_v28, %v5263_v8  ;;  %v430_v47 = vld [vmem:[%s4704_s15 + $0x2d0] sm:$0xff]  ;;  %v3976_v10 = vor.u32 %v4383_v7, %v3973_v11  ;;  %v4286_v11 = vld [vmem:[%s6538_s1 + $0xb8] sm:$0xf0] }
 0x142   : > { %v1753_v63 = vpop.f32.mrf.mxu0 }
 0x143   : > { %v1702_v0 = vpop.f32.mrf.mxu3  ;;  %v1802_v34 = vpop.f32.mrf.mxu1  ;;  %2116 = vmatpush.bf16.msrb.mxu0 %v3976_v10 }
 0x144   : > { %v1703_v16 = vadd.f32 %v1702_v0, %v1654_v30  ;;  %v5593_v30 = vpack.c.bf16 %v437_v12, %v430_v47  ;;  %v4310_v12 = vld [vmem:[%s6538_s1 + $0x178] sm:$0xf0] }
 0x146   : > { %v1752_v5 = vadd.f32 %v1751_v43, %v1703_v16  ;;  %v4069_v43 = vld [vmem:[%s6538_s1 + $0x48c] sm:$0xf0]  ;;  %6631 = vst [vmem:[#allocation35_spill] sm:$0xff] %v5593_v30 }
 0x147   : > { %v4072_v0 = vor.u32 %v4407_v31, %v4069_v43 }
 0x148   : > { %v5584_v19 = vadd.f32 %v1800_v39, %v1752_v5  ;;  %v1655_v8 = vpop.f32.mrf.mxu2 }
 0x149   : > { %v1656_v28 = vadd.f32 %v1655_v8, %v5303_v29  ;;  %2165 = vmatpush.bf16.msrb.mxu1 %v4072_v0  ;;  %v3583_v29 = vld [vmem:[%s6538_s1 + $0xb0] sm:$0xf] }
 0x14a   : > { %v1756_v16 = vpop.f32.mrf.mxu0  ;;  %v3584_v47 = vor.u32 %v4286_v11, %v3583_v29  ;;  %v3775_v29 = vld [vmem:[%s6538_s1 + $0x230] sm:$0xf]  ;;  %v4334_v11 = vld [vmem:[%s6538_s1 + $0x238] sm:$0xf0] }
 0x14b   : > { %v1704_v27 = vpop.f32.mrf.mxu3  ;;  %v1805_v5 = vpop.f32.mrf.mxu1 }
 0x14c   : > { %v1705_v7 = vadd.f32 %v1704_v27, %v1656_v28  ;;  %2207 = vmatpush.bf16.msra.mxu2 %v3584_v47 }
 0x14d   : > { %4083 = vmatmul.msk.bf16.gmra.mxu2 %vm1496_vm0, %v5593_v30  ;;  %1951 = vmatmul.bf16.gmra.mxu0 %v4961_v55  ;;  %v444_v55 = vld [vmem:[%s4704_s15 + $0x340] sm:$0xff] }
 0x14e   : > { %v1754_v39 = vadd.f32 %v1753_v63, %v1705_v7  ;;  %2000 = vmatmul.bf16.gmra.mxu1 %v5295_v15  ;;  %v3679_v63 = vld [vmem:[%s6538_s1 + $0x170] sm:$0xf] }
 0x14f   : > { %v3680_v31 = vor.u32 %v4310_v12, %v3679_v63  ;;  %v451_v63 = vld [vmem:[%s4704_s15 + $0x378] sm:$0xff] }
 0x150   : > { %1902 = vmatmul.bf16.gmra.mxu3 %v4955_v52  ;;  %v5612_v10 = vadd.f32 %v1802_v34, %v1754_v39  ;;  %v1658_v8 = vpop.f32.mrf.mxu2  ;;  %v3776_v39 = vor.u32 %v4334_v11, %v3775_v29 }
 0x151   : > { %v1659_v43 = vadd.f32 %v1658_v8, %v5325_v51  ;;  %2256 = vmatpush.bf16.msra.mxu3 %v3680_v31  ;;  %v5626_v31 = vpack.c.bf16 %v451_v63, %v444_v55  ;;  %v4283_v55 = vld [vmem:[%s6538_s1 + $0xa0] sm:$0xf0] }
 0x152   : > { %v1758_v27 = vpop.f32.mrf.mxu0  ;;  %2305 = vmatpush.bf16.msra.mxu0 %v3776_v39 }
 0x153   : > { %v1707_v28 = vpop.f32.mrf.mxu3  ;;  %v1807_v7 = vpop.f32.mrf.mxu1  ;;  %6632 = vst [vmem:[#allocation36_spill] sm:$0xff] %v5626_v31 }
 0x154   : > { %v1708_v0 = vadd.f32 %v1707_v28, %v1659_v43 }
 0x156   : > { %v1757_v34 = vadd.f32 %v1756_v16, %v1708_v0  ;;  %v3667_v16 = vld [vmem:[%s6538_s1 + $0x158] sm:$0xf] }
 0x158   : > { %v5623_v51 = vadd.f32 %v1805_v5, %v1757_v34  ;;  %v1660_v47 = vpop.f32.mrf.mxu2 }
 0x159   : > { %v1661_v12 = vadd.f32 %v1660_v47, %v5353_v14  ;;  %v3571_v14 = vld [vmem:[%s6538_s1 + $0x98] sm:$0xf] }
 0x15a   : > { %v1761_v43 = vpop.f32.mrf.mxu0  ;;  %v3572_v5 = vor.u32 %v4283_v55, %v3571_v14 }
 0x15b   : > { %v1709_v8 = vpop.f32.mrf.mxu3  ;;  %v1810_v15 = vpop.f32.mrf.mxu1 }
 0x15c   : > { %v1710_v28 = vadd.f32 %v1709_v8, %v1661_v12  ;;  %2208 = vmatpush.bf16.msra.mxu2 %v3572_v5  ;;  %v3763_v8 = vld [vmem:[%s6538_s1 + $0x218] sm:$0xf] }
 0x15d   : > { %4084 = vmatmul.msk.bf16.gmra.mxu2 %vm1496_vm0, %v5626_v31  ;;  %1956 = vmatmul.bf16.gmra.mxu0 %v4999_v20 }
 0x15e   : > { %v1759_v52 = vadd.f32 %v1758_v27, %v1710_v28  ;;  %2005 = vmatmul.bf16.gmra.mxu1 %v5345_v41  ;;  %v4307_v27 = vld [vmem:[%s6538_s1 + $0x160] sm:$0xf0] }
 0x15f   : > { %v3668_v11 = vor.u32 %v4307_v27, %v3667_v16  ;;  %v4331_v28 = vld [vmem:[%s6538_s1 + $0x220] sm:$0xf0] }
 0x160   : > { %1907 = vmatmul.bf16.gmra.mxu3 %v4993_v17  ;;  %v5645_v0 = vadd.f32 %v1807_v7, %v1759_v52  ;;  %v1663_v29 = vpop.f32.mrf.mxu2  ;;  %v3764_v7 = vor.u32 %v4331_v28, %v3763_v8 }
 0x161   : > { %v1664_v34 = vadd.f32 %v1663_v29, %v5375_v44  ;;  %2257 = vmatpush.bf16.msra.mxu3 %v3668_v11 }
 0x162   : > { %v1763_v63 = vpop.f32.mrf.mxu0  ;;  %2306 = vmatpush.bf16.msra.mxu0 %v3764_v7 }
 0x163   : > { %v1712_v39 = vpop.f32.mrf.mxu3  ;;  %v1812_v12 = vpop.f32.mrf.mxu1 }
 0x164   : > { %v1713_v47 = vadd.f32 %v1712_v39, %v1664_v34  ;;  %v5660_v34 = vperm.slane %v5148_v3, 1  ;;  %v4304_v3 = vld [vmem:[%s6538_s1 + $0x148] sm:$0xf0] }
 0x166   : > { %v1762_v52 = vadd.f32 %v1761_v43, %v1713_v47  ;;  %v3655_v43 = vld [vmem:[%s6538_s1 + $0x140] sm:$0xf] }
 0x167   : > { %v3656_v8 = vor.u32 %v4304_v3, %v3655_v43 }
 0x168   : > { %v5654_v14 = vadd.f32 %v1810_v15, %v1762_v52  ;;  %v1665_v44 = vpop.f32.mrf.mxu2  ;;  %v4280_v15 = vld [vmem:[%s6538_s1 + $0x88] sm:$0xf0] }
 0x169   : > { %v1666_v55 = vadd.f32 %v1665_v44, %v5391_v48  ;;  %v3559_v48 = vld [vmem:[%s6538_s1 + $0x80] sm:$0xf]  ;;  %2258 = vmatpush.bf16.msra.mxu3 %v3656_v8 }
 0x16a   : > { %v1922_v5 = vpop.f32.mrf.mxu0  ;;  %v3560_v39 = vor.u32 %v4280_v15, %v3559_v48 }
 0x16b   : > { %v1714_v16 = vpop.f32.mrf.mxu3  ;;  %v1971_v29 = vpop.f32.mrf.mxu1 }
 0x16c   : > { %v1715_v27 = vadd.f32 %v1714_v16, %v1666_v55  ;;  %2209 = vmatpush.bf16.msra.mxu2 %v3560_v39 }
 0x16d   : > { %2019 = vmatmul.bf16.vlgmr.msrb.gmra.mxu2 %v5029_v37  ;;  %2117 = vmatmul.bf16.vlgmr.msrb.gmra.mxu0 %v5031_v38 }
 0x16e   : > { %v1764_v11 = vadd.f32 %v1763_v63, %v1715_v27  ;;  %4085 = vmatmul.msk.bf16.vlgmr.msrb.gmra.mxu1 %vm1496_vm0, %v5389_v40  ;;  %v3751_v27 = vld [vmem:[%s6538_s1 + $0x200] sm:$0xf] }
 0x170   : > { %2068 = vmatmul.bf16.vlgmr.msrb.gmra.mxu3 %v5027_v36  ;;  %v5677_v63 = vadd.f32 %v1812_v12, %v1764_v11  ;;  %v1824_v47 = vpop.f32.mrf.mxu2  ;;  %v4328_v12 = vld [vmem:[%s6538_s1 + $0x208] sm:$0xf0] }
 0x171   : > { %v1825_v28 = vadd.f32 %v1824_v47, %v5419_v9  ;;  %v3752_v11 = vor.u32 %v4328_v12, %v3751_v27  ;;  %v4301_v27 = vld [vmem:[%s6538_s1 + $0x130] sm:$0xf0] }
 0x172   : > { %v1924_v44 = vpop.f32.mrf.mxu0 }
 0x173   : > { %v1873_v52 = vpop.f32.mrf.mxu3  ;;  %v1973_v55 = vpop.f32.mrf.mxu1  ;;  %2307 = vmatpush.bf16.msra.mxu0 %v3752_v11 }
 0x174   : > { %v1874_v7 = vadd.f32 %v1873_v52, %v5660_v34 }
 0x176   : > { %v1923_v16 = vadd.f32 %v1922_v5, %v1874_v7  ;;  %v2550_v5 = vmax.f32 %v1825_v28, 0.0  ;;  %v3643_v28 = vld [vmem:[%s6538_s1 + $0x128] sm:$0xf] }
 0x177   : > { %v3644_v11 = vor.u32 %v4301_v27, %v3643_v28 }
 0x178   : > { %v5687_v48 = vadd.f32 %v1971_v29, %v1923_v16  ;;  %v1826_v9 = vpop.f32.mrf.mxu2  ;;  %v4277_v29 = vld [vmem:[%s6538_s1 + $0x70] sm:$0xf0] }
 0x179   : > { %v1827_v15 = vadd.f32 %v1826_v9, %v5441_v46  ;;  %v3547_v46 = vld [vmem:[%s6538_s1 + $0x68] sm:$0xf]  ;;  %2259 = vmatpush.bf16.msra.mxu3 %v3644_v11 }
 0x17a   : > { %v1927_v3 = vpop.f32.mrf.mxu0  ;;  %v3548_v16 = vor.u32 %v4277_v29, %v3547_v46 }
 0x17b   : > { %v1875_v43 = vpop.f32.mrf.mxu3  ;;  %v2553_v47 = vmax.f32 %v1827_v15, 0.0  ;;  %v1976_v8 = vpop.f32.mrf.mxu1 }
 0x17c   : > { %v1876_v39 = vadd.f32 %v1875_v43, %v5660_v34  ;;  %2210 = vmatpush.bf16.msra.mxu2 %v3548_v16 }
 0x17d   : > { %v5691_v7 = vpack.c.bf16 %v2553_v47, %v2550_v5  ;;  %2024 = vmatmul.bf16.gmra.mxu2 %v5061_v59  ;;  %2122 = vmatmul.bf16.gmra.mxu0 %v5063_v60 }
 0x17e   : > { %v1925_v52 = vadd.f32 %v1924_v44, %v1876_v39  ;;  %4086 = vmatmul.msk.bf16.gmra.mxu1 %vm1496_vm0, %v5422_v13 }
 0x180   : > { %2073 = vmatmul.bf16.gmra.mxu3 %v5059_v58  ;;  %v5707_v44 = vadd.f32 %v1973_v55, %v1925_v52  ;;  %v1829_v12 = vpop.f32.mrf.mxu2  ;;  %v3739_v55 = vld [vmem:[%s6538_s1 + $0x1e8] sm:$0xf]  ;;  %v4325_v52 = vld [vmem:[%s6538_s1 + $0x1f0] sm:$0xf0] }
 0x181   : > { %v1830_v9 = vadd.f32 %v1829_v12, %v5452_v50  ;;  %v3740_v46 = vor.u32 %v4325_v52, %v3739_v55  ;;  %v4298_v52 = vld [vmem:[%s6538_s1 + $0x118] sm:$0xf0] }
 0x182   : > { %v1929_v39 = vpop.f32.mrf.mxu0 }
 0x183   : > { %v1878_v15 = vpop.f32.mrf.mxu3  ;;  %v1978_v5 = vpop.f32.mrf.mxu1  ;;  %2308 = vmatpush.bf16.msra.mxu0 %v3740_v46 }
 0x184   : > { %v1879_v43 = vadd.f32 %v1878_v15, %v5660_v34 }
 0x186   : > { %v1928_v47 = vadd.f32 %v1927_v3, %v1879_v43  ;;  %v2556_v3 = vmax.f32 %v1830_v9, 0.0  ;;  %v4274_v9 = vld [vmem:[%s6538_s1 + $0x58] sm:$0xf0] }
 0x188   : > { %v5720_v29 = vadd.f32 %v1976_v8, %v1928_v47  ;;  %v1831_v50 = vpop.f32.mrf.mxu2  ;;  %v6634_v8 = vld [vmem:[#allocation13_spill] sm:$0xff] }
 0x189   : > { %v1832_v28 = vadd.f32 %v1831_v50, %v5474_v6  ;;  %v3535_v6 = vld [vmem:[%s6538_s1 + $0x50] sm:$0xf] }
 0x18a   : > { %v1932_v12 = vpop.f32.mrf.mxu0  ;;  %v3536_v55 = vor.u32 %v4274_v9, %v3535_v6 }
 0x18b   : > { %v1880_v16 = vpop.f32.mrf.mxu3  ;;  %v2559_v11 = vmax.f32 %v1832_v28, 0.0  ;;  %v1981_v15 = vpop.f32.mrf.mxu1 }
 0x18c   : > { %v1881_v27 = vadd.f32 %v1880_v16, %v5660_v34  ;;  %2211 = vmatpush.bf16.msra.mxu2 %v3536_v55 }
 0x18d   : > { %2029 = vmatmul.bf16.gmra.mxu2 %v5093_v25  ;;  %2127 = vmatmul.bf16.gmra.mxu0 %v5095_v26  ;;  %v5726_v60 = vpack.c.bf16 %v2559_v11, %v2556_v3 }
 0x18e   : > { %v1930_v43 = vadd.f32 %v1929_v39, %v1881_v27  ;;  %4087 = vmatmul.msk.bf16.gmra.mxu1 %vm1496_vm0, %v5455_v49  ;;  %v3631_v39 = vld [vmem:[%s6538_s1 + $0x110] sm:$0xf] }
 0x18f   : > { %6633 = vst [vmem:[#allocation37_spill] sm:$0xff] %v5726_v60  ;;  %v3632_v50 = vor.u32 %v4298_v52, %v3631_v39  ;;  %v6635_v49 = vld [vmem:[#allocation16_spill] sm:$0xff] }
 0x190   : > { %2078 = vmatmul.bf16.gmra.mxu3 %v6634_v8  ;;  %v5740_v47 = vadd.f32 %v1978_v5, %v1930_v43  ;;  %v1834_v46 = vpop.f32.mrf.mxu2  ;;  %v3727_v5 = vld [vmem:[%s6538_s1 + $0x1d0] sm:$0xf]  ;;  %v4322_v43 = vld [vmem:[%s6538_s1 + $0x1d8] sm:$0xf0] }
 0x191   : > { %v1835_v28 = vadd.f32 %v1834_v46, %v5485_v2  ;;  %2260 = vmatpush.bf16.msra.mxu3 %v3632_v50  ;;  %v3728_v6 = vor.u32 %v4322_v43, %v3727_v5  ;;  %v6636_v8 = vld [vmem:[#allocation17_spill] sm:$0xff]  ;;  %v4295_v43 = vld [vmem:[%s6538_s1 + $0x100] sm:$0xf0] }
 0x192   : > { %v1934_v3 = vpop.f32.mrf.mxu0 }
 0x193   : > { %v1883_v16 = vpop.f32.mrf.mxu3  ;;  %v1983_v11 = vpop.f32.mrf.mxu1  ;;  %2309 = vmatpush.bf16.msra.mxu0 %v3728_v6 }
 0x194   : > { %v1884_v27 = vadd.f32 %v1883_v16, %v5660_v34 }
 0x196   : > { %v1933_v26 = vadd.f32 %v1932_v12, %v1884_v27  ;;  %v2562_v12 = vmax.f32 %v1835_v28, 0.0  ;;  %v3619_v28 = vld [vmem:[%s6538_s1 + $0xf8] sm:$0xf] }
 0x198   : > { %v5753_v9 = vadd.f32 %v1981_v15, %v1933_v26  ;;  %v1836_v2 = vpop.f32.mrf.mxu2  ;;  %v6638_v26 = vld [vmem:[#allocation15_spill] sm:$0xff]  ;;  %v4271_v15 = vld [vmem:[%s6538_s1 + $0x40] sm:$0xf0] }
 0x199   : > { %v1837_v39 = vadd.f32 %v1836_v2, %v5507_v32  ;;  %v3523_v32 = vld [vmem:[%s6538_s1 + $0x38] sm:$0xf]  ;;  %v3620_v2 = vor.u32 %v4295_v43, %v3619_v28 }
 0x19a   : > { %v1937_v46 = vpop.f32.mrf.mxu0  ;;  %v3524_v5 = vor.u32 %v4271_v15, %v3523_v32 }
 0x19b   : > { %v1885_v55 = vpop.f32.mrf.mxu3  ;;  %v2565_v50 = vmax.f32 %v1837_v39, 0.0  ;;  %v1986_v16 = vpop.f32.mrf.mxu1  ;;  %2261 = vmatpush.bf16.msra.mxu3 %v3620_v2 }
 0x19c   : > { %v1886_v52 = vadd.f32 %v1885_v55, %v5660_v34  ;;  %2212 = vmatpush.bf16.msra.mxu2 %v3524_v5 }
 0x19d   : > { %2034 = vmatmul.bf16.gmra.mxu2 %v6635_v49  ;;  %2132 = vmatmul.bf16.gmra.mxu0 %v6636_v8  ;;  %v5759_v60 = vpack.c.bf16 %v2565_v50, %v2562_v12 }
 0x19e   : > { %v1935_v27 = vadd.f32 %v1934_v3, %v1886_v52  ;;  %4088 = vmatmul.msk.bf16.gmra.mxu1 %vm1496_vm0, %v5488_v35  ;;  %v3871_v35 = vld [vmem:[%s6538_s1 + $0x2f0] sm:$0xf] }
 0x19f   : > { %6637 = vst [vmem:[#allocation16_spill] sm:$0xff] %v5759_v60  ;;  %v6656_v60 = vld [vmem:[#allocation11_spill] sm:$0xff] }
 0x1a0   : > { %2083 = vmatmul.bf16.gmra.mxu3 %v6638_v26  ;;  %v5773_v3 = vadd.f32 %v1983_v11, %v1935_v27  ;;  %v1839_v6 = vpop.f32.mrf.mxu2  ;;  %v3715_v11 = vld [vmem:[%s6538_s1 + $0x1b8] sm:$0xf]  ;;  %v4319_v27 = vld [vmem:[%s6538_s1 + $0x1c0] sm:$0xf0] }
 0x1a1   : > { %v1840_v39 = vadd.f32 %v1839_v6, %v5518_v4  ;;  %v3716_v32 = vor.u32 %v4319_v27, %v3715_v11  ;;  %v6640_v11 = vld [vmem:[#allocation20_spill] sm:$0xff]  ;;  %v6650_v26 = vld [vmem:[#allocation25_spill] sm:$0xff] }
 0x1a2   : > { %v1939_v12 = vpop.f32.mrf.mxu0 }
 0x1a3   : > { %v1888_v55 = vpop.f32.mrf.mxu3  ;;  %v1988_v50 = vpop.f32.mrf.mxu1  ;;  %2310 = vmatpush.bf16.msra.mxu0 %v3716_v32  ;;  %v6642_v32 = vld [vmem:[#allocation18_spill] sm:$0xff] }
 0x1a4   : > { %v1889_v52 = vadd.f32 %v1888_v55, %v5660_v34 }
 0x1a6   : > { %v1938_v8 = vadd.f32 %v1937_v46, %v1889_v52  ;;  %v2568_v46 = vmax.f32 %v1840_v39, 0.0  ;;  %v3511_v39 = vld [vmem:[%s6538_s1 + $0x20] sm:$0xf] }
 0x1a8   : > { %v5786_v15 = vadd.f32 %v1986_v16, %v1938_v8  ;;  %v1841_v4 = vpop.f32.mrf.mxu2  ;;  %v4358_v8 = vld [vmem:[%s6538_s1 + $0x2f8] sm:$0xf0]  ;;  %v6639_v16 = vld [vmem:[#allocation19_spill] sm:$0xff] }
 0x1a9   : > { %v1842_v28 = vadd.f32 %v1841_v4, %v5540_v33  ;;  %v3872_v33 = vor.u32 %v4358_v8, %v3871_v35  ;;  %v3607_v4 = vld [vmem:[%s6538_s1 + $0xe0] sm:$0xf]  ;;  %v4355_v8 = vld [vmem:[%s6538_s1 + $0x2e0] sm:$0xf0] }
 0x1aa   : > { %v1942_v6 = vpop.f32.mrf.mxu0 }
 0x1ab   : > { %v1890_v5 = vpop.f32.mrf.mxu3  ;;  %v2571_v2 = vmax.f32 %v1842_v28, 0.0  ;;  %v1991_v55 = vpop.f32.mrf.mxu1  ;;  %2354 = vmatpush.bf16.msra.mxu1 %v3872_v33 }
 0x1ac   : > { %v1891_v43 = vadd.f32 %v1890_v5, %v5660_v34  ;;  %v4292_v5 = vld [vmem:[%s6538_s1 + $0xe8] sm:$0xf0] }
 0x1ad   : > { %2039 = vmatmul.bf16.gmra.mxu2 %v6639_v16  ;;  %2137 = vmatmul.bf16.gmra.mxu0 %v6640_v11  ;;  %v5798_v27 = vpack.c.bf16 %v2571_v2, %v2568_v46  ;;  %v3608_v46 = vor.u32 %v4292_v5, %v3607_v4  ;;  %v3859_v2 = vld [vmem:[%s6538_s1 + $0x2d8] sm:$0xf]  ;;  %v3847_v5 = vld [vmem:[%s6538_s1 + $0x2c0] sm:$0xf] }
 0x1ae   : > { %v1940_v52 = vadd.f32 %v1939_v12, %v1891_v43  ;;  %4089 = vmatmul.msk.bf16.gmra.mxu1 %vm1496_vm0, %v5521_v42  ;;  %v4268_v12 = vld [vmem:[%s6538_s1 + $0x28] sm:$0xf0] }
 0x1af   : > { %6641 = vst [vmem:[#allocation19_spill] sm:$0xff] %v5798_v27  ;;  %v3512_v28 = vor.u32 %v4268_v12, %v3511_v39  ;;  %2262 = vmatpush.bf16.msra.mxu3 %v3608_v46  ;;  %v4352_v42 = vld [vmem:[%s6538_s1 + $0x2c8] sm:$0xf0]  ;;  %v6643_v27 = vld [vmem:[#allocation22_spill] sm:$0xff] }
 0x1b0   : > { %2088 = vmatmul.bf16.gmra.mxu3 %v6642_v32  ;;  %v5812_v35 = vadd.f32 %v1988_v50, %v1940_v52  ;;  %v1844_v43 = vpop.f32.mrf.mxu2  ;;  %v3860_v52 = vor.u32 %v4355_v8, %v3859_v2  ;;  %v3835_v8 = vld [vmem:[%s6538_s1 + $0x2a8] sm:$0xf]  ;;  %v4346_v32 = vld [vmem:[%s6538_s1 + $0x298] sm:$0xf0] }
 0x1b1   : > { %v1845_v11 = vadd.f32 %v1844_v43, %v5551_v54  ;;  %2213 = vmatpush.bf16.msra.mxu2 %v3512_v28  ;;  %v3703_v54 = vld [vmem:[%s6538_s1 + $0x1a0] sm:$0xf]  ;;  %v3848_v28 = vor.u32 %v4352_v42, %v3847_v5  ;;  %v4316_v43 = vld [vmem:[%s6538_s1 + $0x1a8] sm:$0xf0] }
 0x1b2   : > { %v1944_v39 = vpop.f32.mrf.mxu0  ;;  %2355 = vmatpush.bf16.msra.mxu1 %v3860_v52  ;;  %v3704_v46 = vor.u32 %v4316_v43, %v3703_v54 }
 0x1b3   : > { %v1893_v50 = vpop.f32.mrf.mxu3  ;;  %v1993_v12 = vpop.f32.mrf.mxu1 }
 0x1b4   : > { %v1894_v33 = vadd.f32 %v1893_v50, %v5660_v34  ;;  %2311 = vmatpush.bf16.msra.mxu0 %v3704_v46  ;;  %v4349_v50 = vld [vmem:[%s6538_s1 + $0x2b0] sm:$0xf0]  ;;  %v3823_v46 = vld [vmem:[%s6538_s1 + $0x290] sm:$0xf] }
 0x1b6   : > { %v1943_v4 = vadd.f32 %v1942_v6, %v1894_v33  ;;  %2356 = vmatpush.bf16.msra.mxu1 %v3848_v28  ;;  %v3836_v33 = vor.u32 %v4349_v50, %v3835_v8  ;;  %v4265_v50 = vld [vmem:[%s6538_s1 + $0x10] sm:$0xf0] }
 0x1b8   : > { %v5837_v2 = vadd.f32 %v1991_v55, %v1943_v4  ;;  %v1846_v6 = vpop.f32.mrf.mxu2  ;;  %v2574_v55 = vmax.f32 %v1845_v11, 0.0  ;;  %v6646_v11 = vld [vmem:[#allocation21_spill] sm:$0xff] }
 0x1b9   : > { %v1847_v42 = vadd.f32 %v1846_v6, %v5573_v24  ;;  %v6644_v24 = vld [vmem:[#allocation23_spill] sm:$0xff]  ;;  %v3824_v6 = vor.u32 %v4346_v32, %v3823_v46  ;;  %v4343_v46 = vld [vmem:[%s6538_s1 + $0x280] sm:$0xf0] }
 0x1ba   : > { %v1947_v54 = vpop.f32.mrf.mxu0  ;;  %2357 = vmatpush.bf16.msra.mxu1 %v3836_v33  ;;  %v4289_v33 = vld [vmem:[%s6538_s1 + $0xd0] sm:$0xf0] }
 0x1bb   : > { %v1895_v52 = vpop.f32.mrf.mxu3  ;;  %v2577_v4 = vmax.f32 %v1847_v42, 0.0  ;;  %v1996_v28 = vpop.f32.mrf.mxu1  ;;  %v3595_v42 = vld [vmem:[%s6538_s1 + $0xc8] sm:$0xf] }
 0x1bc   : > { %v1896_v5 = vadd.f32 %v1895_v52, %v5660_v34 }
 0x1bd   : > { %2044 = vmatmul.bf16.gmra.mxu2 %v6643_v27  ;;  %2142 = vmatmul.bf16.gmra.mxu0 %v6644_v24  ;;  %v5855_v8 = vpack.c.bf16 %v2577_v4, %v2574_v55  ;;  %v3596_v55 = vor.u32 %v4289_v33, %v3595_v42  ;;  %v3811_v4 = vld [vmem:[%s6538_s1 + $0x278] sm:$0xf]  ;;  %v3799_v33 = vld [vmem:[%s6538_s1 + $0x260] sm:$0xf] }
 0x1be   : > { %v1945_v43 = vadd.f32 %v1944_v39, %v1896_v5  ;;  %4090 = vmatmul.msk.bf16.gmra.mxu1 %vm1496_vm0, %v5554_v22  ;;  %v3499_v39 = vld [vmem:[%s6538_s1 + $0x8] sm:$0xf]  ;;  %v4340_v22 = vld [vmem:[%s6538_s1 + $0x268] sm:$0xf0] }
 0x1bf   : > { %6645 = vst [vmem:[#allocation22_spill] sm:$0xff] %v5855_v8  ;;  %v3500_v52 = vor.u32 %v4265_v50, %v3499_v39  ;;  %2358 = vmatpush.bf16.msra.mxu1 %v3824_v6  ;;  %2263 = vmatpush.bf16.msra.mxu3 %v3596_v55 }
 0x1c0   : > { %2093 = vmatmul.bf16.gmra.mxu3 %v6646_v11  ;;  %v5869_v32 = vadd.f32 %v1993_v12, %v1945_v43  ;;  %v1849_v5 = vpop.f32.mrf.mxu2  ;;  %v3812_v43 = vor.u32 %v4343_v46, %v3811_v4  ;;  %v3787_v46 = vld [vmem:[%s6538_s1 + $0x248] sm:$0xf] }
 0x1c1   : > { %v1850_v24 = vadd.f32 %v1849_v5, %v5584_v19  ;;  %2214 = vmatpush.bf16.msra.mxu2 %v3500_v52  ;;  %v3691_v19 = vld [vmem:[%s6538_s1 + $0x188] sm:$0xf]  ;;  %v3800_v52 = vor.u32 %v4340_v22, %v3799_v33  ;;  %v4313_v5 = vld [vmem:[%s6538_s1 + $0x190] sm:$0xf0] }
 0x1c2   : > { %v1949_v39 = vpop.f32.mrf.mxu0  ;;  %v3692_v55 = vor.u32 %v4313_v5, %v3691_v19  ;;  %v6648_v11 = vld [vmem:[#allocation27_spill] sm:$0xff] }
 0x1c3   : > { %v1898_v12 = vpop.f32.mrf.mxu3  ;;  %v1998_v50 = vpop.f32.mrf.mxu1  ;;  %2359 = vmatpush.bf16.msra.mxu1 %v3812_v43 }
 0x1c4   : > { %v1899_v6 = vadd.f32 %v1898_v12, %v5660_v34  ;;  %2312 = vmatpush.bf16.msra.mxu0 %v3692_v55  ;;  %v4337_v12 = vld [vmem:[%s6538_s1 + $0x250] sm:$0xf0]  ;;  %v6647_v55 = vld [vmem:[#allocation26_spill] sm:$0xff] }
 0x1c6   : > { %v1948_v42 = vadd.f32 %v1947_v54, %v1899_v6  ;;  %v3788_v6 = vor.u32 %v4337_v12, %v3787_v46  ;;  %v4406_v12 = vld [vmem:[%s6538_s1 + $0x478] sm:$0xf0] }
 0x1c7   : > { %2360 = vmatpush.bf16.msra.mxu1 %v3800_v52 }
 0x1c8   : > { %v5894_v4 = vadd.f32 %v1996_v28, %v1948_v42  ;;  %v1851_v54 = vpop.f32.mrf.mxu2  ;;  %v2580_v28 = vmax.f32 %v1850_v24, 0.0  ;;  %v4382_v24 = vld [vmem:[%s6538_s1 + $0x3b8] sm:$0xf0] }
 0x1c9   : > { %v1852_v22 = vadd.f32 %v1851_v54, %v5612_v10  ;;  %v3967_v10 = vld [vmem:[%s6538_s1 + $0x3b0] sm:$0xf] }
 0x1ca   : > { %v1952_v19 = vpop.f32.mrf.mxu0  ;;  %v3968_v46 = vor.u32 %v4382_v24, %v3967_v10  ;;  %v4075_v24 = vld [vmem:[%s6538_s1 + $0x488] sm:$0xf] }
 0x1cb   : > { %v1900_v43 = vpop.f32.mrf.mxu3  ;;  %v2583_v42 = vmax.f32 %v1852_v22, 0.0  ;;  %v2001_v52 = vpop.f32.mrf.mxu1  ;;  %2361 = vmatpush.bf16.msra.mxu1 %v3788_v6 }
 0x1cc   : > { %v1901_v33 = vadd.f32 %v1900_v43, %v5660_v34  ;;  %2403 = vmatpush.bf16.msrb.mxu2 %v3968_v46 }
 0x1cd   : > { %2049 = vmatmul.bf16.gmra.mxu2 %v6647_v55  ;;  %2147 = vmatmul.bf16.gmra.mxu0 %v6648_v11  ;;  %v5906_v8 = vpack.c.bf16 %v2583_v42, %v2580_v28 }
 0x1ce   : > { %v1950_v5 = vadd.f32 %v1949_v39, %v1901_v33  ;;  %4091 = vmatmul.msk.bf16.gmra.mxu1 %vm1496_vm0, %v5593_v30  ;;  %v4063_v39 = vld [vmem:[%s6538_s1 + $0x470] sm:$0xf] }
 0x1cf   : > { %6649 = vst [vmem:[#allocation26_spill] sm:$0xff] %v5906_v8  ;;  %v4064_v43 = vor.u32 %v4406_v12, %v4063_v39  ;;  %v6655_v8 = vld [vmem:[#allocation2_spill] sm:$0xff] }
 0x1d0   : > { %2098 = vmatmul.bf16.gmra.mxu3 %v6650_v26  ;;  %v5920_v54 = vadd.f32 %v1998_v50, %v1950_v5  ;;  %v1854_v22 = vpop.f32.mrf.mxu2 }
 0x1d1   : > { %v1855_v6 = vadd.f32 %v1854_v22, %v5623_v51  ;;  %2452 = vmatpush.bf16.msrb.mxu3 %v4064_v43  ;;  %v4409_v51 = vld [vmem:[%s6538_s1 + $0x490] sm:$0xf0]  ;;  %v6651_v43 = vld [vmem:[#allocation29_spill] sm:$0xff] }
 0x1d2   : > { %v1954_v42 = vpop.f32.mrf.mxu0  ;;  %v4076_v12 = vor.u32 %v4409_v51, %v4075_v24 }
 0x1d3   : > { %v1903_v33 = vpop.f32.mrf.mxu3  ;;  %v2003_v11 = vpop.f32.mrf.mxu1  ;;  %v2586_v22 = vmax.f32 %v1855_v6, 0.0 }
 0x1d4   : > { %v1904_v28 = vadd.f32 %v1903_v33, %v5660_v34  ;;  %2508 = vmatpush.bf16.msrb.mxu0 %v4076_v12  ;;  %v4379_v12 = vld [vmem:[%s6538_s1 + $0x3a0] sm:$0xf0] }
 0x1d6   : > { %v1953_v30 = vadd.f32 %v1952_v19, %v1904_v28  ;;  %v6654_v28 = vld [vmem:[#allocation28_spill] sm:$0xff] }
 0x1d8   : > { %v5927_v26 = vadd.f32 %v2001_v52, %v1953_v30  ;;  %v1856_v50 = vpop.f32.mrf.mxu2 }
 0x1d9   : > { %v1857_v5 = vadd.f32 %v1856_v50, %v5645_v0  ;;  %v6652_v0 = vld [vmem:[#allocation30_spill] sm:$0xff] }
 0x1da   : > { %v1957_v46 = vpop.f32.mrf.mxu0 }
 0x1db   : > { %v1905_v10 = vpop.f32.mrf.mxu3  ;;  %v2589_v19 = vmax.f32 %v1857_v5, 0.0  ;;  %v2006_v30 = vpop.f32.mrf.mxu1 }
 0x1dc   : > { %v1906_v39 = vadd.f32 %v1905_v10, %v5660_v34 }
 0x1dd   : > { %2054 = vmatmul.bf16.gmra.mxu2 %v6651_v43  ;;  %2152 = vmatmul.bf16.gmra.mxu0 %v6652_v0  ;;  %v5939_v33 = vpack.c.bf16 %v2589_v19, %v2586_v22 }
 0x1de   : > { %v1955_v52 = vadd.f32 %v1954_v42, %v1906_v39  ;;  %4092 = vmatmul.msk.bf16.gmra.mxu1 %vm1496_vm0, %v5626_v31  ;;  %v3955_v39 = vld [vmem:[%s6538_s1 + $0x398] sm:$0xf] }
 0x1df   : > { %6653 = vst [vmem:[#allocation29_spill] sm:$0xff] %v5939_v33  ;;  %v3956_v19 = vor.u32 %v4379_v12, %v3955_v39 }
 0x1e0   : > { %2103 = vmatmul.bf16.gmra.mxu3 %v6654_v28  ;;  %v5944_v50 = vadd.f32 %v2003_v11, %v1955_v52  ;;  %v1859_v10 = vpop.f32.mrf.mxu2  ;;  %v4051_v11 = vld [vmem:[%s6538_s1 + $0x458] sm:$0xf] }
 0x1e1   : > { %v1860_v6 = vadd.f32 %v1859_v10, %v5654_v14  ;;  %v4403_v14 = vld [vmem:[%s6538_s1 + $0x460] sm:$0xf0]  ;;  %2404 = vmatpush.bf16.msrb.mxu2 %v3956_v19 }
 0x1e2   : > { %v1959_v24 = vpop.f32.mrf.mxu0  ;;  %v4052_v52 = vor.u32 %v4403_v14, %v4051_v11 }
 0x1e3   : > { %v1908_v5 = vpop.f32.mrf.mxu3  ;;  %v2008_v51 = vpop.f32.mrf.mxu1  ;;  %v2592_v39 = vmax.f32 %v1860_v6, 0.0 }
 0x1e4   : > { %v1909_v42 = vadd.f32 %v1908_v5, %v5660_v34  ;;  %2453 = vmatpush.bf16.msrb.mxu3 %v4052_v52 }
 0x1e6   : > { %v1958_v22 = vadd.f32 %v1957_v46, %v1909_v42 }
 0x1e8   : > { %v5960_v10 = vadd.f32 %v2006_v30, %v1958_v22  ;;  %v1861_v5 = vpop.f32.mrf.mxu2  ;;  %v6657_v30 = vld [vmem:[#allocation3_spill] sm:$0xff] }
 0x1e9   : > { %v1862_v0 = vadd.f32 %v1861_v5, %v5677_v63 }
 0x1ea   : > { %v2118_v42 = vpop.f32.mrf.mxu0 }
 0x1eb   : > { %v1910_v31 = vpop.f32.mrf.mxu3  ;;  %v2595_v12 = vmax.f32 %v1862_v0, 0.0  ;;  %v2167_v28 = vpop.f32.mrf.mxu1 }
 0x1ec   : > { %v1911_v46 = vadd.f32 %v1910_v31, %v5660_v34  ;;  %v3943_v31 = vld [vmem:[%s6538_s1 + $0x380] sm:$0xf]  ;;  %v4376_v34 = vld [vmem:[%s6538_s1 + $0x388] sm:$0xf0] }
 0x1ed   : > { %2215 = vmatmul.bf16.vlgmr.msra.gmra.mxu2 %v6655_v8  ;;  %2313 = vmatmul.bf16.vlgmr.msra.gmra.mxu0 %v6656_v60  ;;  %v5966_v11 = vpack.c.bf16 %v2595_v12, %v2592_v39  ;;  %v4039_v60 = vld [vmem:[%s6538_s1 + $0x440] sm:$0xf]  ;;  %v3944_v8 = vor.u32 %v4376_v34, %v3943_v31 }
 0x1ee   : > { %v1960_v33 = vadd.f32 %v1959_v24, %v1911_v46  ;;  %2362 = vmatmul.bf16.vlgmr.msra.gmra.mxu1 %v5029_v37  ;;  %v4400_v37 = vld [vmem:[%s6538_s1 + $0x448] sm:$0xf0] }
 0x1ef   : > { %v4040_v6 = vor.u32 %v4400_v37, %v4039_v60  ;;  %2405 = vmatpush.bf16.msrb.mxu2 %v3944_v8 }
 0x1f0   : > { %2264 = vmatmul.bf16.vlgmr.msra.gmra.mxu3 %v6657_v30  ;;  %v5970_v22 = vadd.f32 %v2008_v51, %v1960_v33  ;;  %v2020_v63 = vpop.f32.mrf.mxu2 }
 0x1f1   : > { %v2021_v0 = vadd.f32 %v2020_v63, %v5687_v48  ;;  %2454 = vmatpush.bf16.msrb.mxu3 %v4040_v6  ;;  %v6658_v48 = vld [vmem:[#allocation5_spill] sm:$0xff] }
 0x1f2   : > { %v2120_v24 = vpop.f32.mrf.mxu0 }
 0x1f3   : > { %v2069_v33 = vpop.f32.mrf.mxu3  ;;  %v2169_v19 = vpop.f32.mrf.mxu1 }
 0x1f4   : > { %v2070_v51 = vadd.f32 %v2069_v33, %v2021_v0 }
 0x1f6   : > { %v2119_v14 = vadd.f32 %v2118_v42, %v2070_v51  ;;  %v4027_v42 = vld [vmem:[%s6538_s1 + $0x428] sm:$0xf] }
 0x1f8   : > { %v2168_v52 = vadd.f32 %v2167_v28, %v2119_v14  ;;  %v2022_v5 = vpop.f32.mrf.mxu2  ;;  %v3931_v28 = vld [vmem:[%s6538_s1 + $0x368] sm:$0xf] }
 0x1f9   : > { %v2023_v46 = vadd.f32 %v2022_v5, %v5707_v44  ;;  %v4373_v44 = vld [vmem:[%s6538_s1 + $0x370] sm:$0xf0] }
 0x1fa   : > { %v2123_v12 = vpop.f32.mrf.mxu0  ;;  %v3932_v63 = vor.u32 %v4373_v44, %v3931_v28 }
 0x1fb   : > { %v2071_v39 = vpop.f32.mrf.mxu3  ;;  %v2172_v31 = vpop.f32.mrf.mxu1 }
 0x1fc   : > { %v2072_v30 = vadd.f32 %v2071_v39, %v2023_v46  ;;  %2406 = vmatpush.bf16.msrb.mxu2 %v3932_v63 }
 0x1fd   : > { %2220 = vmatmul.bf16.gmra.mxu2 %v4862_v62  ;;  %2318 = vmatmul.bf16.gmra.mxu0 %v5057_v57  ;;  %v4397_v57 = vld [vmem:[%s6538_s1 + $0x430] sm:$0xf0] }
 0x1fe   : > { %v2121_v34 = vadd.f32 %v2120_v24, %v2072_v30  ;;  %2367 = vmatmul.bf16.gmra.mxu1 %v5061_v59  ;;  %v2551_v59 = vmax.f32 %v2168_v52, 0.0  ;;  %v4028_v33 = vor.u32 %v4397_v57, %v4027_v42 }
 0x200   : > { %2269 = vmatmul.bf16.gmra.mxu3 %v6658_v48  ;;  %v2170_v60 = vadd.f32 %v2169_v19, %v2121_v34  ;;  %v2025_v62 = vpop.f32.mrf.mxu2 }
 0x201   : > { %v2026_v37 = vadd.f32 %v2025_v62, %v5720_v29  ;;  %2455 = vmatpush.bf16.msrb.mxu3 %v4028_v33  ;;  %v6659_v29 = vld [vmem:[#allocation8_spill] sm:$0xff] }
 0x202   : > { %v2554_v8 = vmax.f32 %v2170_v60, 0.0  ;;  %v2125_v6 = vpop.f32.mrf.mxu0 }
 0x203   : > { %v2074_v0 = vpop.f32.mrf.mxu3  ;;  %v2174_v19 = vpop.f32.mrf.mxu1 }
 0x204   : > { %v6003_v24 = vpack.c.bf16 %v2554_v8, %v2551_v59  ;;  %v2075_v51 = vadd.f32 %v2074_v0, %v2026_v37 }
 0x206   : > { %v2124_v14 = vadd.f32 %v2123_v12, %v2075_v51  ;;  %v3919_v12 = vld [vmem:[%s6538_s1 + $0x350] sm:$0xf] }
 0x208   : > { %v2173_v5 = vadd.f32 %v2172_v31, %v2124_v14  ;;  %v2027_v46 = vpop.f32.mrf.mxu2  ;;  %v4015_v31 = vld [vmem:[%s6538_s1 + $0x410] sm:$0xf] }
 0x209   : > { %v2028_v39 = vadd.f32 %v2027_v46, %v5740_v47  ;;  %v4370_v47 = vld [vmem:[%s6538_s1 + $0x358] sm:$0xf0] }
 0x20a   : > { %v2128_v34 = vpop.f32.mrf.mxu0  ;;  %v3920_v44 = vor.u32 %v4370_v47, %v3919_v12 }
 0x20b   : > { %v2076_v30 = vpop.f32.mrf.mxu3  ;;  %v2177_v48 = vpop.f32.mrf.mxu1 }
 0x20c   : > { %v2077_v52 = vadd.f32 %v2076_v30, %v2028_v39  ;;  %2407 = vmatpush.bf16.msrb.mxu2 %v3920_v44  ;;  %v6660_v30 = vld [vmem:[#allocation10_spill] sm:$0xff] }
 0x20d   : > { %2225 = vmatmul.bf16.gmra.mxu2 %v4957_v53  ;;  %2323 = vmatmul.bf16.gmra.mxu0 %v5089_v23  ;;  %v4394_v23 = vld [vmem:[%s6538_s1 + $0x418] sm:$0xf0] }
 0x20e   : > { %v2126_v60 = vadd.f32 %v2125_v6, %v2077_v52  ;;  %2372 = vmatmul.bf16.gmra.mxu1 %v5093_v25  ;;  %v2557_v25 = vmax.f32 %v2173_v5, 0.0  ;;  %v4016_v63 = vor.u32 %v4394_v23, %v4015_v31 }
 0x210   : > { %2274 = vmatmul.bf16.gmra.mxu3 %v6659_v29  ;;  %v2175_v28 = vadd.f32 %v2174_v19, %v2126_v60  ;;  %v2030_v53 = vpop.f32.mrf.mxu2 }
 0x211   : > { %v2031_v42 = vadd.f32 %v2030_v53, %v5753_v9  ;;  %2456 = vmatpush.bf16.msrb.mxu3 %v4016_v63 }
 0x212   : > { %v2560_v57 = vmax.f32 %v2175_v28, 0.0  ;;  %v2130_v59 = vpop.f32.mrf.mxu0 }
 0x213   : > { %v2079_v62 = vpop.f32.mrf.mxu3  ;;  %v2179_v37 = vpop.f32.mrf.mxu1 }
 0x214   : > { %v2080_v8 = vadd.f32 %v2079_v62, %v2031_v42  ;;  %v6023_v0 = vpack.c.bf16 %v2560_v57, %v2557_v25 }
 0x216   : > { %v2129_v33 = vadd.f32 %v2128_v34, %v2080_v8  ;;  %v3907_v34 = vld [vmem:[%s6538_s1 + $0x338] sm:$0xf] }
 0x218   : > { %v2178_v6 = vadd.f32 %v2177_v48, %v2129_v33  ;;  %v2032_v51 = vpop.f32.mrf.mxu2  ;;  %v4003_v48 = vld [vmem:[%s6538_s1 + $0x3f8] sm:$0xf] }
 0x219   : > { %v2033_v19 = vadd.f32 %v2032_v51, %v5773_v3  ;;  %v4367_v3 = vld [vmem:[%s6538_s1 + $0x340] sm:$0xf0]  ;;  %v4417_v33 = vld [vmem:[%s6540_s3 + $0x38] sm:$0xff] }
 0x21a   : > { %v2133_v46 = vpop.f32.mrf.mxu0  ;;  %v3908_v60 = vor.u32 %v4367_v3, %v3907_v34  ;;  %2818 = vmatpush.bf16.msrb.mxu1 %v4417_v33  ;;  %v4412_v33 = vld [vmem:[%s6540_s3 + $0x10] sm:$0xff] }
 0x21b   : > { %v2081_v14 = vpop.f32.mrf.mxu3  ;;  %v2182_v39 = vpop.f32.mrf.mxu1 }
 0x21c   : > { %v2082_v5 = vadd.f32 %v2081_v14, %v2033_v19  ;;  %2408 = vmatpush.bf16.msrb.mxu2 %v3908_v60  ;;  %v4364_v19 = vld [vmem:[%s6538_s1 + $0x328] sm:$0xf0] }
 0x21d   : > { %2230 = vmatmul.bf16.gmra.mxu2 %v4995_v18  ;;  %2328 = vmatmul.bf16.gmra.mxu0 %v5121_v45  ;;  %v4391_v45 = vld [vmem:[%s6538_s1 + $0x400] sm:$0xf0] }
 0x21e   : > { %v2131_v9 = vadd.f32 %v2130_v59, %v2082_v5  ;;  %2377 = vmatmul.bf16.gmra.mxu1 %v6635_v49  ;;  %v2563_v49 = vmax.f32 %v2178_v6, 0.0  ;;  %v4004_v12 = vor.u32 %v4391_v45, %v4003_v48  ;;  %v6661_v6 = vld [vmem:[#allocation4_spill] sm:$0xff] }
 0x220   : > { %2279 = vmatmul.bf16.gmra.mxu3 %v6660_v30  ;;  %v2180_v52 = vadd.f32 %v2179_v37, %v2131_v9  ;;  %v2035_v18 = vpop.f32.mrf.mxu2  ;;  %v4416_v30 = vld [vmem:[%s6540_s3 + $0x30] sm:$0xff] }
 0x221   : > { %v2036_v29 = vadd.f32 %v2035_v18, %v5786_v15  ;;  %2457 = vmatpush.bf16.msrb.mxu3 %v4004_v12  ;;  %2819 = vmatpush.bf16.msrb.mxu1 %v4416_v30  ;;  %v4414_v12 = vld [vmem:[%s6540_s3 + $0x20] sm:$0xff] }
 0x222   : > { %v2566_v47 = vmax.f32 %v2180_v52, 0.0  ;;  %v2135_v31 = vpop.f32.mrf.mxu0 }
 0x223   : > { %v2084_v28 = vpop.f32.mrf.mxu3  ;;  %v2184_v44 = vpop.f32.mrf.mxu1 }
 0x224   : > { %v2085_v53 = vadd.f32 %v2084_v28, %v2036_v29  ;;  %v6043_v23 = vpack.c.bf16 %v2566_v47, %v2563_v49 }
 0x226   : > { %v2134_v25 = vadd.f32 %v2133_v46, %v2085_v53 }
 0x228   : > { %v2183_v42 = vadd.f32 %v2182_v39, %v2134_v25  ;;  %v2037_v62 = vpop.f32.mrf.mxu2  ;;  %v4413_v25 = vld [vmem:[%s6540_s3 + $0x18] sm:$0xff] }
 0x229   : > { %v2038_v63 = vadd.f32 %v2037_v62, %v5812_v35  ;;  %v3895_v35 = vld [vmem:[%s6538_s1 + $0x320] sm:$0xf]  ;;  %v3883_v62 = vld [vmem:[%s6538_s1 + $0x308] sm:$0xf] }
 0x22a   : > { %v2138_v59 = vpop.f32.mrf.mxu0  ;;  %v3896_v14 = vor.u32 %v4364_v19, %v3895_v35  ;;  %v2569_v46 = vmax.f32 %v2183_v42, 0.0  ;;  %v6662_v42 = vld [vmem:[#allocation6_spill] sm:$0xff] }
 0x22b   : > { %v2086_v57 = vpop.f32.mrf.mxu3  ;;  %v2187_v37 = vpop.f32.mrf.mxu1 }
 0x22c   : > { %v2087_v8 = vadd.f32 %v2086_v57, %v2038_v63  ;;  %2409 = vmatpush.bf16.msrb.mxu2 %v3896_v14  ;;  %v4361_v63 = vld [vmem:[%s6538_s1 + $0x310] sm:$0xf0] }
 0x22d   : > { %2235 = vmatmul.bf16.gmra.mxu2 %v4744_v1  ;;  %2333 = vmatmul.bf16.gmra.mxu0 %v5161_v21  ;;  %v3991_v1 = vld [vmem:[%s6538_s1 + $0x3e0] sm:$0xf]  ;;  %v3884_v57 = vor.u32 %v4361_v63, %v3883_v62 }
 0x22e   : > { %v2136_v15 = vadd.f32 %v2135_v31, %v2087_v8  ;;  %2382 = vmatmul.bf16.gmra.mxu1 %v6639_v16  ;;  %v4388_v16 = vld [vmem:[%s6538_s1 + $0x3e8] sm:$0xf0] }
 0x22f   : > { %v3992_v9 = vor.u32 %v4388_v16, %v3991_v1 }
 0x230   : > { %2284 = vmatmul.bf16.gmra.mxu3 %v6661_v6  ;;  %v2185_v51 = vadd.f32 %v2184_v44, %v2136_v15  ;;  %v2040_v21 = vpop.f32.mrf.mxu2  ;;  %2410 = vmatpush.bf16.msrb.mxu2 %v3884_v57 }
 0x231   : > { %v2041_v5 = vadd.f32 %v2040_v21, %v5837_v2  ;;  %2458 = vmatpush.bf16.msrb.mxu3 %v3992_v9  ;;  %v4415_v2 = vld [vmem:[%s6540_s3 + $0x28] sm:$0xff] }
 0x232   : > { %v2572_v52 = vmax.f32 %v2185_v51, 0.0  ;;  %v2140_v34 = vpop.f32.mrf.mxu0  ;;  %2820 = vmatpush.bf16.msrb.mxu1 %v4415_v2 }
 0x233   : > { %v2089_v39 = vpop.f32.mrf.mxu3  ;;  %v2189_v48 = vpop.f32.mrf.mxu1 }
 0x234   : > { %v2090_v3 = vadd.f32 %v2089_v39, %v2041_v5  ;;  %v6069_v18 = vpack.c.bf16 %v2572_v52, %v2569_v46  ;;  %v4410_v39 = vld [vmem:[%s6540_s3] sm:$0xff] }
 0x236   : > { %v2139_v60 = vadd.f32 %v2138_v59, %v2090_v3  ;;  %2821 = vmatpush.bf16.msrb.mxu1 %v4414_v12  ;;  %v6663_v3 = vld [vmem:[#allocation7_spill] sm:$0xff] }
 0x238   : > { %v2188_v45 = vadd.f32 %v2187_v37, %v2139_v60  ;;  %v2042_v49 = vpop.f32.mrf.mxu2  ;;  %v6665_v60 = vld [vmem:[#allocation9_spill] sm:$0xff] }
 0x239   : > { %v2043_v29 = vadd.f32 %v2042_v49, %v5869_v32 }
 0x23a   : > { %v2143_v47 = vpop.f32.mrf.mxu0  ;;  %2822 = vmatpush.bf16.msrb.mxu1 %v4413_v25  ;;  %v2575_v59 = vmax.f32 %v2188_v45, 0.0 }
 0x23b   : > { %v2091_v28 = vpop.f32.mrf.mxu3  ;;  %v2192_v53 = vpop.f32.mrf.mxu1 }
 0x23c   : > { %v2092_v31 = vadd.f32 %v2091_v28, %v2043_v29 }
 0x23d   : > { %2240 = vmatmul.bf16.gmra.mxu2 %v4860_v61  ;;  %2338 = vmatmul.bf16.gmra.mxu0 %v5227_v56  ;;  %v3979_v61 = vld [vmem:[%s6538_s1 + $0x3c8] sm:$0xf] }
 0x23e   : > { %v2141_v44 = vadd.f32 %v2140_v34, %v2092_v31  ;;  %2387 = vmatmul.bf16.gmra.mxu1 %v6643_v27  ;;  %v4385_v27 = vld [vmem:[%s6538_s1 + $0x3d0] sm:$0xf0] }
 0x23f   : > { %v3980_v15 = vor.u32 %v4385_v27, %v3979_v61  ;;  %2823 = vmatpush.bf16.msrb.mxu1 %v4412_v33 }
 0x240   : > { %2289 = vmatmul.bf16.gmra.mxu3 %v6662_v42  ;;  %v2190_v32 = vadd.f32 %v2189_v48, %v2141_v44  ;;  %v2045_v56 = vpop.f32.mrf.mxu2  ;;  %v6664_v48 = vld [vmem:[#allocation24_spill] sm:$0xff] }
 0x241   : > { %v2046_v8 = vadd.f32 %v2045_v56, %v5894_v4  ;;  %2459 = vmatpush.bf16.msrb.mxu3 %v3980_v15  ;;  %v4411_v4 = vld [vmem:[%s6540_s3 + $0x8] sm:$0xff] }
 0x242   : > { %v2578_v6 = vmax.f32 %v2190_v32, 0.0  ;;  %v2145_v51 = vpop.f32.mrf.mxu0 }
 0x243   : > { %v2094_v37 = vpop.f32.mrf.mxu3  ;;  %v2194_v19 = vpop.f32.mrf.mxu1  ;;  %2824 = vmatpush.bf16.msrb.mxu1 %v4411_v4 }
 0x244   : > { %v2095_v35 = vadd.f32 %v2094_v37, %v2046_v8  ;;  %v6101_v1 = vpack.c.bf16 %v2578_v6, %v2575_v59 }
 0x246   : > { %v2144_v21 = vadd.f32 %v2143_v47, %v2095_v35 }
 0x247   : > { %2825 = vmatpush.bf16.msrb.mxu1 %v4410_v39 }
 0x248   : > { %v2193_v14 = vadd.f32 %v2192_v53, %v2144_v21  ;;  %v2047_v16 = vpop.f32.mrf.mxu2 }
 0x249   : > { %v2048_v46 = vadd.f32 %v2047_v16, %v5920_v54  ;;  %v4542_v16 = vld [vmem:[%s6539_s2] sm:$0x7] }
 0x24a   : > { %v2148_v9 = vpop.f32.mrf.mxu0  ;;  %v2581_v45 = vmax.f32 %v2193_v14, 0.0 }
 0x24b   : > { %v2096_v5 = vpop.f32.mrf.mxu3  ;;  %v2197_v52 = vpop.f32.mrf.mxu1 }
 0x24c   : > { %v2097_v30 = vadd.f32 %v2096_v5, %v2048_v46  ;;  %v6138_v46 = vperm.slane %v4542_v16, 2 }
 0x24d   : > { %2245 = vmatmul.bf16.gmra.mxu2 %v6663_v3  ;;  %2343 = vmatmul.bf16.gmra.mxu0 %v6664_v48 }
 0x24e   : > { %v2146_v34 = vadd.f32 %v2145_v51, %v2097_v30  ;;  %2392 = vmatmul.bf16.gmra.mxu1 %v6647_v55 }
 0x250   : > { %2294 = vmatmul.bf16.gmra.mxu3 %v6665_v60  ;;  %v2195_v2 = vadd.f32 %v2194_v19, %v2146_v34  ;;  %v2050_v54 = vpop.f32.mrf.mxu2  ;;  %v4424_v60 = vld [vmem:[%s6540_s3 + $0x70] sm:$0xff] }
 0x251   : > { %v2051_v49 = vadd.f32 %v2050_v54, %v5927_v26 }
 0x252   : > { %v2584_v28 = vmax.f32 %v2195_v2, 0.0  ;;  %v2150_v12 = vpop.f32.mrf.mxu0 }
 0x253   : > { %v2099_v29 = vpop.f32.mrf.mxu3  ;;  %v2199_v31 = vpop.f32.mrf.mxu1 }
 0x254   : > { %v2100_v47 = vadd.f32 %v2099_v29, %v2051_v49  ;;  %v6115_v53 = vpack.c.bf16 %v2584_v28, %v2581_v45 }
 0x256   : > { %v2149_v44 = vadd.f32 %v2148_v9, %v2100_v47  ;;  %v6666_v47 = vld [vmem:[#allocation12_spill] sm:$0xff] }
 0x258   : > { %v2198_v25 = vadd.f32 %v2197_v52, %v2149_v44  ;;  %v2052_v42 = vpop.f32.mrf.mxu2 }
 0x259   : > { %v2053_v32 = vadd.f32 %v2052_v42, %v5944_v50 }
 0x25a   : > { %v2153_v63 = vpop.f32.mrf.mxu0  ;;  %v2587_v27 = vmax.f32 %v2198_v25, 0.0 }
 0x25b   : > { %v2101_v62 = vpop.f32.mrf.mxu3  ;;  %v2202_v61 = vpop.f32.mrf.mxu1 }
 0x25c   : > { %v2102_v55 = vadd.f32 %v2101_v62, %v2053_v32 }
 0x25d   : > { %2250 = vmatmul.bf16.gmra.mxu2 %v4993_v17  ;;  %2348 = vmatmul.bf16.gmra.mxu0 %v5345_v41  ;;  %v4425_v17 = vld [vmem:[%s6540_s3 + $0x78] sm:$0xff] }
 0x25e   : > { %v2151_v56 = vadd.f32 %v2150_v12, %v2102_v55  ;;  %2397 = vmatmul.bf16.gmra.mxu1 %v6651_v43  ;;  %2867 = vmatpush.bf16.msra.mxu2 %v4425_v17 }
 0x260   : > { %2299 = vmatmul.bf16.gmra.mxu3 %v4999_v20  ;;  %v2200_v26 = vadd.f32 %v2199_v31, %v2151_v56  ;;  %v2055_v57 = vpop.f32.mrf.mxu2  ;;  %v4433_v20 = vld [vmem:[%s6540_s3 + $0xb8] sm:$0xff] }
 0x261   : > { %v2056_v59 = vadd.f32 %v2055_v57, %v5960_v10  ;;  %2916 = vmatpush.bf16.msra.mxu3 %v4433_v20  ;;  %v6667_v31 = vld [vmem:[#allocation37_spill] sm:$0xff] }
 0x262   : > { %v2590_v50 = vmax.f32 %v2200_v26, 0.0  ;;  %v2155_v37 = vpop.f32.mrf.mxu0  ;;  %2868 = vmatpush.bf16.msra.mxu2 %v4424_v60  ;;  %v6675_v60 = vld [vmem:[#allocation19_spill] sm:$0xff] }
 0x263   : > { %v2104_v8 = vpop.f32.mrf.mxu3  ;;  %v2204_v33 = vpop.f32.mrf.mxu1 }
 0x264   : > { %v2105_v15 = vadd.f32 %v2104_v8, %v2056_v59  ;;  %v6123_v6 = vpack.c.bf16 %v2590_v50, %v2587_v27 }
 0x266   : > { %v2154_v51 = vadd.f32 %v2153_v63, %v2105_v15  ;;  %v6669_v15 = vld [vmem:[#allocation31_spill] sm:$0xff] }
 0x268   : > { %v2203_v41 = vadd.f32 %v2202_v61, %v2154_v51  ;;  %v2057_v43 = vpop.f32.mrf.mxu2  ;;  %v6671_v51 = vld [vmem:[#allocation16_spill] sm:$0xff] }
 0x269   : > { %v2058_v10 = vadd.f32 %v2057_v43, %v5970_v22 }
 0x26a   : > { %v2314_v19 = vpop.f32.mrf.mxu0  ;;  %v2593_v39 = vmax.f32 %v2203_v41, 0.0 }
 0x26b   : > { %v2106_v35 = vpop.f32.mrf.mxu3  ;;  %v2363_v4 = vpop.f32.mrf.mxu1 }
 0x26c   : > { %v2107_v21 = vadd.f32 %v2106_v35, %v2058_v10 }
 0x26d   : > { %2411 = vmatmul.bf16.vlgmr.msrb.gmra.mxu2 %v5027_v36  ;;  %4093 = vmatmul.msk.bf16.vlgmr.msrb.gmra.mxu0 %vm1496_vm0, %v5389_v40 }
 0x26e   : > { %v2156_v14 = vadd.f32 %v2155_v37, %v2107_v21  ;;  %2826 = vmatmul.bf16.vlgmr.msrb.gmra.mxu1 %v5691_v7  ;;  %v6668_v37 = vld [vmem:[#allocation13_spill] sm:$0xff] }
 0x270   : > { %2460 = vmatmul.bf16.vlgmr.msrb.gmra.mxu3 %v5031_v38  ;;  %v2205_v22 = vadd.f32 %v2204_v33, %v2156_v14  ;;  %v2216_v5 = vpop.f32.mrf.mxu2  ;;  %v4432_v38 = vld [vmem:[%s6540_s3 + $0xb0] sm:$0xff]  ;;  %v6670_v33 = vld [vmem:[#allocation14_spill] sm:$0xff] }
 0x271   : > { %v2217_v9 = vadd.f32 %v2216_v5, %v6138_v46  ;;  %2917 = vmatpush.bf16.msra.mxu3 %v4432_v38  ;;  %v4430_v14 = vld [vmem:[%s6540_s3 + $0xa0] sm:$0xff] }
 0x272   : > { %v2596_v36 = vmax.f32 %v2205_v22, 0.0  ;;  %v2316_v52 = vpop.f32.mrf.mxu0 }
 0x273   : > { %v2265_v30 = vpop.f32.mrf.mxu3  ;;  %v2365_v40 = vpop.f32.mrf.mxu1 }
 0x274   : > { %v2266_v34 = vadd.f32 %v2265_v30, %v2217_v9  ;;  %v6143_v3 = vpack.c.bf16 %v2596_v36, %v2593_v39 }
 0x276   : > { %v2315_v48 = vadd.f32 %v2314_v19, %v2266_v34  ;;  %v6672_v34 = vld [vmem:[#allocation15_spill] sm:$0xff] }
 0x278   : > { %v6151_v7 = vadd.f32 %v2363_v4, %v2315_v48  ;;  %v2218_v2 = vpop.f32.mrf.mxu2  ;;  %v4422_v4 = vld [vmem:[%s6540_s3 + $0x60] sm:$0xff]  ;;  %v6674_v48 = vld [vmem:[#allocation17_spill] sm:$0xff] }
 0x279   : > { %v2219_v54 = vadd.f32 %v2218_v2, %v6138_v46 }
 0x27a   : > { %v2319_v49 = vpop.f32.mrf.mxu0 }
 0x27b   : > { %v2267_v45 = vpop.f32.mrf.mxu3  ;;  %v2368_v28 = vpop.f32.mrf.mxu1 }
 0x27c   : > { %v2268_v29 = vadd.f32 %v2267_v45, %v2219_v54 }
 0x27d   : > { %2416 = vmatmul.bf16.gmra.mxu2 %v5059_v58  ;;  %4094 = vmatmul.msk.bf16.gmra.mxu0 %vm1496_vm0, %v5422_v13  ;;  %v4423_v58 = vld [vmem:[%s6540_s3 + $0x68] sm:$0xff] }
 0x27e   : > { %v2317_v12 = vadd.f32 %v2316_v52, %v2268_v29  ;;  %2831 = vmatmul.bf16.gmra.mxu1 %v6667_v31  ;;  %v4431_v13 = vld [vmem:[%s6540_s3 + $0xa8] sm:$0xff]  ;;  %2869 = vmatpush.bf16.msra.mxu2 %v4423_v58  ;;  %v4429_v31 = vld [vmem:[%s6540_s3 + $0x98] sm:$0xff] }
 0x27f   : > { %2918 = vmatpush.bf16.msra.mxu3 %v4431_v13  ;;  %v6676_v13 = vld [vmem:[#allocation18_spill] sm:$0xff] }
 0x280   : > { %2465 = vmatmul.bf16.gmra.mxu3 %v6666_v47  ;;  %v6159_v44 = vadd.f32 %v2365_v40, %v2317_v12  ;;  %v2221_v25 = vpop.f32.mrf.mxu2  ;;  %v6673_v40 = vld [vmem:[#allocation32_spill] sm:$0xff]  ;;  %v4421_v47 = vld [vmem:[%s6540_s3 + $0x58] sm:$0xff] }
 0x281   : > { %v2222_v42 = vadd.f32 %v2221_v25, %v6138_v46 }
 0x282   : > { %v2321_v62 = vpop.f32.mrf.mxu0  ;;  %2870 = vmatpush.bf16.msra.mxu2 %v4422_v4  ;;  %v6682_v4 = vld [vmem:[#allocation23_spill] sm:$0xff] }
 0x283   : > { %v2270_v32 = vpop.f32.mrf.mxu3  ;;  %v2370_v61 = vpop.f32.mrf.mxu1  ;;  %2919 = vmatpush.bf16.msra.mxu3 %v4430_v14  ;;  %v6683_v14 = vld [vmem:[#allocation26_spill] sm:$0xff] }
 0x284   : > { %v2271_v63 = vadd.f32 %v2270_v32, %v2222_v42 }
 0x286   : > { %v2320_v55 = vadd.f32 %v2319_v49, %v2271_v63  ;;  %2871 = vmatpush.bf16.msra.mxu2 %v4421_v47 }
 0x287   : > { %2920 = vmatpush.bf16.msra.mxu3 %v4429_v31 }
 0x288   : > { %v6168_v56 = vadd.f32 %v2368_v28, %v2320_v55  ;;  %v2223_v26 = vpop.f32.mrf.mxu2 }
 0x289   : > { %v2224_v57 = vadd.f32 %v2223_v26, %v6138_v46 }
 0x28a   : > { %v2324_v59 = vpop.f32.mrf.mxu0 }
 0x28b   : > { %v2272_v27 = vpop.f32.mrf.mxu3  ;;  %v2373_v20 = vpop.f32.mrf.mxu1 }
 0x28c   : > { %v2273_v8 = vadd.f32 %v2272_v27, %v2224_v57  ;;  %v6678_v57 = vld [vmem:[#allocation20_spill] sm:$0xff]  ;;  %v6679_v27 = vld [vmem:[#allocation22_spill] sm:$0xff] }
 0x28d   : > { %2421 = vmatmul.bf16.gmra.mxu2 %v6668_v37  ;;  %4095 = vmatmul.msk.bf16.gmra.mxu0 %vm1496_vm0, %v6669_v15 }
 0x28e   : > { %v2322_v50 = vadd.f32 %v2321_v62, %v2273_v8  ;;  %2836 = vmatmul.bf16.gmra.mxu1 %v6671_v51 }
 0x290   : > { %2470 = vmatmul.bf16.gmra.mxu3 %v6670_v33  ;;  %v6176_v17 = vadd.f32 %v2370_v61, %v2322_v50  ;;  %v2226_v41 = vpop.f32.mrf.mxu2  ;;  %v6677_v61 = vld [vmem:[#allocation33_spill] sm:$0xff] }
 0x291   : > { %v2227_v43 = vadd.f32 %v2226_v41, %v6138_v46  ;;  %v4428_v41 = vld [vmem:[%s6540_s3 + $0x90] sm:$0xff] }
 0x292   : > { %v2326_v35 = vpop.f32.mrf.mxu0  ;;  %2921 = vmatpush.bf16.msra.mxu3 %v4428_v41 }
 0x293   : > { %v2275_v10 = vpop.f32.mrf.mxu3  ;;  %v2375_v9 = vpop.f32.mrf.mxu1 }
 0x294   : > { %v2276_v19 = vadd.f32 %v2275_v10, %v2227_v43 }
 0x296   : > { %v2325_v21 = vadd.f32 %v2324_v59, %v2276_v19  ;;  %v6680_v19 = vld [vmem:[#allocation21_spill] sm:$0xff] }
 0x298   : > { %v6185_v16 = vadd.f32 %v2373_v20, %v2325_v21  ;;  %v2228_v22 = vpop.f32.mrf.mxu2  ;;  %v4420_v20 = vld [vmem:[%s6540_s3 + $0x50] sm:$0xff]  ;;  %v6681_v21 = vld [vmem:[#allocation34_spill] sm:$0xff] }
 0x299   : > { %v2229_v5 = vadd.f32 %v2228_v22, %v6138_v46  ;;  %2872 = vmatpush.bf16.msra.mxu2 %v4420_v20 }
 0x29a   : > { %v2329_v30 = vpop.f32.mrf.mxu0 }
 0x29b   : > { %v2277_v39 = vpop.f32.mrf.mxu3  ;;  %v2378_v28 = vpop.f32.mrf.mxu1 }
 0x29c   : > { %v2278_v36 = vadd.f32 %v2277_v39, %v2229_v5 }
 0x29d   : > { %2426 = vmatmul.bf16.gmra.mxu2 %v6672_v34  ;;  %4096 = vmatmul.msk.bf16.gmra.mxu0 %vm1496_vm0, %v6673_v40  ;;  %v4427_v34 = vld [vmem:[%s6540_s3 + $0x88] sm:$0xff] }
 0x29e   : > { %v2327_v52 = vadd.f32 %v2326_v35, %v2278_v36  ;;  %2841 = vmatmul.bf16.gmra.mxu1 %v6675_v60  ;;  %2922 = vmatpush.bf16.msra.mxu3 %v4427_v34  ;;  %v4418_v60 = vld [vmem:[%s6540_s3 + $0x40] sm:$0xff] }
 0x2a0   : > { %2475 = vmatmul.bf16.gmra.mxu3 %v6674_v48  ;;  %v6193_v38 = vadd.f32 %v2375_v9, %v2327_v52  ;;  %v2231_v2 = vpop.f32.mrf.mxu2  ;;  %v4419_v52 = vld [vmem:[%s6540_s3 + $0x48] sm:$0xff] }
 0x2a1   : > { %v2232_v54 = vadd.f32 %v2231_v2, %v6138_v46  ;;  %2873 = vmatpush.bf16.msra.mxu2 %v4419_v52 }
 0x2a2   : > { %v2331_v49 = vpop.f32.mrf.mxu0 }
 0x2a3   : > { %v2280_v45 = vpop.f32.mrf.mxu3  ;;  %v2380_v26 = vpop.f32.mrf.mxu1 }
 0x2a4   : > { %v2281_v29 = vadd.f32 %v2280_v45, %v2232_v54  ;;  %v6684_v54 = vld [vmem:[#allocation25_spill] sm:$0xff]  ;;  %v6685_v45 = vld [vmem:[#allocation35_spill] sm:$0xff] }
 0x2a5   : > { %2874 = vmatpush.bf16.msra.mxu2 %v4418_v60 }
 0x2a6   : > { %v2330_v12 = vadd.f32 %v2329_v30, %v2281_v29  ;;  %v6687_v29 = vld [vmem:[#allocation29_spill] sm:$0xff] }
 0x2a8   : > { %v6202_v25 = vadd.f32 %v2378_v28, %v2330_v12  ;;  %v2233_v42 = vpop.f32.mrf.mxu2 }
 0x2a9   : > { %v2234_v32 = vadd.f32 %v2233_v42, %v6138_v46 }
 0x2aa   : > { %v2334_v63 = vpop.f32.mrf.mxu0 }
 0x2ab   : > { %v2282_v62 = vpop.f32.mrf.mxu3 }
 0x2ac   : > { %v2283_v55 = vadd.f32 %v2282_v62, %v2234_v32  ;;  %v4426_v62 = vld [vmem:[%s6540_s3 + $0x80] sm:$0xff] }
 0x2ad   : > { %2431 = vmatmul.bf16.gmra.mxu2 %v6676_v13  ;;  %4097 = vmatmul.msk.bf16.gmra.mxu0 %vm1496_vm0, %v6677_v61  ;;  %v6688_v13 = vld [vmem:[#allocation28_spill] sm:$0xff] }
 0x2ae   : > { %v2332_v58 = vadd.f32 %v2331_v49, %v2283_v55  ;;  %2846 = vmatmul.bf16.gmra.mxu1 %v6679_v27  ;;  %v6686_v49 = vld [vmem:[#allocation27_spill] sm:$0xff]  ;;  %2923 = vmatpush.bf16.msra.mxu3 %v4426_v62  ;;  %v6689_v61 = vld [vmem:[#allocation36_spill] sm:$0xff] }
 0x2b0   : > { %2480 = vmatmul.bf16.gmra.mxu3 %v6678_v57  ;;  %v6210_v59 = vadd.f32 %v2380_v26, %v2332_v58  ;;  %v2236_v8 = vpop.f32.mrf.mxu2  ;;  %v6690_v26 = vld [vmem:[#allocation30_spill] sm:$0xff] }
 0x2b1   : > { %v2237_v50 = vadd.f32 %v2236_v8, %v6138_v46 }
 0x2b2   : > { %v6213_v15 = vpop.f32.mrf.mxu0 }
 0x2b3   : > { %v2285_v37 = vpop.f32.mrf.mxu3 }
 0x2b4   : > { %v2286_v33 = vadd.f32 %v2285_v37, %v2237_v50 }
 0x2b6   : > { %v6215_v51 = vadd.f32 %v2334_v63, %v2286_v33 }
 0x2b8   : > { %v6223_v43 = vpop.f32.mrf.mxu2 }
 0x2ba   : > { %v2339_v35 = vpop.f32.mrf.mxu0 }
 0x2bb   : > { %v6225_v10 = vpop.f32.mrf.mxu3 }
 0x2bd   : > { %2436 = vmatmul.bf16.gmra.mxu2 %v6680_v19  ;;  %4098 = vmatmul.msk.bf16.gmra.mxu0 %vm1496_vm0, %v6681_v21 }
 0x2be   : > { %2851 = vmatmul.bf16.gmra.mxu1 %v6683_v14 }
 0x2c0   : > { %2485 = vmatmul.bf16.gmra.mxu3 %v6682_v4  ;;  %v2241_v22 = vpop.f32.mrf.mxu2 }
 0x2c1   : > { %v2242_v5 = vadd.f32 %v2241_v22, %v6138_v46  ;;  %v4441_v22 = vld [vmem:[%s6542_s5 + $0x38] sm:$0xff] }
 0x2c2   : > { %v6233_v9 = vpop.f32.mrf.mxu0  ;;  %3057 = vmatpush.bf16.msra.mxu0 %v4441_v22 }
 0x2c3   : > { %v2290_v39 = vpop.f32.mrf.mxu3 }
 0x2c4   : > { %v2291_v30 = vadd.f32 %v2290_v39, %v2242_v5 }
 0x2c6   : > { %v6235_v36 = vadd.f32 %v2339_v35, %v2291_v30 }
 0x2c8   : > { %v6243_v40 = vpop.f32.mrf.mxu2 }
 0x2ca   : > { %v2344_v2 = vpop.f32.mrf.mxu0 }
 0x2cb   : > { %v6245_v48 = vpop.f32.mrf.mxu3 }
 0x2cd   : > { %2441 = vmatmul.bf16.gmra.mxu2 %v6684_v54  ;;  %4099 = vmatmul.msk.bf16.gmra.mxu0 %vm1496_vm0, %v6685_v45 }
 0x2ce   : > { %2856 = vmatmul.bf16.gmra.mxu1 %v6687_v29 }
 0x2d0   : > { %2490 = vmatmul.bf16.gmra.mxu3 %v6686_v49  ;;  %v2246_v28 = vpop.f32.mrf.mxu2 }
 0x2d1   : > { %v2247_v12 = vadd.f32 %v2246_v28, %v6138_v46 }
 0x2d2   : > { %v6256_v31 = vpop.f32.mrf.mxu0 }
 0x2d3   : > { %v2295_v47 = vpop.f32.mrf.mxu3 }
 0x2d4   : > { %v2296_v42 = vadd.f32 %v2295_v47, %v2247_v12 }
 0x2d6   : > { %v6258_v32 = vadd.f32 %v2344_v2, %v2296_v42 }
 0x2d8   : > { %v6263_v63 = vpop.f32.mrf.mxu2 }
 0x2da   : > { %v2349_v58 = vpop.f32.mrf.mxu0 }
 0x2db   : > { %v6265_v55 = vpop.f32.mrf.mxu3 }
 0x2dd   : > { %2446 = vmatmul.bf16.gmra.mxu2 %v6688_v13  ;;  %4100 = vmatmul.msk.bf16.gmra.mxu0 %vm1496_vm0, %v6689_v61 }
 0x2de   : > { %2861 = vmatmul.bf16.gmra.mxu1 %v5966_v11 }
 0x2e0   : > { %2495 = vmatmul.bf16.gmra.mxu3 %v6690_v26  ;;  %v2251_v57 = vpop.f32.mrf.mxu2 }
 0x2e1   : > { %v2252_v27 = vadd.f32 %v2251_v57, %v6138_v46 }
 0x2e2   : > { %v6273_v50 = vpop.f32.mrf.mxu0 }
 0x2e3   : > { %v2300_v8 = vpop.f32.mrf.mxu3 }
 0x2e4   : > { %v2301_v37 = vadd.f32 %v2300_v8, %v2252_v27  ;;  %v2383_v27 = vpop.f32.mrf.mxu1 }
 0x2e6   : > { %v6275_v33 = vadd.f32 %v2349_v58, %v2301_v37 }
 0x2e8   : > { %v6277_v20 = vpop.f32.mrf.mxu2 }
 0x2ea   : > { %v2510_v35 = vpop.f32.mrf.mxu0 }
 0x2eb   : > { %v6279_v41 = vpop.f32.mrf.mxu3 }
 0x2ec   : > { %v2385_v22 = vpop.f32.mrf.mxu1 }
 0x2ed   : > { %2875 = vmatmul.bf16.vlgmr.msra.gmra.mxu2 %v6003_v24 }
 0x2f0   : > { %v2412_v19 = vpop.f32.mrf.mxu2 }
 0x2f1   : > { %v2413_v11 = vadd.f32 %v2412_v19, %v6151_v7 }
 0x2f2   : > { %v2512_v4 = vpop.f32.mrf.mxu0 }
 0x2f3   : > { %v2461_v21 = vpop.f32.mrf.mxu3 }
 0x2f4   : > { %v2462_v14 = vadd.f32 %v2461_v21, %v2413_v11 }
 0x2f6   : > { %v2511_v34 = vadd.f32 %v2510_v35, %v2462_v14 }
 0x2f8   : > { %v2414_v5 = vpop.f32.mrf.mxu2  ;;  %v2552_v24 = vmax.f32 %v2511_v34, 0.0 }
 0x2f9   : > { %v2415_v39 = vadd.f32 %v2414_v5, %v6159_v44  ;;  %v4440_v44 = vld [vmem:[%s6542_s5 + $0x30] sm:$0xff] }
 0x2fa   : > { %v2515_v52 = vpop.f32.mrf.mxu0  ;;  %3058 = vmatpush.bf16.msra.mxu0 %v4440_v44 }
 0x2fb   : > { %v2463_v30 = vpop.f32.mrf.mxu3 }
 0x2fc   : > { %v2464_v60 = vadd.f32 %v2463_v30, %v2415_v39 }
 0x2fd   : > { %2880 = vmatmul.bf16.gmra.mxu2 %v6023_v0 }
 0x2fe   : > { %v2513_v2 = vadd.f32 %v2512_v4, %v2464_v60 }
 0x300   : > { %v2555_v54 = vmax.f32 %v2513_v2, 0.0  ;;  %v2417_v45 = vpop.f32.mrf.mxu2 }
 0x301   : > { %v2418_v28 = vadd.f32 %v2417_v45, %v6168_v56  ;;  %v2388_v45 = vpop.f32.mrf.mxu1 }
 0x302   : > { %v2600_v7 = vpack.c.bf16 %v2555_v54, %v2552_v24  ;;  %v2517_v29 = vpop.f32.mrf.mxu0 }
 0x303   : > { %v2466_v49 = vpop.f32.mrf.mxu3 }
 0x304   : > { %2924 = vmatmul.bf16.vlgmr.msra.gmra.mxu3 %v2600_v7  ;;  %v2467_v12 = vadd.f32 %v2466_v49, %v2418_v28  ;;  %v4438_v7 = vld [vmem:[%s6542_s5 + $0x20] sm:$0xff] }
 0x306   : > { %v2516_v58 = vadd.f32 %v2515_v52, %v2467_v12  ;;  %v2239_v12 = vadd.f32 %v6223_v43, %v6138_v46 }
 0x308   : > { %v2419_v47 = vpop.f32.mrf.mxu2  ;;  %v2558_v26 = vmax.f32 %v2516_v58, 0.0 }
 0x309   : > { %v2420_v42 = vadd.f32 %v2419_v47, %v6176_v17  ;;  %v4439_v17 = vld [vmem:[%s6542_s5 + $0x28] sm:$0xff] }
 0x30a   : > { %v2520_v0 = vpop.f32.mrf.mxu0  ;;  %3059 = vmatpush.bf16.msra.mxu0 %v4439_v17 }
 0x30b   : > { %v2468_v62 = vpop.f32.mrf.mxu3 }
 0x30c   : > { %v2469_v13 = vadd.f32 %v2468_v62, %v2420_v42  ;;  %v2390_v62 = vpop.f32.mrf.mxu1 }
 0x30d   : > { %2885 = vmatmul.bf16.gmra.mxu2 %v6043_v23 }
 0x30e   : > { %v2518_v61 = vadd.f32 %v2517_v29, %v2469_v13  ;;  %3060 = vmatpush.bf16.msra.mxu0 %v4438_v7 }
 0x310   : > { %v2561_v57 = vmax.f32 %v2518_v61, 0.0  ;;  %v2422_v56 = vpop.f32.mrf.mxu2  ;;  %v2384_v61 = vadd.f32 %v2383_v27, %v6215_v51  ;;  %v2244_v51 = vadd.f32 %v6243_v40, %v6138_v46 }
 0x311   : > { %v2423_v19 = vadd.f32 %v2422_v56, %v6185_v16 }
 0x312   : > { %v2603_v37 = vpack.c.bf16 %v2561_v57, %v2558_v26  ;;  %v2522_v35 = vpop.f32.mrf.mxu0 }
 0x313   : > { %v2471_v8 = vpop.f32.mrf.mxu3 }
 0x314   : > { %2929 = vmatmul.bf16.gmra.mxu3 %v2603_v37  ;;  %v2472_v21 = vadd.f32 %v2471_v8, %v2423_v19 }
 0x316   : > { %v2521_v5 = vadd.f32 %v2520_v0, %v2472_v21 }
 0x318   : > { %v2424_v4 = vpop.f32.mrf.mxu2  ;;  %v2564_v52 = vmax.f32 %v2521_v5, 0.0  ;;  %v2389_v5 = vadd.f32 %v2388_v45, %v6235_v36  ;;  %v2249_v36 = vadd.f32 %v6263_v63, %v6138_v46  ;;  %v4435_v63 = vld [vmem:[%s6542_s5 + $0x8] sm:$0xff] }
 0x319   : > { %v2425_v11 = vadd.f32 %v2424_v4, %v6193_v38 }
 0x31a   : > { %v2525_v23 = vpop.f32.mrf.mxu0 }
 0x31b   : > { %v2473_v14 = vpop.f32.mrf.mxu3 }
 0x31c   : > { %v2474_v39 = vadd.f32 %v2473_v14, %v2425_v11  ;;  %v2293_v11 = vadd.f32 %v6245_v48, %v2244_v51 }
 0x31d   : > { %2890 = vmatmul.bf16.gmra.mxu2 %v6069_v18 }
 0x31e   : > { %v2523_v30 = vadd.f32 %v2522_v35, %v2474_v39  ;;  %v2393_v35 = vpop.f32.mrf.mxu1 }
 0x320   : > { %v2567_v16 = vmax.f32 %v2523_v30, 0.0  ;;  %v2427_v34 = vpop.f32.mrf.mxu2 }
 0x321   : > { %v2428_v54 = vadd.f32 %v2427_v34, %v6202_v25  ;;  %v2288_v25 = vadd.f32 %v6225_v10, %v2239_v12 }
 0x322   : > { %v2606_v2 = vpack.c.bf16 %v2567_v16, %v2564_v52  ;;  %v2527_v24 = vpop.f32.mrf.mxu0  ;;  %v2342_v52 = vadd.f32 %v6233_v9, %v2293_v11 }
 0x323   : > { %v2476_v60 = vpop.f32.mrf.mxu3  ;;  %v2337_v56 = vadd.f32 %v6213_v15, %v2288_v25 }
 0x324   : > { %2934 = vmatmul.bf16.gmra.mxu3 %v2606_v2  ;;  %v2477_v38 = vadd.f32 %v2476_v60, %v2428_v54  ;;  %v2391_v2 = vadd.f32 %v2390_v62, %v2342_v52 }
 0x325   : > { %v2386_v37 = vadd.f32 %v2385_v22, %v2337_v56 }
 0x326   : > { %v2526_v44 = vadd.f32 %v2525_v23, %v2477_v38  ;;  %v2395_v16 = vpop.f32.mrf.mxu1 }
 0x328   : > { %v2429_v49 = vpop.f32.mrf.mxu2  ;;  %v2570_v0 = vmax.f32 %v2526_v44, 0.0  ;;  %v2394_v44 = vadd.f32 %v2393_v35, %v6258_v32  ;;  %v2254_v32 = vadd.f32 %v6277_v20, %v6138_v46 }
 0x329   : > { %v2430_v29 = vadd.f32 %v2429_v49, %v6210_v59 }
 0x32a   : > { %v2530_v18 = vpop.f32.mrf.mxu0  ;;  %v2303_v56 = vadd.f32 %v6279_v41, %v2254_v32 }
 0x32b   : > { %v2478_v28 = vpop.f32.mrf.mxu3 }
 0x32c   : > { %v2479_v47 = vadd.f32 %v2478_v28, %v2430_v29  ;;  %v2298_v29 = vadd.f32 %v6265_v55, %v2249_v36  ;;  %v2352_v20 = vadd.f32 %v6273_v50, %v2303_v56 }
 0x32d   : > { %2895 = vmatmul.bf16.gmra.mxu2 %v6101_v1  ;;  %v4437_v1 = vld [vmem:[%s6542_s5 + $0x18] sm:$0xff] }
 0x32e   : > { %v2528_v42 = vadd.f32 %v2527_v24, %v2479_v47  ;;  %3061 = vmatpush.bf16.msra.mxu0 %v4437_v1  ;;  %v2398_v9 = vpop.f32.mrf.mxu1  ;;  %v2347_v25 = vadd.f32 %v6256_v31, %v2298_v29 }
 0x32f   : > { %v2399_v1 = vadd.f32 %v2398_v9, %v6275_v33 }
 0x330   : > { %v2573_v58 = vmax.f32 %v2528_v42, 0.0  ;;  %v2432_v13 = vpop.f32.mrf.mxu2 }
 0x331   : > { %v2433_v8 = vadd.f32 %v2432_v13, %v2384_v61 }
 0x332   : > { %v2609_v26 = vpack.c.bf16 %v2573_v58, %v2570_v0  ;;  %v2532_v57 = vpop.f32.mrf.mxu0  ;;  %v2396_v58 = vadd.f32 %v2395_v16, %v2347_v25 }
 0x333   : > { %v2481_v59 = vpop.f32.mrf.mxu3 }
 0x334   : > { %2939 = vmatmul.bf16.gmra.mxu3 %v2609_v26  ;;  %v2482_v43 = vadd.f32 %v2481_v59, %v2433_v8 }
 0x336   : > { %v2531_v27 = vadd.f32 %v2530_v18, %v2482_v43 }
 0x338   : > { %v2434_v10 = vpop.f32.mrf.mxu2  ;;  %v2576_v14 = vmax.f32 %v2531_v27, 0.0 }
 0x339   : > { %v2435_v19 = vadd.f32 %v2434_v10, %v2386_v37 }
 0x33a   : > { %v2535_v17 = vpop.f32.mrf.mxu0 }
 0x33b   : > { %v2483_v21 = vpop.f32.mrf.mxu3 }
 0x33c   : > { %v2484_v4 = vadd.f32 %v2483_v21, %v2435_v19  ;;  %v4434_v19 = vld [vmem:[%s6542_s5] sm:$0xff] }
 0x33d   : > { %2900 = vmatmul.bf16.gmra.mxu2 %v6115_v53  ;;  %v4436_v53 = vld [vmem:[%s6542_s5 + $0x10] sm:$0xff] }
 0x33e   : > { %v2533_v15 = vadd.f32 %v2532_v57, %v2484_v4  ;;  %3062 = vmatpush.bf16.msra.mxu0 %v4436_v53 }
 0x340   : > { %v2579_v23 = vmax.f32 %v2533_v15, 0.0  ;;  %v2437_v22 = vpop.f32.mrf.mxu2 }
 0x341   : > { %v2438_v34 = vadd.f32 %v2437_v22, %v2389_v5 }
 0x342   : > { %v2612_v30 = vpack.c.bf16 %v2579_v23, %v2576_v14  ;;  %v2537_v40 = vpop.f32.mrf.mxu0  ;;  %3063 = vmatpush.bf16.msra.mxu0 %v4435_v63 }
 0x343   : > { %v2486_v39 = vpop.f32.mrf.mxu3 }
 0x344   : > { %2944 = vmatmul.bf16.gmra.mxu3 %v2612_v30  ;;  %v2487_v60 = vadd.f32 %v2486_v39, %v2438_v34 }
 0x346   : > { %v2536_v45 = vadd.f32 %v2535_v17, %v2487_v60  ;;  %3064 = vmatpush.bf16.msra.mxu0 %v4434_v19  ;;  %v6347_v60 = vld [vmem:[%s6541_s4] ss:$0 sm:$0xff] }
 0x348   : > { %v2439_v48 = vpop.f32.mrf.mxu2  ;;  %v2582_v28 = vmax.f32 %v2536_v45, 0.0 }
 0x349   : > { %v2440_v24 = vadd.f32 %v2439_v48, %v2391_v2 }
 0x34a   : > { %v2540_v49 = vpop.f32.mrf.mxu0 }
 0x34b   : > { %v2488_v54 = vpop.f32.mrf.mxu3 }
 0x34c   : > { %v2489_v38 = vadd.f32 %v2488_v54, %v2440_v24 }
 0x34d   : > { %2905 = vmatmul.bf16.gmra.mxu2 %v6123_v6  ;;  %v2400_v6 = vpop.f32.mrf.mxu1 }
 0x34e   : > { %v2538_v7 = vadd.f32 %v2537_v40, %v2489_v38  ;;  %v2401_v41 = vadd.f32 %v2400_v6, %v2352_v20  ;;  %v4449_v40 = vld [vmem:[%s6544_s7 + $0x38] sm:$0xff] }
 0x34f   : > { %3198 = vmatpush.bf16.msra.mxu1 %v4449_v40 }
 0x350   : > { %v2585_v18 = vmax.f32 %v2538_v7, 0.0  ;;  %v2442_v12 = vpop.f32.mrf.mxu2 }
 0x351   : > { %v2443_v62 = vadd.f32 %v2442_v12, %v2394_v44  ;;  %v4448_v12 = vld [vmem:[%s6544_s7 + $0x30] sm:$0xff] }
 0x352   : > { %v2615_v42 = vpack.c.bf16 %v2585_v18, %v2582_v28  ;;  %v2542_v55 = vpop.f32.mrf.mxu0 }
 0x353   : > { %v2491_v47 = vpop.f32.mrf.mxu3  ;;  %3199 = vmatpush.bf16.msra.mxu1 %v4448_v12 }
 0x354   : > { %2949 = vmatmul.bf16.gmra.mxu3 %v2615_v42  ;;  %v2492_v0 = vadd.f32 %v2491_v47, %v2443_v62 }
 0x355   : > { %v2827_v21 = vpop.f32.mrf.mxu1 }
 0x356   : > { %v2541_v26 = vadd.f32 %v2540_v49, %v2492_v0  ;;  %v2828_v48 = vadd.f32 %v6347_v60, %v2827_v21 }
 0x358   : > { %v2444_v13 = vpop.f32.mrf.mxu2  ;;  %v2588_v8 = vmax.f32 %v2541_v26, 0.0 }
 0x359   : > { %v2445_v61 = vadd.f32 %v2444_v13, %v2396_v58 }
 0x35a   : > { %v2545_v46 = vpop.f32.mrf.mxu0 }
 0x35b   : > { %v2493_v59 = vpop.f32.mrf.mxu3 }
 0x35c   : > { %v2494_v57 = vadd.f32 %v2493_v59, %v2445_v61 }
 0x35d   : > { %2910 = vmatmul.bf16.gmra.mxu2 %v6143_v3  ;;  %v2829_v11 = vpop.f32.mrf.mxu1 }
 0x35e   : > { %v2543_v31 = vadd.f32 %v2542_v55, %v2494_v57  ;;  %v2830_v54 = vadd.f32 %v6347_v60, %v2829_v11  ;;  %v4447_v57 = vld [vmem:[%s6544_s7 + $0x28] sm:$0xff] }
 0x35f   : > { %3200 = vmatpush.bf16.msra.mxu1 %v4447_v57 }
 0x360   : > { %v2591_v43 = vmax.f32 %v2543_v31, 0.0  ;;  %v2447_v37 = vpop.f32.mrf.mxu2 }
 0x361   : > { %v2448_v17 = vadd.f32 %v2447_v37, %v2399_v1 }
 0x362   : > { %v2618_v35 = vpack.c.bf16 %v2591_v43, %v2588_v8  ;;  %v2547_v14 = vpop.f32.mrf.mxu0 }
 0x363   : > { %v2496_v10 = vpop.f32.mrf.mxu3 }
 0x364   : > { %2954 = vmatmul.bf16.gmra.mxu3 %v2618_v35  ;;  %v2497_v3 = vadd.f32 %v2496_v10, %v2448_v17 }
 0x365   : > { %v2832_v52 = vpop.f32.mrf.mxu1 }
 0x366   : > { %v2546_v15 = vadd.f32 %v2545_v46, %v2497_v3  ;;  %v2833_v25 = vadd.f32 %v6347_v60, %v2832_v52 }
 0x368   : > { %v2449_v51 = vpop.f32.mrf.mxu2  ;;  %v2594_v22 = vmax.f32 %v2546_v15, 0.0 }
 0x369   : > { %v2450_v27 = vadd.f32 %v2449_v51, %v2401_v41  ;;  %v4446_v41 = vld [vmem:[%s6544_s7 + $0x20] sm:$0xff] }
 0x36a   : > { %3201 = vmatpush.bf16.msra.mxu1 %v4446_v41 }
 0x36b   : > { %v2498_v4 = vpop.f32.mrf.mxu3 }
 0x36c   : > { %v2499_v33 = vadd.f32 %v2498_v4, %v2450_v27 }
 0x36d   : > { %v2834_v16 = vpop.f32.mrf.mxu1 }
 0x36e   : > { %v2548_v23 = vadd.f32 %v2547_v14, %v2499_v33  ;;  %v2835_v62 = vadd.f32 %v6347_v60, %v2834_v16  ;;  %v4445_v16 = vld [vmem:[%s6544_s7 + $0x18] sm:$0xff] }
 0x36f   : > { %3202 = vmatpush.bf16.msra.mxu1 %v4445_v16 }
 0x370   : > { %v2597_v5 = vmax.f32 %v2548_v23, 0.0  ;;  %v2876_v39 = vpop.f32.mrf.mxu2 }
 0x371   : > { %v2877_v36 = vadd.f32 %v2876_v39, %v2828_v48 }
 0x372   : > { %v2621_v30 = vpack.c.bf16 %v2597_v5, %v2594_v22 }
 0x374   : > { %2959 = vmatmul.bf16.gmra.mxu3 %v2621_v30 }
 0x375   : > { %v2837_v24 = vpop.f32.mrf.mxu1 }
 0x376   : > { %v2838_v8 = vadd.f32 %v6347_v60, %v2837_v24 }
 0x378   : > { %v2878_v50 = vpop.f32.mrf.mxu2 }
 0x379   : > { %v2879_v45 = vadd.f32 %v2878_v50, %v2830_v54 }
 0x37d   : > { %v2839_v44 = vpop.f32.mrf.mxu1 }
 0x37e   : > { %v2840_v37 = vadd.f32 %v6347_v60, %v2839_v44 }
 0x380   : > { %v2881_v34 = vpop.f32.mrf.mxu2 }
 0x381   : > { %v2882_v63 = vadd.f32 %v2881_v34, %v2833_v25 }
 0x385   : > { %v2842_v58 = vpop.f32.mrf.mxu1 }
 0x386   : > { %v2843_v4 = vadd.f32 %v6347_v60, %v2842_v58 }
 0x387   : > { %v2925_v2 = vpop.f32.mrf.mxu3 }
 0x388   : > { %v2883_v53 = vpop.f32.mrf.mxu2  ;;  %v2926_v38 = vadd.f32 %v2925_v2, %v2877_v36 }
 0x389   : > { %v2884_v6 = vadd.f32 %v2883_v53, %v2835_v62 }
 0x38a   : > { %v2965_v29 = vmax.f32 %v2926_v38, 0.0 }
 0x38d   : > { %v2844_v56 = vpop.f32.mrf.mxu1 }
 0x38e   : > { %v2845_v15 = vadd.f32 %v6347_v60, %v2844_v56 }
 0x38f   : > { %v2927_v9 = vpop.f32.mrf.mxu3 }
 0x390   : > { %v2928_v7 = vadd.f32 %v2927_v9, %v2879_v45  ;;  %v2886_v49 = vpop.f32.mrf.mxu2 }
 0x391   : > { %v2887_v1 = vadd.f32 %v2886_v49, %v2838_v8 }
 0x392   : > { %v2966_v28 = vmax.f32 %v2928_v7, 0.0 }
 0x394   : > { %v2981_v18 = vpack.c.bf16 %v2966_v28, %v2965_v29 }
 0x395   : > { %v2847_v17 = vpop.f32.mrf.mxu1 }
 0x396   : > { %3065 = vmatmul.bf16.vlgmr.msra.gmra.mxu0 %v2981_v18  ;;  %v2848_v53 = vadd.f32 %v6347_v60, %v2847_v17  ;;  %v4444_v18 = vld [vmem:[%s6544_s7 + $0x10] sm:$0xff] }
 0x397   : > { %v2930_v47 = vpop.f32.mrf.mxu3  ;;  %3203 = vmatpush.bf16.msra.mxu1 %v4444_v18 }
 0x398   : > { %v2888_v42 = vpop.f32.mrf.mxu2  ;;  %v2931_v0 = vadd.f32 %v2930_v47, %v2882_v63 }
 0x399   : > { %v2889_v10 = vadd.f32 %v2888_v42, %v2840_v37 }
 0x39a   : > { %v2967_v59 = vmax.f32 %v2931_v0, 0.0 }
 0x39d   : > { %v2849_v11 = vpop.f32.mrf.mxu1 }
 0x39e   : > { %v2850_v48 = vadd.f32 %v6347_v60, %v2849_v11 }
 0x39f   : > { %v2932_v55 = vpop.f32.mrf.mxu3 }
 0x3a0   : > { %v2933_v13 = vadd.f32 %v2932_v55, %v2884_v6  ;;  %v2891_v61 = vpop.f32.mrf.mxu2 }
 0x3a1   : > { %v2892_v33 = vadd.f32 %v2891_v61, %v2843_v4 }
 0x3a2   : > { %v2968_v32 = vmax.f32 %v2933_v13, 0.0 }
 0x3a4   : > { %v2982_v26 = vpack.c.bf16 %v2968_v32, %v2967_v59  ;;  %v4443_v59 = vld [vmem:[%s6544_s7 + $0x8] sm:$0xff] }
 0x3a5   : > { %v2852_v34 = vpop.f32.mrf.mxu1  ;;  %3204 = vmatpush.bf16.msra.mxu1 %v4443_v59 }
 0x3a6   : > { %3070 = vmatmul.bf16.gmra.mxu0 %v2982_v26  ;;  %v2853_v44 = vadd.f32 %v6347_v60, %v2852_v34  ;;  %v4442_v26 = vld [vmem:[%s6544_s7] sm:$0xff] }
 0x3a7   : > { %v2935_v31 = vpop.f32.mrf.mxu3 }
 0x3a8   : > { %v2893_v43 = vpop.f32.mrf.mxu2  ;;  %v2936_v35 = vadd.f32 %v2935_v31, %v2887_v1 }
 0x3a9   : > { %v2894_v14 = vadd.f32 %v2893_v43, %v2845_v15  ;;  %3205 = vmatpush.bf16.msra.mxu1 %v4442_v26 }
 0x3aa   : > { %v2969_v46 = vmax.f32 %v2936_v35, 0.0 }
 0x3ad   : > { %v2854_v9 = vpop.f32.mrf.mxu1 }
 0x3ae   : > { %v2855_v42 = vadd.f32 %v6347_v60, %v2854_v9 }
 0x3af   : > { %v2937_v19 = vpop.f32.mrf.mxu3 }
 0x3b0   : > { %v2938_v21 = vadd.f32 %v2937_v19, %v2889_v10  ;;  %v2896_v51 = vpop.f32.mrf.mxu2 }
 0x3b1   : > { %v2897_v24 = vadd.f32 %v2896_v51, %v2848_v53 }
 0x3b2   : > { %v2970_v20 = vmax.f32 %v2938_v21, 0.0 }
 0x3b4   : > { %v2983_v3 = vpack.c.bf16 %v2970_v20, %v2969_v46 }
 0x3b5   : > { %v2857_v47 = vpop.f32.mrf.mxu1 }
 0x3b6   : > { %3075 = vmatmul.bf16.gmra.mxu0 %v2983_v3  ;;  %v2858_v56 = vadd.f32 %v6347_v60, %v2857_v47 }
 0x3b7   : > { %v2940_v27 = vpop.f32.mrf.mxu3 }
 0x3b8   : > { %v2941_v23 = vadd.f32 %v2940_v27, %v2892_v33  ;;  %v2898_v22 = vpop.f32.mrf.mxu2 }
 0x3b9   : > { %v2899_v54 = vadd.f32 %v2898_v22, %v2850_v48 }
 0x3ba   : > { %v2971_v30 = vmax.f32 %v2941_v23, 0.0 }
 0x3bd   : > { %v2859_v32 = vpop.f32.mrf.mxu1 }
 0x3be   : > { %v2860_v8 = vadd.f32 %v6347_v60, %v2859_v32 }
 0x3bf   : > { %v2942_v5 = vpop.f32.mrf.mxu3 }
 0x3c0   : > { %v2943_v39 = vadd.f32 %v2942_v5, %v2894_v14  ;;  %v2901_v2 = vpop.f32.mrf.mxu2 }
 0x3c1   : > { %v2902_v25 = vadd.f32 %v2901_v2, %v2853_v44 }
 0x3c2   : > { %v2972_v52 = vmax.f32 %v2943_v39, 0.0 }
 0x3c4   : > { %v2984_v50 = vpack.c.bf16 %v2972_v52, %v2971_v30  ;;  %v4476_v52 = vld [vmem:[%s6543_s6] ss:$0 sm:$0xff] }
 0x3c5   : > { %v2862_v10 = vpop.f32.mrf.mxu1 }
 0x3c6   : > { %3080 = vmatmul.bf16.gmra.mxu0 %v2984_v50  ;;  %v2863_v51 = vadd.f32 %v6347_v60, %v2862_v10 }
 0x3c7   : > { %v2945_v40 = vpop.f32.mrf.mxu3 }
 0x3c8   : > { %v2946_v36 = vadd.f32 %v2945_v40, %v2897_v24  ;;  %v2903_v29 = vpop.f32.mrf.mxu2 }
 0x3c9   : > { %v2904_v63 = vadd.f32 %v2903_v29, %v2855_v42 }
 0x3ca   : > { %v2973_v7 = vmax.f32 %v2946_v36, 0.0 }
 0x3cd   : > { %v2864_v41 = vpop.f32.mrf.mxu1 }
 0x3ce   : > { %v2865_v4 = vadd.f32 %v6347_v60, %v2864_v41 }
 0x3cf   : > { %v2947_v45 = vpop.f32.mrf.mxu3 }
 0x3d0   : > { %v2948_v38 = vadd.f32 %v2947_v45, %v2899_v54  ;;  %v2906_v62 = vpop.f32.mrf.mxu2 }
 0x3d1   : > { %v2907_v43 = vadd.f32 %v2906_v62, %v2858_v56 }
 0x3d2   : > { %v2974_v49 = vmax.f32 %v2948_v38, 0.0 }
 0x3d4   : > { %v2985_v28 = vpack.c.bf16 %v2974_v49, %v2973_v7 }
 0x3d6   : > { %3085 = vmatmul.bf16.gmra.mxu0 %v2985_v28 }
 0x3d7   : > { %v2950_v12 = vpop.f32.mrf.mxu3 }
 0x3d8   : > { %v2951_v6 = vadd.f32 %v2950_v12, %v2902_v25  ;;  %v2908_v57 = vpop.f32.mrf.mxu2 }
 0x3d9   : > { %v2909_v37 = vadd.f32 %v2908_v57, %v2860_v8 }
 0x3da   : > { %v2975_v55 = vmax.f32 %v2951_v6, 0.0 }
 0x3df   : > { %v2952_v0 = vpop.f32.mrf.mxu3 }
 0x3e0   : > { %v2953_v58 = vadd.f32 %v2952_v0, %v2904_v63  ;;  %v2911_v21 = vpop.f32.mrf.mxu2 }
 0x3e1   : > { %v2912_v15 = vadd.f32 %v2911_v21, %v2863_v51 }
 0x3e2   : > { %v2976_v13 = vmax.f32 %v2953_v58, 0.0 }
 0x3e4   : > { %v2986_v61 = vpack.c.bf16 %v2976_v13, %v2975_v55 }
 0x3e6   : > { %3090 = vmatmul.bf16.gmra.mxu0 %v2986_v61 }
 0x3e7   : > { %v2955_v31 = vpop.f32.mrf.mxu3 }
 0x3e8   : > { %v2956_v1 = vadd.f32 %v2955_v31, %v2907_v43  ;;  %v2913_v27 = vpop.f32.mrf.mxu2 }
 0x3e9   : > { %v2914_v33 = vadd.f32 %v2913_v27, %v2865_v4 }
 0x3ea   : > { %v2977_v46 = vmax.f32 %v2956_v1, 0.0 }
 0x3ef   : > { %v2957_v35 = vpop.f32.mrf.mxu3 }
 0x3f0   : > { %v2958_v19 = vadd.f32 %v2957_v35, %v2909_v37 }
 0x3f2   : > { %v2978_v20 = vmax.f32 %v2958_v19, 0.0 }
 0x3f4   : > { %v2987_v17 = vpack.c.bf16 %v2978_v20, %v2977_v46 }
 0x3f6   : > { %3095 = vmatmul.bf16.gmra.mxu0 %v2987_v17 }
 0x3f7   : > { %v2960_v3 = vpop.f32.mrf.mxu3 }
 0x3f8   : > { %v2961_v11 = vadd.f32 %v2960_v3, %v2912_v15 }
 0x3fa   : > { %v2979_v22 = vmax.f32 %v2961_v11, 0.0 }
 0x3ff   : > { %v2962_v14 = vpop.f32.mrf.mxu3 }
 0x400   : > { %v2963_v23 = vadd.f32 %v2962_v14, %v2914_v33  ;;  %v4477_v33 = vld [vmem:[%s6545_s8] ss:$0 sm:$0xff] }
 0x402   : > { %v2980_v5 = vmax.f32 %v2963_v23, 0.0 }
 0x404   : > { %v2988_v39 = vpack.c.bf16 %v2980_v5, %v2979_v22 }
 0x406   : > { %3100 = vmatmul.bf16.gmra.mxu0 %v2988_v39 }
 0x413   : > { %v3066_v30 = vpop.f32.mrf.mxu0 }
 0x414   : > { %v3067_v50 = vadd.f32 %v4476_v52, %v3066_v30 }
 0x416   : > { %v3106_v40 = vmax.f32 %v3067_v50, 0.0 }
 0x41b   : > { %v3068_v16 = vpop.f32.mrf.mxu0 }
 0x41c   : > { %v3069_v34 = vadd.f32 %v4476_v52, %v3068_v16 }
 0x41e   : > { %v3107_v2 = vmax.f32 %v3069_v34, 0.0 }
 0x420   : > { %v3122_v60 = vpack.c.bf16 %v3107_v2, %v3106_v40 }
 0x422   : > { %3206 = vmatmul.bf16.vlgmr.msra.gmra.mxu1 %v3122_v60 }
 0x423   : > { %v3071_v53 = vpop.f32.mrf.mxu0 }
 0x424   : > { %v3072_v48 = vadd.f32 %v4476_v52, %v3071_v53 }
 0x426   : > { %v3108_v36 = vmax.f32 %v3072_v48, 0.0 }
 0x42b   : > { %v3073_v24 = vpop.f32.mrf.mxu0 }
 0x42c   : > { %v3074_v54 = vadd.f32 %v4476_v52, %v3073_v24 }
 0x42e   : > { %v3109_v45 = vmax.f32 %v3074_v54, 0.0 }
 0x430   : > { %v3123_v38 = vpack.c.bf16 %v3109_v45, %v3108_v36 }
 0x432   : > { %3211 = vmatmul.bf16.gmra.mxu1 %v3123_v38 }
 0x433   : > { %v3076_v9 = vpop.f32.mrf.mxu0 }
 0x434   : > { %v3077_v7 = vadd.f32 %v4476_v52, %v3076_v9 }
 0x436   : > { %v3110_v28 = vmax.f32 %v3077_v7, 0.0 }
 0x43b   : > { %v3078_v49 = vpop.f32.mrf.mxu0 }
 0x43c   : > { %v3079_v29 = vadd.f32 %v4476_v52, %v3078_v49 }
 0x43e   : > { %v3111_v18 = vmax.f32 %v3079_v29, 0.0 }
 0x440   : > { %v3124_v12 = vpack.c.bf16 %v3111_v18, %v3110_v28 }
 0x442   : > { %3216 = vmatmul.bf16.gmra.mxu1 %v3124_v12 }
 0x443   : > { %v3081_v44 = vpop.f32.mrf.mxu0 }
 0x444   : > { %v3082_v47 = vadd.f32 %v4476_v52, %v3081_v44 }
 0x446   : > { %v3112_v62 = vmax.f32 %v3082_v47, 0.0 }
 0x44b   : > { %v3083_v42 = vpop.f32.mrf.mxu0 }
 0x44c   : > { %v3084_v25 = vadd.f32 %v4476_v52, %v3083_v42 }
 0x44e   : > { %v3113_v63 = vmax.f32 %v3084_v25, 0.0 }
 0x450   : > { %v3125_v6 = vpack.c.bf16 %v3113_v63, %v3112_v62 }
 0x452   : > { %3221 = vmatmul.bf16.gmra.mxu1 %v3125_v6 }
 0x453   : > { %v3086_v0 = vpop.f32.mrf.mxu0 }
 0x454   : > { %v3087_v58 = vadd.f32 %v4476_v52, %v3086_v0 }
 0x456   : > { %v3114_v61 = vmax.f32 %v3087_v58, 0.0 }
 0x45b   : > { %v3088_v55 = vpop.f32.mrf.mxu0 }
 0x45c   : > { %v3089_v13 = vadd.f32 %v4476_v52, %v3088_v55 }
 0x45e   : > { %v3115_v59 = vmax.f32 %v3089_v13, 0.0 }
 0x460   : > { %v3126_v32 = vpack.c.bf16 %v3115_v59, %v3114_v61 }
 0x462   : > { %3226 = vmatmul.bf16.gmra.mxu1 %v3126_v32 }
 0x463   : > { %v3091_v26 = vpop.f32.mrf.mxu0 }
 0x464   : > { %v3092_v57 = vadd.f32 %v4476_v52, %v3091_v26 }
 0x466   : > { %v3116_v8 = vmax.f32 %v3092_v57, 0.0 }
 0x46b   : > { %v3093_v31 = vpop.f32.mrf.mxu0 }
 0x46c   : > { %v3094_v56 = vadd.f32 %v4476_v52, %v3093_v31 }
 0x46e   : > { %v3117_v43 = vmax.f32 %v3094_v56, 0.0 }
 0x470   : > { %v3127_v37 = vpack.c.bf16 %v3117_v43, %v3116_v8 }
 0x472   : > { %3231 = vmatmul.bf16.gmra.mxu1 %v3127_v37 }
 0x473   : > { %v3096_v1 = vpop.f32.mrf.mxu0 }
 0x474   : > { %v3097_v10 = vadd.f32 %v4476_v52, %v3096_v1 }
 0x476   : > { %v3118_v21 = vmax.f32 %v3097_v10, 0.0 }
 0x47b   : > { %v3098_v35 = vpop.f32.mrf.mxu0 }
 0x47c   : > { %v3099_v19 = vadd.f32 %v4476_v52, %v3098_v35 }
 0x47e   : > { %v3119_v46 = vmax.f32 %v3099_v19, 0.0 }
 0x480   : > { %v3128_v20 = vpack.c.bf16 %v3119_v46, %v3118_v21 }
 0x482   : > { %3236 = vmatmul.bf16.gmra.mxu1 %v3128_v20 }
 0x483   : > { %v3101_v17 = vpop.f32.mrf.mxu0 }
 0x484   : > { %v3102_v3 = vadd.f32 %v4476_v52, %v3101_v17 }
 0x486   : > { %v3120_v27 = vmax.f32 %v3102_v3, 0.0 }
 0x48b   : > { %v3103_v41 = vpop.f32.mrf.mxu0 }
 0x48c   : > { %v3104_v51 = vadd.f32 %v4476_v52, %v3103_v41 }
 0x48e   : > { %v3121_v4 = vmax.f32 %v3104_v51, 0.0 }
 0x490   : > { %v3129_v15 = vpack.c.bf16 %v3121_v4, %v3120_v27 }
 0x492   : > { %3241 = vmatmul.bf16.gmra.mxu1 %v3129_v15 }
 0x49f   : > { %v3207_v11 = vpop.f32.mrf.mxu1 }
 0x4a0   : > { %v3208_v14 = vadd.f32 %v4477_v33, %v3207_v11 }
 0x4a2   : > { %3247 = vmax.xlane.f32.xlu0 %v3208_v14 }
 0x4a7   : > { %v3209_v23 = vpop.f32.mrf.mxu1 }
 0x4a8   : > { %v3210_v22 = vadd.f32 %v4477_v33, %v3209_v23 }
 0x4aa   : > { %3249 = vmax.xlane.f32.xlu0 %v3210_v22 }
 0x4af   : > { %v3212_v5 = vpop.f32.mrf.mxu1 }
 0x4b0   : > { %v3213_v39 = vadd.f32 %v4477_v33, %v3212_v5 }
 0x4b2   : > { %3251 = vmax.xlane.f32.xlu1 %v3213_v39 }
 0x4b7   : > { %v3214_v30 = vpop.f32.mrf.mxu1 }
 0x4b8   : > { %v3215_v50 = vadd.f32 %v4477_v33, %v3214_v30 }
 0x4ba   : > { %3253 = vmax.xlane.f32.xlu1 %v3215_v50 }
 0x4bf   : > { %v3217_v52 = vpop.f32.mrf.mxu1 }
 0x4c0   : > { %v3218_v16 = vadd.f32 %v4477_v33, %v3217_v52 }
 0x4c2   : > { %3255 = vmax.xlane.f32.xlu2 %v3218_v16 }
 0x4c7   : > { %v3219_v34 = vpop.f32.mrf.mxu1 }
 0x4c8   : > { %v3220_v40 = vadd.f32 %v4477_v33, %v3219_v34 }
 0x4ca   : > { %3257 = vmax.xlane.f32.xlu2 %v3220_v40 }
 0x4cf   : > { %v3222_v2 = vpop.f32.mrf.mxu1 }
 0x4d0   : > { %v6392_v60 = vadd.f32 %v4477_v33, %v3222_v2 }
 0x4d2   : > { %3259 = vmax.xlane.f32.xlu0 %v6392_v60 }
 0x4d7   : > { %v3224_v53 = vpop.f32.mrf.mxu1 }
 0x4d8   : > { %v6395_v48 = vadd.f32 %v4477_v33, %v3224_v53 }
 0x4da   : > { %3261 = vmax.xlane.f32.xlu1 %v6395_v48 }
 0x4df   : > { %v3227_v24 = vpop.f32.mrf.mxu1 }
 0x4e0   : > { %v6398_v54 = vadd.f32 %v4477_v33, %v3227_v24 }
 0x4e2   : > { %3263 = vmax.xlane.f32.xlu2 %v6398_v54 }
 0x4e7   : > { %v3229_v36 = vpop.f32.mrf.mxu1 }
 0x4e8   : > { %v6401_v45 = vadd.f32 %v4477_v33, %v3229_v36 }
 0x4ea   : > { %3265 = vmax.xlane.f32.xlu0 %v6401_v45 }
 0x4ef   : > { %v3232_v38 = vpop.f32.mrf.mxu1 }
 0x4f0   : > { %v6404_v9 = vadd.f32 %v4477_v33, %v3232_v38 }
 0x4f2   : > { %3267 = vmax.xlane.f32.xlu1 %v6404_v9 }
 0x4f7   : > { %v3234_v7 = vpop.f32.mrf.mxu1 }
 0x4f8   : > { %v6407_v49 = vadd.f32 %v4477_v33, %v3234_v7 }
 0x4fa   : > { %3269 = vmax.xlane.f32.xlu2 %v6407_v49 }
 0x4ff   : > { %v3237_v29 = vpop.f32.mrf.mxu1 }
 0x500   : > { %v6410_v28 = vadd.f32 %v4477_v33, %v3237_v29 }
 0x502   : > { %3271 = vmax.xlane.f32.xlu0 %v6410_v28 }
 0x507   : > { %v3239_v18 = vpop.f32.mrf.mxu1 }
 0x508   : > { %v6413_v12 = vadd.f32 %v4477_v33, %v3239_v18 }
 0x50a   : > { %3273 = vmax.xlane.f32.xlu1 %v6413_v12 }
 0x50f   : > { %v3242_v44 = vpop.f32.mrf.mxu1 }
 0x510   : > { %v6416_v47 = vadd.f32 %v4477_v33, %v3242_v44 }
 0x512   : > { %3275 = vmax.xlane.f32.xlu2 %v6416_v47 }
 0x515   : > { %v3248_v42 = vpop.xlane.xlu0 %3247 }
 0x516   : > { %v6419_v25 = vsub.f32 %v3208_v14, %v3248_v42 }
 0x517   : > { %v3244_v62 = vpop.f32.mrf.mxu1 }
 0x518   : > { %v3295_v63 = vmul.f32 1.442695, %v6419_v25  ;;  %v6422_v6 = vadd.f32 %v4477_v33, %v3244_v62 }
 0x51a   : > { %4478 = vpow2.f32 %v3295_v63  ;;  %3277 = vmax.xlane.f32.xlu0 %v6422_v6 }
 0x51d   : > { %v3250_v0 = vpop.xlane.xlu0 %3249 }
 0x51e   : > { %v6425_v58 = vsub.f32 %v3210_v22, %v3250_v0 }
 0x520   : > { %v4479_v55 = vpop.eup %4478  ;;  %v3297_v13 = vmul.f32 1.442695, %v6425_v58 }
 0x521   : > { %3327 = vadd.xlane.f32.xlu1 %v4479_v55 }
 0x522   : > { %4480 = vpow2.f32 %v3297_v13 }
 0x525   : > { %v3252_v61 = vpop.xlane.xlu1 %3251 }
 0x526   : > { %v6428_v59 = vsub.f32 %v3213_v39, %v3252_v61 }
 0x528   : > { %v4481_v32 = vpop.eup %4480  ;;  %v3299_v26 = vmul.f32 1.442695, %v6428_v59 }
 0x529   : > { %3329 = vadd.xlane.f32.xlu2 %v4481_v32 }
 0x52a   : > { %4482 = vpow2.f32 %v3299_v26 }
 0x52d   : > { %v3254_v57 = vpop.xlane.xlu1 %3253 }
 0x52e   : > { %v6431_v31 = vsub.f32 %v3215_v50, %v3254_v57 }
 0x530   : > { %v4483_v56 = vpop.eup %4482  ;;  %v3301_v8 = vmul.f32 1.442695, %v6431_v31 }
 0x531   : > { %3331 = vadd.xlane.f32.xlu0 %v4483_v56 }
 0x532   : > { %4484 = vpow2.f32 %v3301_v8 }
 0x535   : > { %v3256_v43 = vpop.xlane.xlu2 %3255 }
 0x536   : > { %v6434_v37 = vsub.f32 %v3218_v16, %v3256_v43 }
 0x538   : > { %v4485_v1 = vpop.eup %4484  ;;  %v3303_v10 = vmul.f32 1.442695, %v6434_v37 }
 0x539   : > { %3333 = vadd.xlane.f32.xlu1 %v4485_v1 }
 0x53a   : > { %4486 = vpow2.f32 %v3303_v10 }
 0x53d   : > { %v3258_v35 = vpop.xlane.xlu2 %3257 }
 0x53e   : > { %v6437_v19 = vsub.f32 %v3220_v40, %v3258_v35 }
 0x540   : > { %v4487_v21 = vpop.eup %4486  ;;  %v3305_v46 = vmul.f32 1.442695, %v6437_v19 }
 0x541   : > { %3335 = vadd.xlane.f32.xlu2 %v4487_v21 }
 0x542   : > { %4488 = vpow2.f32 %v3305_v46 }
 0x545   : > { %v3260_v20 = vpop.xlane.xlu0 %3259 }
 0x546   : > { %v6441_v17 = vsub.f32 %v6392_v60, %v3260_v20 }
 0x548   : > { %v4489_v3 = vpop.eup %4488  ;;  %v3307_v41 = vmul.f32 1.442695, %v6441_v17 }
 0x549   : > { %3337 = vadd.xlane.f32.xlu0 %v4489_v3 }
 0x54a   : > { %4490 = vpow2.f32 %v3307_v41 }
 0x54d   : > { %v3262_v51 = vpop.xlane.xlu1 %3261 }
 0x54e   : > { %v6445_v27 = vsub.f32 %v6395_v48, %v3262_v51 }
 0x550   : > { %v4491_v4 = vpop.eup %4490  ;;  %v3309_v15 = vmul.f32 1.442695, %v6445_v27 }
 0x551   : > { %3339 = vadd.xlane.f32.xlu1 %v4491_v4 }
 0x552   : > { %4492 = vpow2.f32 %v3309_v15 }
 0x555   : > { %v3264_v33 = vpop.xlane.xlu2 %3263 }
 0x556   : > { %v6449_v11 = vsub.f32 %v6398_v54, %v3264_v33 }
 0x558   : > { %v4493_v14 = vpop.eup %4492  ;;  %v3311_v23 = vmul.f32 1.442695, %v6449_v11 }
 0x559   : > { %3341 = vadd.xlane.f32.xlu2 %v4493_v14 }
 0x55a   : > { %4494 = vpow2.f32 %v3311_v23 }
 0x55d   : > { %v3266_v22 = vpop.xlane.xlu0 %3265 }
 0x55e   : > { %v6453_v5 = vsub.f32 %v6401_v45, %v3266_v22 }
 0x560   : > { %v4495_v39 = vpop.eup %4494  ;;  %v3313_v30 = vmul.f32 1.442695, %v6453_v5 }
 0x561   : > { %3343 = vadd.xlane.f32.xlu0 %v4495_v39 }
 0x562   : > { %4496 = vpow2.f32 %v3313_v30 }
 0x565   : > { %v3268_v50 = vpop.xlane.xlu1 %3267 }
 0x566   : > { %v6457_v52 = vsub.f32 %v6404_v9, %v3268_v50 }
 0x568   : > { %v4497_v16 = vpop.eup %4496  ;;  %v3315_v34 = vmul.f32 1.442695, %v6457_v52 }
 0x569   : > { %3345 = vadd.xlane.f32.xlu1 %v4497_v16 }
 0x56a   : > { %4498 = vpow2.f32 %v3315_v34 }
 0x56d   : > { %v3270_v40 = vpop.xlane.xlu2 %3269 }
 0x56e   : > { %v6461_v2 = vsub.f32 %v6407_v49, %v3270_v40 }
 0x570   : > { %v4499_v60 = vpop.eup %4498  ;;  %v3317_v53 = vmul.f32 1.442695, %v6461_v2 }
 0x571   : > { %3347 = vadd.xlane.f32.xlu2 %v4499_v60 }
 0x572   : > { %4500 = vpow2.f32 %v3317_v53 }
 0x575   : > { %v3272_v48 = vpop.xlane.xlu0 %3271 }
 0x576   : > { %v6465_v24 = vsub.f32 %v6410_v28, %v3272_v48 }
 0x578   : > { %v4501_v54 = vpop.eup %4500  ;;  %v3319_v36 = vmul.f32 1.442695, %v6465_v24 }
 0x579   : > { %3349 = vadd.xlane.f32.xlu0 %v4501_v54 }
 0x57a   : > { %4502 = vpow2.f32 %v3319_v36 }
 0x57d   : > { %v3274_v45 = vpop.xlane.xlu1 %3273 }
 0x57e   : > { %v6469_v38 = vsub.f32 %v6413_v12, %v3274_v45 }
 0x580   : > { %v4503_v9 = vpop.eup %4502  ;;  %v3321_v7 = vmul.f32 1.442695, %v6469_v38 }
 0x581   : > { %3351 = vadd.xlane.f32.xlu1 %v4503_v9 }
 0x582   : > { %4504 = vpow2.f32 %v3321_v7 }
 0x585   : > { %v3276_v49 = vpop.xlane.xlu2 %3275 }
 0x586   : > { %v6473_v29 = vsub.f32 %v6416_v47, %v3276_v49 }
 0x588   : > { %v4505_v28 = vpop.eup %4504  ;;  %v3323_v18 = vmul.f32 1.442695, %v6473_v29 }
 0x589   : > { %3353 = vadd.xlane.f32.xlu2 %v4505_v28 }
 0x58a   : > { %4506 = vpow2.f32 %v3323_v18 }
 0x58d   : > { %v3278_v44 = vpop.xlane.xlu0 %3277 }
 0x58e   : > { %v6477_v42 = vsub.f32 %v6422_v6, %v3278_v44 }
 0x590   : > { %v4507_v12 = vpop.eup %4506  ;;  %v3325_v62 = vmul.f32 1.442695, %v6477_v42 }
 0x591   : > { %3355 = vadd.xlane.f32.xlu0 %v4507_v12 }
 0x592   : > { %4508 = vpow2.f32 %v3325_v62 }
 0x594   : > { %v3328_v63 = vpop.xlane.xlu1 %3327 }
 0x595   : > { %4510 = vlog2.f32 %v3328_v63 }
 0x598   : > { %v4509_v0 = vpop.eup %4508 }
 0x599   : > { %3357 = vadd.xlane.f32.xlu1 %v4509_v0 }
 0x59b   : > { %v4511_v47 = vpop.eup %4510 }
 0x59c   : > { %v3360_v55 = vmul.f32 0.6931472, %v4511_v47  ;;  %v3330_v13 = vpop.xlane.xlu2 %3329 }
 0x59d   : > { %4512 = vlog2.f32 %v3330_v13 }
 0x59e   : > { %v3391_v6 = vsub.f32 %v6419_v25, %v3360_v55 }
 0x5a0   : > { %3408 = vst.msk [vmem:[%s6484_s10] sm:$0xff] %vm3407_vm1, %v3391_v6 }
 0x5a3   : > { %v4513_v61 = vpop.eup %4512 }
 0x5a4   : > { %v3362_v32 = vmul.f32 0.6931472, %v4513_v61  ;;  %v3332_v26 = vpop.xlane.xlu0 %3331 }
 0x5a5   : > { %4514 = vlog2.f32 %v3332_v26 }
 0x5a6   : > { %v3392_v57 = vsub.f32 %v6425_v58, %v3362_v32 }
 0x5a8   : > { %3409 = vst.msk [vmem:[%s6484_s10 + $0x8] sm:$0xff] %vm3407_vm1, %v3392_v57 }
 0x5ab   : > { %v4515_v56 = vpop.eup %4514 }
 0x5ac   : > { %v3364_v8 = vmul.f32 0.6931472, %v4515_v56  ;;  %v3334_v43 = vpop.xlane.xlu1 %3333 }
 0x5ad   : > { %4516 = vlog2.f32 %v3334_v43 }
 0x5ae   : > { %v3393_v1 = vsub.f32 %v6428_v59, %v3364_v8 }
 0x5b0   : > { %3410 = vst.msk [vmem:[%s6484_s10 + $0x10] sm:$0xff] %vm3407_vm1, %v3393_v1 }
 0x5b3   : > { %v4517_v25 = vpop.eup %4516 }
 0x5b4   : > { %v3366_v10 = vmul.f32 0.6931472, %v4517_v25  ;;  %v3336_v35 = vpop.xlane.xlu2 %3335 }
 0x5b5   : > { %4518 = vlog2.f32 %v3336_v35 }
 0x5b6   : > { %v3394_v21 = vsub.f32 %v6431_v31, %v3366_v10 }
 0x5b8   : > { %3411 = vst.msk [vmem:[%s6484_s10 + $0x18] sm:$0xff] %vm3407_vm1, %v3394_v21 }
 0x5bb   : > { %v4519_v58 = vpop.eup %4518 }
 0x5bc   : > { %v3368_v46 = vmul.f32 0.6931472, %v4519_v58  ;;  %v3338_v20 = vpop.xlane.xlu0 %3337 }
 0x5bd   : > { %4520 = vlog2.f32 %v3338_v20 }
 0x5be   : > { %v3395_v3 = vsub.f32 %v6434_v37, %v3368_v46 }
 0x5c0   : > { %3412 = vst.msk [vmem:[%s6484_s10 + $0x20] sm:$0xff] %vm3407_vm1, %v3395_v3 }
 0x5c3   : > { %v4521_v59 = vpop.eup %4520 }
 0x5c4   : > { %v3370_v41 = vmul.f32 0.6931472, %v4521_v59  ;;  %v3340_v51 = vpop.xlane.xlu1 %3339 }
 0x5c5   : > { %4522 = vlog2.f32 %v3340_v51 }
 0x5c6   : > { %v3396_v4 = vsub.f32 %v6437_v19, %v3370_v41 }
 0x5c8   : > { %3413 = vst.msk [vmem:[%s6484_s10 + $0x28] sm:$0xff] %vm3407_vm1, %v3396_v4 }
 0x5cb   : > { %v4523_v31 = vpop.eup %4522 }
 0x5cc   : > { %v3372_v15 = vmul.f32 0.6931472, %v4523_v31  ;;  %v3342_v33 = vpop.xlane.xlu2 %3341 }
 0x5cd   : > { %4524 = vlog2.f32 %v3342_v33 }
 0x5ce   : > { %v3397_v14 = vsub.f32 %v6441_v17, %v3372_v15 }
 0x5d0   : > { %3414 = vst.msk [vmem:[%s6484_s10 + $0x30] sm:$0xff] %vm3407_vm1, %v3397_v14 }
 0x5d3   : > { %v4525_v37 = vpop.eup %4524 }
 0x5d4   : > { %v3374_v23 = vmul.f32 0.6931472, %v4525_v37  ;;  %v3344_v22 = vpop.xlane.xlu0 %3343 }
 0x5d5   : > { %4526 = vlog2.f32 %v3344_v22 }
 0x5d6   : > { %v3398_v39 = vsub.f32 %v6445_v27, %v3374_v23 }
 0x5d8   : > { %3415 = vst.msk [vmem:[%s6484_s10 + $0x38] sm:$0xff] %vm3407_vm1, %v3398_v39 }
 0x5db   : > { %v4527_v19 = vpop.eup %4526 }
 0x5dc   : > { %v3376_v30 = vmul.f32 0.6931472, %v4527_v19  ;;  %v3346_v50 = vpop.xlane.xlu1 %3345 }
 0x5dd   : > { %4528 = vlog2.f32 %v3346_v50 }
 0x5de   : > { %v3399_v16 = vsub.f32 %v6449_v11, %v3376_v30 }
 0x5e0   : > { %3416 = vst.msk [vmem:[%s6484_s10 + $0x40] sm:$0xff] %vm3407_vm1, %v3399_v16 }
 0x5e3   : > { %v4529_v17 = vpop.eup %4528 }
 0x5e4   : > { %v3378_v34 = vmul.f32 0.6931472, %v4529_v17  ;;  %v3348_v40 = vpop.xlane.xlu2 %3347 }
 0x5e5   : > { %4530 = vlog2.f32 %v3348_v40 }
 0x5e6   : > { %v3400_v60 = vsub.f32 %v6453_v5, %v3378_v34 }
 0x5e8   : > { %3417 = vst.msk [vmem:[%s6484_s10 + $0x48] sm:$0xff] %vm3407_vm1, %v3400_v60 }
 0x5eb   : > { %v4531_v27 = vpop.eup %4530 }
 0x5ec   : > { %v3380_v53 = vmul.f32 0.6931472, %v4531_v27  ;;  %v3350_v48 = vpop.xlane.xlu0 %3349 }
 0x5ed   : > { %4532 = vlog2.f32 %v3350_v48 }
 0x5ee   : > { %v3401_v54 = vsub.f32 %v6457_v52, %v3380_v53 }
 0x5f0   : > { %3418 = vst.msk [vmem:[%s6484_s10 + $0x50] sm:$0xff] %vm3407_vm1, %v3401_v54 }
 0x5f3   : > { %v4533_v11 = vpop.eup %4532 }
 0x5f4   : > { %v3382_v36 = vmul.f32 0.6931472, %v4533_v11  ;;  %v3352_v45 = vpop.xlane.xlu1 %3351 }
 0x5f5   : > { %4534 = vlog2.f32 %v3352_v45 }
 0x5f6   : > { %v3402_v9 = vsub.f32 %v6461_v2, %v3382_v36 }
 0x5f8   : > { %3419 = vst.msk [vmem:[%s6484_s10 + $0x58] sm:$0xff] %vm3407_vm1, %v3402_v9 }
 0x5fb   : > { %v4535_v5 = vpop.eup %4534 }
 0x5fc   : > { %v3384_v7 = vmul.f32 0.6931472, %v4535_v5  ;;  %v3354_v49 = vpop.xlane.xlu2 %3353 }
 0x5fd   : > { %4536 = vlog2.f32 %v3354_v49 }
 0x5fe   : > { %v3403_v28 = vsub.f32 %v6465_v24, %v3384_v7 }
 0x600   : > { %3420 = vst.msk [vmem:[%s6484_s10 + $0x60] sm:$0xff] %vm3407_vm1, %v3403_v28 }
 0x603   : > { %v4537_v52 = vpop.eup %4536 }
 0x604   : > { %v3386_v18 = vmul.f32 0.6931472, %v4537_v52  ;;  %v3356_v44 = vpop.xlane.xlu0 %3355 }
 0x605   : > { %4538 = vlog2.f32 %v3356_v44 }
 0x606   : > { %v3404_v12 = vsub.f32 %v6469_v38, %v3386_v18 }
 0x608   : > { %3421 = vst.msk [vmem:[%s6484_s10 + $0x68] sm:$0xff] %vm3407_vm1, %v3404_v12 }
 0x60b   : > { %v4539_v2 = vpop.eup %4538 }
 0x60c   : > { %v3388_v62 = vmul.f32 0.6931472, %v4539_v2  ;;  %v3358_v63 = vpop.xlane.xlu1 %3357 }
 0x60d   : > { %4540 = vlog2.f32 %v3358_v63 }
 0x60e   : > { %v3405_v0 = vsub.f32 %v6473_v29, %v3388_v62 }
 0x610   : > { %3422 = vst.msk [vmem:[%s6484_s10 + $0x70] sm:$0xff] %vm3407_vm1, %v3405_v0 }
 0x613   : > { %v4541_v24 = vpop.eup %4540 }
 0x614   : > { %v3390_v47 = vmul.f32 0.6931472, %v4541_v24 }
 0x616   : > { %v3406_v55 = vsub.f32 %v6477_v42, %v3390_v47 }
 0x618   : > { %3423 = vst.msk [vmem:[%s6484_s10 + $0x78] sm:$0xff] %vm3407_vm1, %v3406_v55 }
 0x619 PF: > { %s19_s30 = sadd.s32 1, %s4549_s30  }
 0x61a   : > { %p16_p4 = scmp.ge.s32.totalorder %s19_s30, 4  }
 0x61c   :  { %18 = sbr.rel (!%p16_p4) target bundleno = 1 (0x1), region = 86 }

</bundles_post_ra>
